<compile_context>
chip_gen: v7x
topology: tpu7x:2x2x1
jax: 0.10.0
libtpu: 0.0.40
codegen_flags: <defaults>
</compile_context>

<pallas_src>
import functools

import jax
import jax.numpy as jnp
import numpy as np
from jax.experimental import pallas as pl
from jax.experimental.pallas import tpu as pltpu


# ---------------------------------------------------------------------------
# Kernel 1: fused pyramid towers (2-layer LSTM recurrence per level).
# ---------------------------------------------------------------------------
def tower_kernel(nsteps_ref, gx_ref, whh0_ref, w1cat_ref, b1_ref, out_ref,
                 *, hidden, max_steps, min_steps):
    lvl = pl.program_id(0)
    n_steps = nsteps_ref[lvl]                 # valid #steps for this level (SMEM)

    H = hidden
    B = out_ref.shape[1]
    whh0 = whh0_ref[0]                        # [H, 4H]
    w1cat = w1cat_ref[0]                      # [2H, 4H] = [[Wih1^T], [Whh1^T]]
    b1 = jnp.broadcast_to(b1_ref[0], (B, 4 * H))   # hoisted bias broadcast

    def lstm_act(gates, c):
        # One sigmoid + one tanh over the full [B, 4H] vreg, then static lane views.
        # (PyTorch gate order i, f, g, o.)
        sig = jax.nn.sigmoid(gates)
        th = jnp.tanh(gates)
        i = sig[:, 0:H]
        f = sig[:, H:2 * H]
        g = th[:, 2 * H:3 * H]
        o = sig[:, 3 * H:4 * H]
        c_new = f * c + i * g
        h_new = o * jnp.tanh(c_new)
        return h_new, c_new

    z = jnp.zeros((B, H), jnp.float32)
    h0, c0, h1, c1 = z, z, z, z
    # Fully unrolled.  Layer-0 input projection is already folded into gx (one big
    # matmul in the wrapper), so each step is only h @ Whh (layer 0) and one fused
    # [B,2H]@[2H,4H] dot (layer 1).
    for t in range(max_steps):
        g0 = gx_ref[0, t] + jnp.dot(h0, whh0, preferred_element_type=jnp.float32)
        h0, c0 = lstm_act(g0, c0)
        hcat = jnp.concatenate([h0, h1], axis=1)                      # [B, 2H]
        g1 = jnp.dot(hcat, w1cat, preferred_element_type=jnp.float32) + b1
        h1n, c1n = lstm_act(g1, c1)
        if t < min_steps:
            # Every level runs at least `min_steps` steps: no masking needed.
            h1, c1 = h1n, c1n
        else:
            # Freeze layer-1 state on padded tail steps (scalar-mask blend).
            m = (t < n_steps).astype(jnp.float32)
            h1 = h1 + m * (h1n - h1)
            c1 = c1 + m * (c1n - c1)
    out_ref[0] = h1


def run_towers(combined, params, levels):
    """combined: [B, L, D] -> [NL, B, H] last hidden states of each tower."""
    B, L, D = combined.shape
    lstm_ps = params['lstm']
    H = lstm_ps[0]['whh0'].shape[1]
    NL = len(levels)
    n_steps = [-(-L // lvl) for lvl in levels]
    max_steps = max(n_steps)
    min_steps = min(n_steps)

    gx_all, whh0_all, w1cat_all, b1_all = [], [], [], []
    for lvl, n, p in zip(levels, n_steps, lstm_ps):
        Lp = n * lvl
        xp = jnp.pad(combined, ((0, 0), (0, Lp - L), (0, 0)))   # zero pad (F.pad)
        pooled = xp.reshape(B, n, lvl, D).mean(axis=2)          # [B, n, D]
        pooled = pooled + params['pos_table'][:n][None]         # positional encoding
        # Hoisted layer-0 input projection for ALL timesteps (one matmul, XLA fuses).
        gx = pooled @ p['wih0'].T + (p['bih0'] + p['bhh0'])     # [B, n, 4H]
        gx = jnp.transpose(gx, (1, 0, 2))                       # [n, B, 4H] time-major
        gx = jnp.pad(gx, ((0, max_steps - n), (0, 0), (0, 0)))
        gx_all.append(gx)
        whh0_all.append(p['whh0'].T)                                            # [H, 4H]
        w1cat_all.append(jnp.concatenate([p['wih1'].T, p['whh1'].T], axis=0))   # [2H, 4H]
        b1_all.append((p['bih1'] + p['bhh1'])[None, :])                         # [1, 4H]

    gx_all = jnp.stack(gx_all, 0)          # [NL, max_steps, B, 4H]
    whh0_all = jnp.stack(whh0_all, 0)      # [NL, H, 4H]
    w1cat_all = jnp.stack(w1cat_all, 0)    # [NL, 2H, 4H]
    b1_all = jnp.stack(b1_all, 0)          # [NL, 1, 4H]
    nsteps_arr = jnp.asarray(n_steps, jnp.int32)

    kernel = functools.partial(tower_kernel, hidden=H, max_steps=max_steps,
                               min_steps=min_steps)
    return pl.pallas_call(
        kernel,
        out_shape=jax.ShapeDtypeStruct((NL, B, H), jnp.float32),
        grid_spec=pltpu.PrefetchScalarGridSpec(
            num_scalar_prefetch=1,
            grid=(NL,),
            in_specs=[
                pl.BlockSpec((1, max_steps, B, 4 * H), lambda l, ns: (l, 0, 0, 0)),
                pl.BlockSpec((1, H, 4 * H), lambda l, ns: (l, 0, 0)),
                pl.BlockSpec((1, 2 * H, 4 * H), lambda l, ns: (l, 0, 0)),
                pl.BlockSpec((1, 1, 4 * H), lambda l, ns: (l, 0, 0)),
            ],
            out_specs=pl.BlockSpec((1, B, H), lambda l, ns: (l, 0, 0)),
        ),
        compiler_params=pltpu.CompilerParams(dimension_semantics=("parallel",)),
    )(nsteps_arr, gx_all, whh0_all, w1cat_all, b1_all)


# ---------------------------------------------------------------------------
# Kernel 2: multi-head self-attention over the pyramid levels + fusion MLP.
# ---------------------------------------------------------------------------
def attn_fusion_kernel(feats_ref, wq_ref, wk_ref, wv_ref, bq_ref, bk_ref, bv_ref,
                       wo_ref, bo_ref, w1_ref, b1_ref, w2_ref, b2_ref, out_ref,
                       *, nh, batch, n_levels):
    rows = feats_ref[...]                                   # [B*NL, H], (b, l) order
    R, H = rows.shape
    hd = wq_ref.shape[-1]
    scale = 1.0 / float(hd) ** 0.5

    acc = jnp.zeros((R, H), jnp.float32)
    for h in range(nh):                                     # small static head loop
        qh = jnp.dot(rows, wq_ref[h], preferred_element_type=jnp.float32) + bq_ref[h]
        kh = jnp.dot(rows, wk_ref[h], preferred_element_type=jnp.float32) + bk_ref[h]
        vh = jnp.dot(rows, wv_ref[h], preferred_element_type=jnp.float32) + bv_ref[h]
        q3 = qh.reshape(batch, n_levels, hd) * scale        # sublane-split reshapes
        k3 = kh.reshape(batch, n_levels, hd)
        v3 = vh.reshape(batch, n_levels, hd)
        s = jnp.einsum('bld,bmd->blm', q3, k3, preferred_element_type=jnp.float32)
        s = s - jnp.max(s, axis=-1, keepdims=True)
        p = jnp.exp(s)
        p = p * pl.reciprocal(jnp.sum(p, axis=-1, keepdims=True), approx=True)
        ctx = jnp.einsum('blm,bmd->bld', p, v3, preferred_element_type=jnp.float32)
        # accumulate the per-head output projection (avoids head concatenation)
        acc = acc + jnp.dot(ctx.reshape(R, hd), wo_ref[h],
                            preferred_element_type=jnp.float32)
    attn = (acc + bo_ref[...]).reshape(batch, n_levels, H)  # [B, NL, H]

    # Fusion layer 1 with per-level weight blocks: equivalent to
    # concat_l(attn[:, l, :]) @ W1^T but without a lane-merging reshape.
    F1 = w1_ref.shape[-1]
    hid = jnp.zeros((batch, F1), jnp.float32)
    for l in range(n_levels):
        hid = hid + jnp.dot(attn[:, l, :], w1_ref[l],
                            preferred_element_type=jnp.float32)
    hid = jnp.maximum(hid + b1_ref[...], 0.0)
    out_ref[...] = (jnp.dot(hid, w2_ref[...], preferred_element_type=jnp.float32)
                    + b2_ref[...])


def run_attn_fusion(feats, params, nh, pred_steps):
    """feats: [NL, B, H] -> [B, pred_steps]."""
    NL, B, H = feats.shape
    hd = H // nh
    rows = jnp.transpose(feats, (1, 0, 2)).reshape(B * NL, H)    # (b, l) row order

    wq, wk, wv = jnp.split(params['in_proj_w'], 3, axis=0)       # each [H, H]
    bq, bk, bv = jnp.split(params['in_proj_b'], 3)               # each [H]

    def split_heads_w(w):     # [H, H] -> [nh, H, hd]; head h: x @ w[h*hd:(h+1)*hd].T
        return jnp.transpose(w.reshape(nh, hd, H), (0, 2, 1))

    def split_heads_b(b):     # [H] -> [nh, 1, hd]
        return b.reshape(nh, 1, hd)

    wo_split = params['out_proj_w'].T.reshape(nh, hd, H)         # [nh, hd, H]
    bo = params['out_proj_b'][None, :]
    w1_split = params['w1'].T.reshape(NL, H, params['w1'].shape[0])   # [NL, H, 128]

    kernel = functools.partial(attn_fusion_kernel, nh=nh, batch=B, n_levels=NL)
    vmem = pl.BlockSpec(memory_space=pltpu.MemorySpace.VMEM)
    return pl.pallas_call(
        kernel,
        out_shape=jax.ShapeDtypeStruct((B, pred_steps), jnp.float32),
        in_specs=[vmem] * 13,
        out_specs=vmem,
    )(rows,
      split_heads_w(wq), split_heads_w(wk), split_heads_w(wv),
      split_heads_b(bq), split_heads_b(bk), split_heads_b(bv),
      wo_split, bo,
      w1_split, params['b1'][None, :],
      params['w2'].T, params['b2'][None, :])


# ---------------------------------------------------------------------------
# Full forward (glue in XLA, hot paths in the two Pallas kernels)
# ---------------------------------------------------------------------------
def pyramid_lstm_forward(x, graph_feat, params, levels, nh, pred_steps):
    B, L = x.shape
    gdim = graph_feat.shape[-1]
    combined = jnp.concatenate(
        [x[:, :, None], jnp.broadcast_to(graph_feat[:, None, :], (B, L, gdim))],
        axis=-1).astype(jnp.float32)                         # [B, L, D]
    feats = run_towers(combined, params, levels)             # [NL, B, H]
    return run_attn_fusion(feats, params, nh, pred_steps)    # [B, pred_steps]


# ---------------------------------------------------------------------------
# Deterministic parameter init (shapes follow the PyTorch module's __init__)
# ---------------------------------------------------------------------------
def init_params(key, input_dim, hidden, levels, pred_steps, max_len=64):
    keys = iter(jax.random.split(key, 64))

    def nrm(shape, scale=0.1):
        return (scale * jax.random.normal(next(keys), shape)).astype(jnp.float32)

    params = {'pos_table': nrm((max_len, hidden)), 'lstm': []}
    for _ in levels:
        params['lstm'].append(dict(
            wih0=nrm((4 * hidden, input_dim)), whh0=nrm((4 * hidden, hidden)),
            bih0=nrm((4 * hidden,)), bhh0=nrm((4 * hidden,)),
            wih1=nrm((4 * hidden, hidden)), whh1=nrm((4 * hidden, hidden)),
            bih1=nrm((4 * hidden,)), bhh1=nrm((4 * hidden,))))
    params['in_proj_w'] = nrm((3 * hidden, hidden))
    params['in_proj_b'] = nrm((3 * hidden,))
    params['out_proj_w'] = nrm((hidden, hidden))
    params['out_proj_b'] = nrm((hidden,))
    fin = hidden * len(levels)
    params['w1'] = nrm((128, fin))
    params['b1'] = nrm((128,))
    params['w2'] = nrm((pred_steps, 128))
    params['b2'] = nrm((pred_steps,))
    return params


# ---------------------------------------------------------------------------
# Pure-JAX reference (mirrors the PyTorch forward, eval mode)
# ---------------------------------------------------------------------------
def reference_forward(x, graph_feat, params, levels, nh):
    B, L = x.shape
    H = params['out_proj_w'].shape[0]
    combined = jnp.concatenate(
        [x[:, :, None],
         jnp.broadcast_to(graph_feat[:, None, :], (B, L, graph_feat.shape[-1]))],
        axis=-1)

    def cell(xt, h, c, wih, whh, bih, bhh):
        g = xt @ wih.T + h @ whh.T + bih + bhh
        i, f, gg, o = jnp.split(g, 4, axis=-1)
        c = jax.nn.sigmoid(f) * c + jax.nn.sigmoid(i) * jnp.tanh(gg)
        h = jax.nn.sigmoid(o) * jnp.tanh(c)
        return h, c

    feats = []
    for lvl, p in zip(levels, params['lstm']):
        Lp = -(-L // lvl) * lvl
        xp = jnp.pad(combined, ((0, 0), (0, Lp - L), (0, 0)))
        pooled = xp.reshape(B, Lp // lvl, lvl, xp.shape[-1]).mean(axis=2)
        pooled = pooled + params['pos_table'][:Lp // lvl][None]
        h0 = c0 = h1 = c1 = jnp.zeros((B, H), jnp.float32)
        for t in range(pooled.shape[1]):
            h0, c0 = cell(pooled[:, t], h0, c0, p['wih0'], p['whh0'], p['bih0'], p['bhh0'])
            h1, c1 = cell(h0, h1, c1, p['wih1'], p['whh1'], p['bih1'], p['bhh1'])
        feats.append(h1)

    A = jnp.stack(feats, axis=1)                       # [B, NL, H]
    NL = len(levels)
    hd = H // nh
    qkv = A @ params['in_proj_w'].T + params['in_proj_b']
    q, k, v = qkv[..., :H], qkv[..., H:2 * H], qkv[..., 2 * H:]
    qh = q.reshape(B, NL, nh, hd).transpose(0, 2, 1, 3)
    kh = k.reshape(B, NL, nh, hd).transpose(0, 2, 1, 3)
    vh = v.reshape(B, NL, nh, hd).transpose(0, 2, 1, 3)
    s = jnp.einsum('bhld,bhmd->bhlm', qh, kh) / jnp.sqrt(hd)
    w = jax.nn.softmax(s, axis=-1)
    ctx = jnp.einsum('bhlm,bhmd->bhld', w, vh).transpose(0, 2, 1, 3).reshape(B, NL, H)
    attn_out = ctx @ params['out_proj_w'].T + params['out_proj_b']
    fused = attn_out.reshape(B, NL * H)
    hid = jax.nn.relu(fused @ params['w1'].T + params['b1'])
    return hid @ params['w2'].T + params['b2']


if __name__ == "__main__":
    B, L = 2, 12
    hidden = 32
    input_dim = hidden          # must equal lstm_hidden for the module's pos-encoding add
    levels = [2, 4, 8]
    nh = 4
    pred_steps = 4

    key = jax.random.PRNGKey(0)
    kx, kg, kp = jax.random.split(key, 3)
    x = jax.random.normal(kx, (B, L), dtype=jnp.float32)
    graph_feat = jax.random.normal(kg, (B, input_dim - 1), dtype=jnp.float32)
    params = init_params(kp, input_dim, hidden, levels, pred_steps)

    fwd = jax.jit(functools.partial(pyramid_lstm_forward,
                                    levels=tuple(levels), nh=nh,
                                    pred_steps=pred_steps))
    out = jax.block_until_ready(fwd(x, graph_feat, params))
    assert out.shape == (B, pred_steps)

    ref = reference_forward(x, graph_feat, params, levels, nh)
    # pl.reciprocal(approx=True) + MXU rounding are the dominant deviations vs the ref.
    np.testing.assert_allclose(np.asarray(out), np.asarray(ref), atol=2e-2, rtol=2e-2)

    # TODO(synk): attention dropout (p=0.1) is eval-mode identity here.
    print("KERNEL_OK")
</pallas_src>

<mosaic_0001>
module attributes {stable_mosaic.version = 11 : i64} {
  func.func @tower_kernel(%arg0: i32, %arg1: memref<3xi32, #tpu.memory_space<smem>>, %arg2: memref<1x6x2x128xf32, #tpu.memory_space<vmem>>, %arg3: memref<1x32x128xf32, #tpu.memory_space<vmem>>, %arg4: memref<1x64x128xf32, #tpu.memory_space<vmem>>, %arg5: memref<1x1x128xf32, #tpu.memory_space<vmem>>, %arg6: memref<1x2x32xf32, #tpu.memory_space<vmem>>) attributes {dimension_semantics = [#tpu.dimension_semantics<parallel>], iteration_bounds = array<i64: 3>, scalar_prefetch = 1 : i64, scratch_operands = 0 : i64, tpu.core_type = #tpu.core_type<tc>, window_params = [{transform_indices = @transform_0, window_bounds = array<i64: 1, 6, 2, 128>}, {transform_indices = @transform_1, window_bounds = array<i64: 1, 32, 128>}, {transform_indices = @transform_2, window_bounds = array<i64: 1, 64, 128>}, {transform_indices = @transform_3, window_bounds = array<i64: 1, 1, 128>}, {transform_indices = @transform_4, window_bounds = array<i64: 1, 2, 32>}]} {
    %0 = arith.index_cast %arg0 : i32 to index
    %1 = memref.load %arg1[%0] : memref<3xi32, #tpu.memory_space<smem>>
    %c0 = arith.constant 0 : index
    %c0_0 = arith.constant 0 : index
    %c0_1 = arith.constant 0 : index
    %2 = vector.load %arg3[%c0, %c0_0, %c0_1] : memref<1x32x128xf32, #tpu.memory_space<vmem>>, vector<1x32x128xf32>
    %3 = vector.shape_cast %2 : vector<1x32x128xf32> to vector<32x128xf32>
    %c0_2 = arith.constant 0 : index
    %c0_3 = arith.constant 0 : index
    %c0_4 = arith.constant 0 : index
    %4 = vector.load %arg4[%c0_2, %c0_3, %c0_4] : memref<1x64x128xf32, #tpu.memory_space<vmem>>, vector<1x64x128xf32>
    %5 = vector.shape_cast %4 : vector<1x64x128xf32> to vector<64x128xf32>
    %c0_5 = arith.constant 0 : index
    %c0_6 = arith.constant 0 : index
    %c0_7 = arith.constant 0 : index
    %6 = vector.load %arg5[%c0_5, %c0_6, %c0_7] : memref<1x1x128xf32, #tpu.memory_space<vmem>>, vector<1x1x128xf32>
    %7 = vector.shape_cast %6 : vector<1x1x128xf32> to vector<1x128xf32>
    %8 = vector.shape_cast %7 : vector<1x128xf32> to vector<1x128xf32>
    %9 = vector.broadcast %8 : vector<1x128xf32> to vector<2x128xf32>
    %cst = arith.constant 0.000000e+00 : f32
    %10 = vector.broadcast %cst : f32 to vector<2x32xf32>
    %c0_8 = arith.constant 0 : index
    %c0_9 = arith.constant 0 : index
    %c0_10 = arith.constant 0 : index
    %c0_11 = arith.constant 0 : index
    %11 = vector.load %arg2[%c0_8, %c0_9, %c0_10, %c0_11] : memref<1x6x2x128xf32, #tpu.memory_space<vmem>>, vector<1x1x2x128xf32>
    %12 = vector.shape_cast %11 : vector<1x1x2x128xf32> to vector<2x128xf32>
    %cst_12 = arith.constant dense<0.000000e+00> : vector<2x128xf32>
    %13 = tpu.matmul %10, %3, %cst_12 {dimension_numbers = #tpu.dot_dimension_numbers<[1], [0], [0], [1], [0, 0, 1, 1], [], []>} : vector<2x32xf32>, vector<32x128xf32>, vector<2x128xf32> -> vector<2x128xf32>
    %14 = arith.addf %12, %13 : vector<2x128xf32>
    %15 = arith.negf %14 : vector<2x128xf32>
    %16 = math.exp %15 : vector<2x128xf32>
    %cst_13 = arith.constant 1.000000e+00 : f32
    %17 = vector.broadcast %cst_13 : f32 to vector<2x128xf32>
    %18 = arith.addf %17, %16 : vector<2x128xf32>
    %19 = arith.divf %17, %18 : vector<2x128xf32>
    %20 = math.tanh %14 : vector<2x128xf32>
    %21 = vector.extract_strided_slice %19 {offsets = [0, 0], sizes = [2, 32], strides = [1, 1]} : vector<2x128xf32> to vector<2x32xf32>
    %22 = vector.extract_strided_slice %19 {offsets = [0, 32], sizes = [2, 32], strides = [1, 1]} : vector<2x128xf32> to vector<2x32xf32>
    %23 = vector.extract_strided_slice %20 {offsets = [0, 64], sizes = [2, 32], strides = [1, 1]} : vector<2x128xf32> to vector<2x32xf32>
    %24 = vector.extract_strided_slice %19 {offsets = [0, 96], sizes = [2, 32], strides = [1, 1]} : vector<2x128xf32> to vector<2x32xf32>
    %25 = arith.mulf %22, %10 : vector<2x32xf32>
    %26 = arith.mulf %21, %23 : vector<2x32xf32>
    %27 = arith.addf %25, %26 : vector<2x32xf32>
    %28 = math.tanh %27 : vector<2x32xf32>
    %29 = arith.mulf %24, %28 : vector<2x32xf32>
    %30 = tpu.concatenate %29, %10 in 1 : vector<2x32xf32>, vector<2x32xf32> -> vector<2x64xf32>
    %cst_14 = arith.constant dense<0.000000e+00> : vector<2x128xf32>
    %31 = tpu.matmul %30, %5, %cst_14 {dimension_numbers = #tpu.dot_dimension_numbers<[1], [0], [0], [1], [0, 0, 1, 1], [], []>} : vector<2x64xf32>, vector<64x128xf32>, vector<2x128xf32> -> vector<2x128xf32>
    %32 = arith.addf %31, %9 : vector<2x128xf32>
    %33 = arith.negf %32 : vector<2x128xf32>
    %34 = math.exp %33 : vector<2x128xf32>
    %cst_15 = arith.constant 1.000000e+00 : f32
    %35 = vector.broadcast %cst_15 : f32 to vector<2x128xf32>
    %36 = arith.addf %35, %34 : vector<2x128xf32>
    %37 = arith.divf %35, %36 : vector<2x128xf32>
    %38 = math.tanh %32 : vector<2x128xf32>
    %39 = vector.extract_strided_slice %37 {offsets = [0, 0], sizes = [2, 32], strides = [1, 1]} : vector<2x128xf32> to vector<2x32xf32>
    %40 = vector.extract_strided_slice %37 {offsets = [0, 32], sizes = [2, 32], strides = [1, 1]} : vector<2x128xf32> to vector<2x32xf32>
    %41 = vector.extract_strided_slice %38 {offsets = [0, 64], sizes = [2, 32], strides = [1, 1]} : vector<2x128xf32> to vector<2x32xf32>
    %42 = vector.extract_strided_slice %37 {offsets = [0, 96], sizes = [2, 32], strides = [1, 1]} : vector<2x128xf32> to vector<2x32xf32>
    %43 = arith.mulf %40, %10 : vector<2x32xf32>
    %44 = arith.mulf %39, %41 : vector<2x32xf32>
    %45 = arith.addf %43, %44 : vector<2x32xf32>
    %46 = math.tanh %45 : vector<2x32xf32>
    %47 = arith.mulf %42, %46 : vector<2x32xf32>
    %c0_16 = arith.constant 0 : index
    %c1 = arith.constant 1 : index
    %c0_17 = arith.constant 0 : index
    %c0_18 = arith.constant 0 : index
    %48 = vector.load %arg2[%c0_16, %c1, %c0_17, %c0_18] : memref<1x6x2x128xf32, #tpu.memory_space<vmem>>, vector<1x1x2x128xf32>
    %49 = vector.shape_cast %48 : vector<1x1x2x128xf32> to vector<2x128xf32>
    %cst_19 = arith.constant dense<0.000000e+00> : vector<2x128xf32>
    %50 = tpu.matmul %29, %3, %cst_19 {dimension_numbers = #tpu.dot_dimension_numbers<[1], [0], [0], [1], [0, 0, 1, 1], [], []>} : vector<2x32xf32>, vector<32x128xf32>, vector<2x128xf32> -> vector<2x128xf32>
    %51 = arith.addf %49, %50 : vector<2x128xf32>
    %52 = arith.negf %51 : vector<2x128xf32>
    %53 = math.exp %52 : vector<2x128xf32>
    %cst_20 = arith.constant 1.000000e+00 : f32
    %54 = vector.broadcast %cst_20 : f32 to vector<2x128xf32>
    %55 = arith.addf %54, %53 : vector<2x128xf32>
    %56 = arith.divf %54, %55 : vector<2x128xf32>
    %57 = math.tanh %51 : vector<2x128xf32>
    %58 = vector.extract_strided_slice %56 {offsets = [0, 0], sizes = [2, 32], strides = [1, 1]} : vector<2x128xf32> to vector<2x32xf32>
    %59 = vector.extract_strided_slice %56 {offsets = [0, 32], sizes = [2, 32], strides = [1, 1]} : vector<2x128xf32> to vector<2x32xf32>
    %60 = vector.extract_strided_slice %57 {offsets = [0, 64], sizes = [2, 32], strides = [1, 1]} : vector<2x128xf32> to vector<2x32xf32>
    %61 = vector.extract_strided_slice %56 {offsets = [0, 96], sizes = [2, 32], strides = [1, 1]} : vector<2x128xf32> to vector<2x32xf32>
    %62 = arith.mulf %59, %27 : vector<2x32xf32>
    %63 = arith.mulf %58, %60 : vector<2x32xf32>
    %64 = arith.addf %62, %63 : vector<2x32xf32>
    %65 = math.tanh %64 : vector<2x32xf32>
    %66 = arith.mulf %61, %65 : vector<2x32xf32>
    %67 = tpu.concatenate %66, %47 in 1 : vector<2x32xf32>, vector<2x32xf32> -> vector<2x64xf32>
    %cst_21 = arith.constant dense<0.000000e+00> : vector<2x128xf32>
    %68 = tpu.matmul %67, %5, %cst_21 {dimension_numbers = #tpu.dot_dimension_numbers<[1], [0], [0], [1], [0, 0, 1, 1], [], []>} : vector<2x64xf32>, vector<64x128xf32>, vector<2x128xf32> -> vector<2x128xf32>
    %69 = arith.addf %68, %9 : vector<2x128xf32>
    %70 = arith.negf %69 : vector<2x128xf32>
    %71 = math.exp %70 : vector<2x128xf32>
    %cst_22 = arith.constant 1.000000e+00 : f32
    %72 = vector.broadcast %cst_22 : f32 to vector<2x128xf32>
    %73 = arith.addf %72, %71 : vector<2x128xf32>
    %74 = arith.divf %72, %73 : vector<2x128xf32>
    %75 = math.tanh %69 : vector<2x128xf32>
    %76 = vector.extract_strided_slice %74 {offsets = [0, 0], sizes = [2, 32], strides = [1, 1]} : vector<2x128xf32> to vector<2x32xf32>
    %77 = vector.extract_strided_slice %74 {offsets = [0, 32], sizes = [2, 32], strides = [1, 1]} : vector<2x128xf32> to vector<2x32xf32>
    %78 = vector.extract_strided_slice %75 {offsets = [0, 64], sizes = [2, 32], strides = [1, 1]} : vector<2x128xf32> to vector<2x32xf32>
    %79 = vector.extract_strided_slice %74 {offsets = [0, 96], sizes = [2, 32], strides = [1, 1]} : vector<2x128xf32> to vector<2x32xf32>
    %80 = arith.mulf %77, %45 : vector<2x32xf32>
    %81 = arith.mulf %76, %78 : vector<2x32xf32>
    %82 = arith.addf %80, %81 : vector<2x32xf32>
    %83 = math.tanh %82 : vector<2x32xf32>
    %84 = arith.mulf %79, %83 : vector<2x32xf32>
    %c0_23 = arith.constant 0 : index
    %c2 = arith.constant 2 : index
    %c0_24 = arith.constant 0 : index
    %c0_25 = arith.constant 0 : index
    %85 = vector.load %arg2[%c0_23, %c2, %c0_24, %c0_25] : memref<1x6x2x128xf32, #tpu.memory_space<vmem>>, vector<1x1x2x128xf32>
    %86 = vector.shape_cast %85 : vector<1x1x2x128xf32> to vector<2x128xf32>
    %cst_26 = arith.constant dense<0.000000e+00> : vector<2x128xf32>
    %87 = tpu.matmul %66, %3, %cst_26 {dimension_numbers = #tpu.dot_dimension_numbers<[1], [0], [0], [1], [0, 0, 1, 1], [], []>} : vector<2x32xf32>, vector<32x128xf32>, vector<2x128xf32> -> vector<2x128xf32>
    %88 = arith.addf %86, %87 : vector<2x128xf32>
    %89 = arith.negf %88 : vector<2x128xf32>
    %90 = math.exp %89 : vector<2x128xf32>
    %cst_27 = arith.constant 1.000000e+00 : f32
    %91 = vector.broadcast %cst_27 : f32 to vector<2x128xf32>
    %92 = arith.addf %91, %90 : vector<2x128xf32>
    %93 = arith.divf %91, %92 : vector<2x128xf32>
    %94 = math.tanh %88 : vector<2x128xf32>
    %95 = vector.extract_strided_slice %93 {offsets = [0, 0], sizes = [2, 32], strides = [1, 1]} : vector<2x128xf32> to vector<2x32xf32>
    %96 = vector.extract_strided_slice %93 {offsets = [0, 32], sizes = [2, 32], strides = [1, 1]} : vector<2x128xf32> to vector<2x32xf32>
    %97 = vector.extract_strided_slice %94 {offsets = [0, 64], sizes = [2, 32], strides = [1, 1]} : vector<2x128xf32> to vector<2x32xf32>
    %98 = vector.extract_strided_slice %93 {offsets = [0, 96], sizes = [2, 32], strides = [1, 1]} : vector<2x128xf32> to vector<2x32xf32>
    %99 = arith.mulf %96, %64 : vector<2x32xf32>
    %100 = arith.mulf %95, %97 : vector<2x32xf32>
    %101 = arith.addf %99, %100 : vector<2x32xf32>
    %102 = math.tanh %101 : vector<2x32xf32>
    %103 = arith.mulf %98, %102 : vector<2x32xf32>
    %104 = tpu.concatenate %103, %84 in 1 : vector<2x32xf32>, vector<2x32xf32> -> vector<2x64xf32>
    %cst_28 = arith.constant dense<0.000000e+00> : vector<2x128xf32>
    %105 = tpu.matmul %104, %5, %cst_28 {dimension_numbers = #tpu.dot_dimension_numbers<[1], [0], [0], [1], [0, 0, 1, 1], [], []>} : vector<2x64xf32>, vector<64x128xf32>, vector<2x128xf32> -> vector<2x128xf32>
    %106 = arith.addf %105, %9 : vector<2x128xf32>
    %107 = arith.negf %106 : vector<2x128xf32>
    %108 = math.exp %107 : vector<2x128xf32>
    %cst_29 = arith.constant 1.000000e+00 : f32
    %109 = vector.broadcast %cst_29 : f32 to vector<2x128xf32>
    %110 = arith.addf %109, %108 : vector<2x128xf32>
    %111 = arith.divf %109, %110 : vector<2x128xf32>
    %112 = math.tanh %106 : vector<2x128xf32>
    %113 = vector.extract_strided_slice %111 {offsets = [0, 0], sizes = [2, 32], strides = [1, 1]} : vector<2x128xf32> to vector<2x32xf32>
    %114 = vector.extract_strided_slice %111 {offsets = [0, 32], sizes = [2, 32], strides = [1, 1]} : vector<2x128xf32> to vector<2x32xf32>
    %115 = vector.extract_strided_slice %112 {offsets = [0, 64], sizes = [2, 32], strides = [1, 1]} : vector<2x128xf32> to vector<2x32xf32>
    %116 = vector.extract_strided_slice %111 {offsets = [0, 96], sizes = [2, 32], strides = [1, 1]} : vector<2x128xf32> to vector<2x32xf32>
    %117 = arith.mulf %114, %82 : vector<2x32xf32>
    %118 = arith.mulf %113, %115 : vector<2x32xf32>
    %119 = arith.addf %117, %118 : vector<2x32xf32>
    %120 = math.tanh %119 : vector<2x32xf32>
    %121 = arith.mulf %116, %120 : vector<2x32xf32>
    %c2_i32 = arith.constant 2 : i32
    %122 = arith.cmpi sgt, %1, %c2_i32 : i32
    %123 = arith.extui %122 : i1 to i32
    %124 = arith.sitofp %123 : i32 to f32
    %125 = arith.subf %121, %84 : vector<2x32xf32>
    %126 = vector.broadcast %124 : f32 to vector<2x32xf32>
    %127 = arith.mulf %126, %125 : vector<2x32xf32>
    %128 = arith.addf %84, %127 : vector<2x32xf32>
    %129 = arith.subf %119, %82 : vector<2x32xf32>
    %130 = vector.broadcast %124 : f32 to vector<2x32xf32>
    %131 = arith.mulf %130, %129 : vector<2x32xf32>
    %132 = arith.addf %82, %131 : vector<2x32xf32>
    %c0_30 = arith.constant 0 : index
    %c3 = arith.constant 3 : index
    %c0_31 = arith.constant 0 : index
    %c0_32 = arith.constant 0 : index
    %133 = vector.load %arg2[%c0_30, %c3, %c0_31, %c0_32] : memref<1x6x2x128xf32, #tpu.memory_space<vmem>>, vector<1x1x2x128xf32>
    %134 = vector.shape_cast %133 : vector<1x1x2x128xf32> to vector<2x128xf32>
    %cst_33 = arith.constant dense<0.000000e+00> : vector<2x128xf32>
    %135 = tpu.matmul %103, %3, %cst_33 {dimension_numbers = #tpu.dot_dimension_numbers<[1], [0], [0], [1], [0, 0, 1, 1], [], []>} : vector<2x32xf32>, vector<32x128xf32>, vector<2x128xf32> -> vector<2x128xf32>
    %136 = arith.addf %134, %135 : vector<2x128xf32>
    %137 = arith.negf %136 : vector<2x128xf32>
    %138 = math.exp %137 : vector<2x128xf32>
    %cst_34 = arith.constant 1.000000e+00 : f32
    %139 = vector.broadcast %cst_34 : f32 to vector<2x128xf32>
    %140 = arith.addf %139, %138 : vector<2x128xf32>
    %141 = arith.divf %139, %140 : vector<2x128xf32>
    %142 = math.tanh %136 : vector<2x128xf32>
    %143 = vector.extract_strided_slice %141 {offsets = [0, 0], sizes = [2, 32], strides = [1, 1]} : vector<2x128xf32> to vector<2x32xf32>
    %144 = vector.extract_strided_slice %141 {offsets = [0, 32], sizes = [2, 32], strides = [1, 1]} : vector<2x128xf32> to vector<2x32xf32>
    %145 = vector.extract_strided_slice %142 {offsets = [0, 64], sizes = [2, 32], strides = [1, 1]} : vector<2x128xf32> to vector<2x32xf32>
    %146 = vector.extract_strided_slice %141 {offsets = [0, 96], sizes = [2, 32], strides = [1, 1]} : vector<2x128xf32> to vector<2x32xf32>
    %147 = arith.mulf %144, %101 : vector<2x32xf32>
    %148 = arith.mulf %143, %145 : vector<2x32xf32>
    %149 = arith.addf %147, %148 : vector<2x32xf32>
    %150 = math.tanh %149 : vector<2x32xf32>
    %151 = arith.mulf %146, %150 : vector<2x32xf32>
    %152 = tpu.concatenate %151, %128 in 1 : vector<2x32xf32>, vector<2x32xf32> -> vector<2x64xf32>
    %cst_35 = arith.constant dense<0.000000e+00> : vector<2x128xf32>
    %153 = tpu.matmul %152, %5, %cst_35 {dimension_numbers = #tpu.dot_dimension_numbers<[1], [0], [0], [1], [0, 0, 1, 1], [], []>} : vector<2x64xf32>, vector<64x128xf32>, vector<2x128xf32> -> vector<2x128xf32>
    %154 = arith.addf %153, %9 : vector<2x128xf32>
    %155 = arith.negf %154 : vector<2x128xf32>
    %156 = math.exp %155 : vector<2x128xf32>
    %cst_36 = arith.constant 1.000000e+00 : f32
    %157 = vector.broadcast %cst_36 : f32 to vector<2x128xf32>
    %158 = arith.addf %157, %156 : vector<2x128xf32>
    %159 = arith.divf %157, %158 : vector<2x128xf32>
    %160 = math.tanh %154 : vector<2x128xf32>
    %161 = vector.extract_strided_slice %159 {offsets = [0, 0], sizes = [2, 32], strides = [1, 1]} : vector<2x128xf32> to vector<2x32xf32>
    %162 = vector.extract_strided_slice %159 {offsets = [0, 32], sizes = [2, 32], strides = [1, 1]} : vector<2x128xf32> to vector<2x32xf32>
    %163 = vector.extract_strided_slice %160 {offsets = [0, 64], sizes = [2, 32], strides = [1, 1]} : vector<2x128xf32> to vector<2x32xf32>
    %164 = vector.extract_strided_slice %159 {offsets = [0, 96], sizes = [2, 32], strides = [1, 1]} : vector<2x128xf32> to vector<2x32xf32>
    %165 = arith.mulf %162, %132 : vector<2x32xf32>
    %166 = arith.mulf %161, %163 : vector<2x32xf32>
    %167 = arith.addf %165, %166 : vector<2x32xf32>
    %168 = math.tanh %167 : vector<2x32xf32>
    %169 = arith.mulf %164, %168 : vector<2x32xf32>
    %c3_i32 = arith.constant 3 : i32
    %170 = arith.cmpi sgt, %1, %c3_i32 : i32
    %171 = arith.extui %170 : i1 to i32
    %172 = arith.sitofp %171 : i32 to f32
    %173 = arith.subf %169, %128 : vector<2x32xf32>
    %174 = vector.broadcast %172 : f32 to vector<2x32xf32>
    %175 = arith.mulf %174, %173 : vector<2x32xf32>
    %176 = arith.addf %128, %175 : vector<2x32xf32>
    %177 = arith.subf %167, %132 : vector<2x32xf32>
    %178 = vector.broadcast %172 : f32 to vector<2x32xf32>
    %179 = arith.mulf %178, %177 : vector<2x32xf32>
    %180 = arith.addf %132, %179 : vector<2x32xf32>
    %c0_37 = arith.constant 0 : index
    %c4 = arith.constant 4 : index
    %c0_38 = arith.constant 0 : index
    %c0_39 = arith.constant 0 : index
    %181 = vector.load %arg2[%c0_37, %c4, %c0_38, %c0_39] : memref<1x6x2x128xf32, #tpu.memory_space<vmem>>, vector<1x1x2x128xf32>
    %182 = vector.shape_cast %181 : vector<1x1x2x128xf32> to vector<2x128xf32>
    %cst_40 = arith.constant dense<0.000000e+00> : vector<2x128xf32>
    %183 = tpu.matmul %151, %3, %cst_40 {dimension_numbers = #tpu.dot_dimension_numbers<[1], [0], [0], [1], [0, 0, 1, 1], [], []>} : vector<2x32xf32>, vector<32x128xf32>, vector<2x128xf32> -> vector<2x128xf32>
    %184 = arith.addf %182, %183 : vector<2x128xf32>
    %185 = arith.negf %184 : vector<2x128xf32>
    %186 = math.exp %185 : vector<2x128xf32>
    %cst_41 = arith.constant 1.000000e+00 : f32
    %187 = vector.broadcast %cst_41 : f32 to vector<2x128xf32>
    %188 = arith.addf %187, %186 : vector<2x128xf32>
    %189 = arith.divf %187, %188 : vector<2x128xf32>
    %190 = math.tanh %184 : vector<2x128xf32>
    %191 = vector.extract_strided_slice %189 {offsets = [0, 0], sizes = [2, 32], strides = [1, 1]} : vector<2x128xf32> to vector<2x32xf32>
    %192 = vector.extract_strided_slice %189 {offsets = [0, 32], sizes = [2, 32], strides = [1, 1]} : vector<2x128xf32> to vector<2x32xf32>
    %193 = vector.extract_strided_slice %190 {offsets = [0, 64], sizes = [2, 32], strides = [1, 1]} : vector<2x128xf32> to vector<2x32xf32>
    %194 = vector.extract_strided_slice %189 {offsets = [0, 96], sizes = [2, 32], strides = [1, 1]} : vector<2x128xf32> to vector<2x32xf32>
    %195 = arith.mulf %192, %149 : vector<2x32xf32>
    %196 = arith.mulf %191, %193 : vector<2x32xf32>
    %197 = arith.addf %195, %196 : vector<2x32xf32>
    %198 = math.tanh %197 : vector<2x32xf32>
    %199 = arith.mulf %194, %198 : vector<2x32xf32>
    %200 = tpu.concatenate %199, %176 in 1 : vector<2x32xf32>, vector<2x32xf32> -> vector<2x64xf32>
    %cst_42 = arith.constant dense<0.000000e+00> : vector<2x128xf32>
    %201 = tpu.matmul %200, %5, %cst_42 {dimension_numbers = #tpu.dot_dimension_numbers<[1], [0], [0], [1], [0, 0, 1, 1], [], []>} : vector<2x64xf32>, vector<64x128xf32>, vector<2x128xf32> -> vector<2x128xf32>
    %202 = arith.addf %201, %9 : vector<2x128xf32>
    %203 = arith.negf %202 : vector<2x128xf32>
    %204 = math.exp %203 : vector<2x128xf32>
    %cst_43 = arith.constant 1.000000e+00 : f32
    %205 = vector.broadcast %cst_43 : f32 to vector<2x128xf32>
    %206 = arith.addf %205, %204 : vector<2x128xf32>
    %207 = arith.divf %205, %206 : vector<2x128xf32>
    %208 = math.tanh %202 : vector<2x128xf32>
    %209 = vector.extract_strided_slice %207 {offsets = [0, 0], sizes = [2, 32], strides = [1, 1]} : vector<2x128xf32> to vector<2x32xf32>
    %210 = vector.extract_strided_slice %207 {offsets = [0, 32], sizes = [2, 32], strides = [1, 1]} : vector<2x128xf32> to vector<2x32xf32>
    %211 = vector.extract_strided_slice %208 {offsets = [0, 64], sizes = [2, 32], strides = [1, 1]} : vector<2x128xf32> to vector<2x32xf32>
    %212 = vector.extract_strided_slice %207 {offsets = [0, 96], sizes = [2, 32], strides = [1, 1]} : vector<2x128xf32> to vector<2x32xf32>
    %213 = arith.mulf %210, %180 : vector<2x32xf32>
    %214 = arith.mulf %209, %211 : vector<2x32xf32>
    %215 = arith.addf %213, %214 : vector<2x32xf32>
    %216 = math.tanh %215 : vector<2x32xf32>
    %217 = arith.mulf %212, %216 : vector<2x32xf32>
    %c4_i32 = arith.constant 4 : i32
    %218 = arith.cmpi sgt, %1, %c4_i32 : i32
    %219 = arith.extui %218 : i1 to i32
    %220 = arith.sitofp %219 : i32 to f32
    %221 = arith.subf %217, %176 : vector<2x32xf32>
    %222 = vector.broadcast %220 : f32 to vector<2x32xf32>
    %223 = arith.mulf %222, %221 : vector<2x32xf32>
    %224 = arith.addf %176, %223 : vector<2x32xf32>
    %225 = arith.subf %215, %180 : vector<2x32xf32>
    %226 = vector.broadcast %220 : f32 to vector<2x32xf32>
    %227 = arith.mulf %226, %225 : vector<2x32xf32>
    %228 = arith.addf %180, %227 : vector<2x32xf32>
    %c0_44 = arith.constant 0 : index
    %c5 = arith.constant 5 : index
    %c0_45 = arith.constant 0 : index
    %c0_46 = arith.constant 0 : index
    %229 = vector.load %arg2[%c0_44, %c5, %c0_45, %c0_46] : memref<1x6x2x128xf32, #tpu.memory_space<vmem>>, vector<1x1x2x128xf32>
    %230 = vector.shape_cast %229 : vector<1x1x2x128xf32> to vector<2x128xf32>
    %cst_47 = arith.constant dense<0.000000e+00> : vector<2x128xf32>
    %231 = tpu.matmul %199, %3, %cst_47 {dimension_numbers = #tpu.dot_dimension_numbers<[1], [0], [0], [1], [0, 0, 1, 1], [], []>} : vector<2x32xf32>, vector<32x128xf32>, vector<2x128xf32> -> vector<2x128xf32>
    %232 = arith.addf %230, %231 : vector<2x128xf32>
    %233 = arith.negf %232 : vector<2x128xf32>
    %234 = math.exp %233 : vector<2x128xf32>
    %cst_48 = arith.constant 1.000000e+00 : f32
    %235 = vector.broadcast %cst_48 : f32 to vector<2x128xf32>
    %236 = arith.addf %235, %234 : vector<2x128xf32>
    %237 = arith.divf %235, %236 : vector<2x128xf32>
    %238 = math.tanh %232 : vector<2x128xf32>
    %239 = vector.extract_strided_slice %237 {offsets = [0, 0], sizes = [2, 32], strides = [1, 1]} : vector<2x128xf32> to vector<2x32xf32>
    %240 = vector.extract_strided_slice %237 {offsets = [0, 32], sizes = [2, 32], strides = [1, 1]} : vector<2x128xf32> to vector<2x32xf32>
    %241 = vector.extract_strided_slice %238 {offsets = [0, 64], sizes = [2, 32], strides = [1, 1]} : vector<2x128xf32> to vector<2x32xf32>
    %242 = vector.extract_strided_slice %237 {offsets = [0, 96], sizes = [2, 32], strides = [1, 1]} : vector<2x128xf32> to vector<2x32xf32>
    %243 = arith.mulf %240, %197 : vector<2x32xf32>
    %244 = arith.mulf %239, %241 : vector<2x32xf32>
    %245 = arith.addf %243, %244 : vector<2x32xf32>
    %246 = math.tanh %245 : vector<2x32xf32>
    %247 = arith.mulf %242, %246 : vector<2x32xf32>
    %248 = tpu.concatenate %247, %224 in 1 : vector<2x32xf32>, vector<2x32xf32> -> vector<2x64xf32>
    %cst_49 = arith.constant dense<0.000000e+00> : vector<2x128xf32>
    %249 = tpu.matmul %248, %5, %cst_49 {dimension_numbers = #tpu.dot_dimension_numbers<[1], [0], [0], [1], [0, 0, 1, 1], [], []>} : vector<2x64xf32>, vector<64x128xf32>, vector<2x128xf32> -> vector<2x128xf32>
    %250 = arith.addf %249, %9 : vector<2x128xf32>
    %251 = arith.negf %250 : vector<2x128xf32>
    %252 = math.exp %251 : vector<2x128xf32>
    %cst_50 = arith.constant 1.000000e+00 : f32
    %253 = vector.broadcast %cst_50 : f32 to vector<2x128xf32>
    %254 = arith.addf %253, %252 : vector<2x128xf32>
    %255 = arith.divf %253, %254 : vector<2x128xf32>
    %256 = math.tanh %250 : vector<2x128xf32>
    %257 = vector.extract_strided_slice %255 {offsets = [0, 0], sizes = [2, 32], strides = [1, 1]} : vector<2x128xf32> to vector<2x32xf32>
    %258 = vector.extract_strided_slice %255 {offsets = [0, 32], sizes = [2, 32], strides = [1, 1]} : vector<2x128xf32> to vector<2x32xf32>
    %259 = vector.extract_strided_slice %256 {offsets = [0, 64], sizes = [2, 32], strides = [1, 1]} : vector<2x128xf32> to vector<2x32xf32>
    %260 = vector.extract_strided_slice %255 {offsets = [0, 96], sizes = [2, 32], strides = [1, 1]} : vector<2x128xf32> to vector<2x32xf32>
    %261 = arith.mulf %258, %228 : vector<2x32xf32>
    %262 = arith.mulf %257, %259 : vector<2x32xf32>
    %263 = arith.addf %261, %262 : vector<2x32xf32>
    %264 = math.tanh %263 : vector<2x32xf32>
    %265 = arith.mulf %260, %264 : vector<2x32xf32>
    %c5_i32 = arith.constant 5 : i32
    %266 = arith.cmpi sgt, %1, %c5_i32 : i32
    %267 = arith.extui %266 : i1 to i32
    %268 = arith.sitofp %267 : i32 to f32
    %269 = arith.subf %265, %224 : vector<2x32xf32>
    %270 = vector.broadcast %268 : f32 to vector<2x32xf32>
    %271 = arith.mulf %270, %269 : vector<2x32xf32>
    %272 = arith.addf %224, %271 : vector<2x32xf32>
    %c0_51 = arith.constant 0 : index
    %c0_52 = arith.constant 0 : index
    %c0_53 = arith.constant 0 : index
    %273 = vector.load %arg6[%c0_51, %c0_52, %c0_53] : memref<1x2x32xf32, #tpu.memory_space<vmem>>, vector<1x2x32xf32>
    %274 = vector.shape_cast %273 : vector<1x2x32xf32> to vector<2x32xf32>
    %275 = vector.shape_cast %272 : vector<2x32xf32> to vector<1x2x32xf32>
    tpu.vector_store %arg6[%c0_51, %c0_52, %c0_53], %275 {strides = array<i32>} : memref<1x2x32xf32, #tpu.memory_space<vmem>>, vector<1x2x32xf32>,
    return
  }
  func.func @transform_0(%arg0: i32, %arg1: memref<3xi32, #tpu.memory_space<smem>>) -> (i32, i32, i32, i32) {
    %c0_i32 = arith.constant 0 : i32
    %c0_i32_0 = arith.constant 0 : i32
    %c0_i32_1 = arith.constant 0 : i32
    %c0_i32_2 = arith.constant 0 : i32
    return %arg0, %c0_i32, %c0_i32_0, %c0_i32_1 : i32, i32, i32, i32
  }
  func.func @transform_1(%arg0: i32, %arg1: memref<3xi32, #tpu.memory_space<smem>>) -> (i32, i32, i32) {
    %c0_i32 = arith.constant 0 : i32
    %c0_i32_0 = arith.constant 0 : i32
    %c0_i32_1 = arith.constant 0 : i32
    return %arg0, %c0_i32, %c0_i32_0 : i32, i32, i32
  }
  func.func @transform_2(%arg0: i32, %arg1: memref<3xi32, #tpu.memory_space<smem>>) -> (i32, i32, i32) {
    %c0_i32 = arith.constant 0 : i32
    %c0_i32_0 = arith.constant 0 : i32
    %c0_i32_1 = arith.constant 0 : i32
    return %arg0, %c0_i32, %c0_i32_0 : i32, i32, i32
  }
  func.func @transform_3(%arg0: i32, %arg1: memref<3xi32, #tpu.memory_space<smem>>) -> (i32, i32, i32) {
    %c0_i32 = arith.constant 0 : i32
    %c0_i32_0 = arith.constant 0 : i32
    %c0_i32_1 = arith.constant 0 : i32
    return %arg0, %c0_i32, %c0_i32_0 : i32, i32, i32
  }
  func.func @transform_4(%arg0: i32, %arg1: memref<3xi32, #tpu.memory_space<smem>>) -> (i32, i32, i32) {
    %c0_i32 = arith.constant 0 : i32
    %c0_i32_0 = arith.constant 0 : i32
    %c0_i32_1 = arith.constant 0 : i32
    return %arg0, %c0_i32, %c0_i32_0 : i32, i32, i32
  }
}

module attributes {stable_mosaic.version = 11 : i64} {
  func.func @attn_fusion_kernel(%arg0: memref<6x32xf32, #tpu.memory_space<vmem>>, %arg1: memref<4x32x8xf32, #tpu.memory_space<vmem>>, %arg2: memref<4x32x8xf32, #tpu.memory_space<vmem>>, %arg3: memref<4x32x8xf32, #tpu.memory_space<vmem>>, %arg4: memref<4x1x8xf32, #tpu.memory_space<vmem>>, %arg5: memref<4x1x8xf32, #tpu.memory_space<vmem>>, %arg6: memref<4x1x8xf32, #tpu.memory_space<vmem>>, %arg7: memref<4x8x32xf32, #tpu.memory_space<vmem>>, %arg8: memref<1x32xf32, #tpu.memory_space<vmem>>, %arg9: memref<3x32x128xf32, #tpu.memory_space<vmem>>, %arg10: memref<1x128xf32, #tpu.memory_space<vmem>>, %arg11: memref<128x4xf32, #tpu.memory_space<vmem>>, %arg12: memref<1x4xf32, #tpu.memory_space<vmem>>, %arg13: memref<2x4xf32, #tpu.memory_space<vmem>>) attributes {dimension_semantics = [], scalar_prefetch = 0 : i64, scratch_operands = 0 : i64, tpu.core_type = #tpu.core_type<tc>} {
    %c0 = arith.constant 0 : index
    %c0_0 = arith.constant 0 : index
    %0 = vector.load %arg0[%c0, %c0_0] : memref<6x32xf32, #tpu.memory_space<vmem>>, vector<6x32xf32>
    %cst = arith.constant 0.000000e+00 : f32
    %1 = vector.broadcast %cst : f32 to vector<6x32xf32>
    %c0_1 = arith.constant 0 : index
    %c0_2 = arith.constant 0 : index
    %c0_3 = arith.constant 0 : index
    %2 = vector.load %arg1[%c0_1, %c0_2, %c0_3] : memref<4x32x8xf32, #tpu.memory_space<vmem>>, vector<1x32x8xf32>
    %3 = vector.shape_cast %2 : vector<1x32x8xf32> to vector<32x8xf32>
    %cst_4 = arith.constant dense<0.000000e+00> : vector<6x8xf32>
    %4 = tpu.matmul %0, %3, %cst_4 {dimension_numbers = #tpu.dot_dimension_numbers<[1], [0], [0], [1], [0, 0, 1, 1], [], []>} : vector<6x32xf32>, vector<32x8xf32>, vector<6x8xf32> -> vector<6x8xf32>
    %c0_5 = arith.constant 0 : index
    %c0_6 = arith.constant 0 : index
    %c0_7 = arith.constant 0 : index
    %5 = vector.load %arg4[%c0_5, %c0_6, %c0_7] : memref<4x1x8xf32, #tpu.memory_space<vmem>>, vector<1x1x8xf32>
    %6 = vector.shape_cast %5 : vector<1x1x8xf32> to vector<1x8xf32>
    %7 = vector.broadcast %6 : vector<1x8xf32> to vector<6x8xf32>
    %8 = arith.addf %4, %7 : vector<6x8xf32>
    %c0_8 = arith.constant 0 : index
    %c0_9 = arith.constant 0 : index
    %c0_10 = arith.constant 0 : index
    %9 = vector.load %arg2[%c0_8, %c0_9, %c0_10] : memref<4x32x8xf32, #tpu.memory_space<vmem>>, vector<1x32x8xf32>
    %10 = vector.shape_cast %9 : vector<1x32x8xf32> to vector<32x8xf32>
    %cst_11 = arith.constant dense<0.000000e+00> : vector<6x8xf32>
    %11 = tpu.matmul %0, %10, %cst_11 {dimension_numbers = #tpu.dot_dimension_numbers<[1], [0], [0], [1], [0, 0, 1, 1], [], []>} : vector<6x32xf32>, vector<32x8xf32>, vector<6x8xf32> -> vector<6x8xf32>
    %c0_12 = arith.constant 0 : index
    %c0_13 = arith.constant 0 : index
    %c0_14 = arith.constant 0 : index
    %12 = vector.load %arg5[%c0_12, %c0_13, %c0_14] : memref<4x1x8xf32, #tpu.memory_space<vmem>>, vector<1x1x8xf32>
    %13 = vector.shape_cast %12 : vector<1x1x8xf32> to vector<1x8xf32>
    %14 = vector.broadcast %13 : vector<1x8xf32> to vector<6x8xf32>
    %15 = arith.addf %11, %14 : vector<6x8xf32>
    %c0_15 = arith.constant 0 : index
    %c0_16 = arith.constant 0 : index
    %c0_17 = arith.constant 0 : index
    %16 = vector.load %arg3[%c0_15, %c0_16, %c0_17] : memref<4x32x8xf32, #tpu.memory_space<vmem>>, vector<1x32x8xf32>
    %17 = vector.shape_cast %16 : vector<1x32x8xf32> to vector<32x8xf32>
    %cst_18 = arith.constant dense<0.000000e+00> : vector<6x8xf32>
    %18 = tpu.matmul %0, %17, %cst_18 {dimension_numbers = #tpu.dot_dimension_numbers<[1], [0], [0], [1], [0, 0, 1, 1], [], []>} : vector<6x32xf32>, vector<32x8xf32>, vector<6x8xf32> -> vector<6x8xf32>
    %c0_19 = arith.constant 0 : index
    %c0_20 = arith.constant 0 : index
    %c0_21 = arith.constant 0 : index
    %19 = vector.load %arg6[%c0_19, %c0_20, %c0_21] : memref<4x1x8xf32, #tpu.memory_space<vmem>>, vector<1x1x8xf32>
    %20 = vector.shape_cast %19 : vector<1x1x8xf32> to vector<1x8xf32>
    %21 = vector.broadcast %20 : vector<1x8xf32> to vector<6x8xf32>
    %22 = arith.addf %18, %21 : vector<6x8xf32>
    %23 = vector.shape_cast %8 : vector<6x8xf32> to vector<2x3x8xf32>
    %cst_22 = arith.constant 0.353553385 : f32
    %24 = vector.broadcast %cst_22 : f32 to vector<2x3x8xf32>
    %25 = arith.mulf %23, %24 : vector<2x3x8xf32>
    %26 = vector.shape_cast %15 : vector<6x8xf32> to vector<2x3x8xf32>
    %27 = vector.shape_cast %22 : vector<6x8xf32> to vector<2x3x8xf32>
    "tpu.trace_start"() <{level = 10 : i32, message = "bld,bmd->blm"}> : () -> ()
    %cst_23 = arith.constant dense<0.000000e+00> : vector<2x3x3xf32>
    %28 = tpu.matmul %25, %26, %cst_23 {dimension_numbers = #tpu.dot_dimension_numbers<[2], [2], [1], [1], [0, 0, 0, 1, 1, 1], [0], [0]>} : vector<2x3x8xf32>, vector<2x3x8xf32>, vector<2x3x3xf32> -> vector<2x3x3xf32>
    "tpu.trace_stop"() : () -> ()
    %cst_24 = arith.constant dense<0xFF800000> : vector<2x3xf32>
    %29 = vector.multi_reduction <maximumf>, %28, %cst_24 [2] : vector<2x3x3xf32> to vector<2x3xf32>
    %30 = vector.shape_cast %29 : vector<2x3xf32> to vector<2x3x1xf32>
    %31 = vector.broadcast %30 : vector<2x3x1xf32> to vector<2x3x3xf32>
    %32 = arith.subf %28, %31 : vector<2x3x3xf32>
    %33 = math.exp %32 : vector<2x3x3xf32>
    %cst_25 = arith.constant dense<0.000000e+00> : vector<2x3xf32>
    %34 = vector.multi_reduction <add>, %33, %cst_25 [2] : vector<2x3x3xf32> to vector<2x3xf32>
    %35 = vector.shape_cast %34 : vector<2x3xf32> to vector<2x3x1xf32>
    %36 = tpu.reciprocal %35 {approx = true} : vector<2x3x1xf32> -> vector<2x3x1xf32>
    %37 = vector.broadcast %36 : vector<2x3x1xf32> to vector<2x3x3xf32>
    %38 = arith.mulf %33, %37 : vector<2x3x3xf32>
    "tpu.trace_start"() <{level = 10 : i32, message = "blm,bmd->bld"}> : () -> ()
    %cst_26 = arith.constant dense<0.000000e+00> : vector<2x3x8xf32>
    %39 = tpu.matmul %38, %27, %cst_26 {dimension_numbers = #tpu.dot_dimension_numbers<[2], [1], [1], [2], [0, 0, 0, 1, 1, 2], [0], [0]>} : vector<2x3x3xf32>, vector<2x3x8xf32>, vector<2x3x8xf32> -> vector<2x3x8xf32>
    "tpu.trace_stop"() : () -> ()
    %40 = vector.shape_cast %39 : vector<2x3x8xf32> to vector<6x8xf32>
    %c0_27 = arith.constant 0 : index
    %c0_28 = arith.constant 0 : index
    %c0_29 = arith.constant 0 : index
    %41 = vector.load %arg7[%c0_27, %c0_28, %c0_29] : memref<4x8x32xf32, #tpu.memory_space<vmem>>, vector<1x8x32xf32>
    %42 = vector.shape_cast %41 : vector<1x8x32xf32> to vector<8x32xf32>
    %cst_30 = arith.constant dense<0.000000e+00> : vector<6x32xf32>
    %43 = tpu.matmul %40, %42, %cst_30 {dimension_numbers = #tpu.dot_dimension_numbers<[1], [0], [0], [1], [0, 0, 1, 1], [], []>} : vector<6x8xf32>, vector<8x32xf32>, vector<6x32xf32> -> vector<6x32xf32>
    %44 = arith.addf %1, %43 : vector<6x32xf32>
    %c1 = arith.constant 1 : index
    %c0_31 = arith.constant 0 : index
    %c0_32 = arith.constant 0 : index
    %45 = vector.load %arg1[%c1, %c0_31, %c0_32] : memref<4x32x8xf32, #tpu.memory_space<vmem>>, vector<1x32x8xf32>
    %46 = vector.shape_cast %45 : vector<1x32x8xf32> to vector<32x8xf32>
    %cst_33 = arith.constant dense<0.000000e+00> : vector<6x8xf32>
    %47 = tpu.matmul %0, %46, %cst_33 {dimension_numbers = #tpu.dot_dimension_numbers<[1], [0], [0], [1], [0, 0, 1, 1], [], []>} : vector<6x32xf32>, vector<32x8xf32>, vector<6x8xf32> -> vector<6x8xf32>
    %c1_34 = arith.constant 1 : index
    %c0_35 = arith.constant 0 : index
    %c0_36 = arith.constant 0 : index
    %48 = vector.load %arg4[%c1_34, %c0_35, %c0_36] : memref<4x1x8xf32, #tpu.memory_space<vmem>>, vector<1x1x8xf32>
    %49 = vector.shape_cast %48 : vector<1x1x8xf32> to vector<1x8xf32>
    %50 = vector.broadcast %49 : vector<1x8xf32> to vector<6x8xf32>
    %51 = arith.addf %47, %50 : vector<6x8xf32>
    %c1_37 = arith.constant 1 : index
    %c0_38 = arith.constant 0 : index
    %c0_39 = arith.constant 0 : index
    %52 = vector.load %arg2[%c1_37, %c0_38, %c0_39] : memref<4x32x8xf32, #tpu.memory_space<vmem>>, vector<1x32x8xf32>
    %53 = vector.shape_cast %52 : vector<1x32x8xf32> to vector<32x8xf32>
    %cst_40 = arith.constant dense<0.000000e+00> : vector<6x8xf32>
    %54 = tpu.matmul %0, %53, %cst_40 {dimension_numbers = #tpu.dot_dimension_numbers<[1], [0], [0], [1], [0, 0, 1, 1], [], []>} : vector<6x32xf32>, vector<32x8xf32>, vector<6x8xf32> -> vector<6x8xf32>
    %c1_41 = arith.constant 1 : index
    %c0_42 = arith.constant 0 : index
    %c0_43 = arith.constant 0 : index
    %55 = vector.load %arg5[%c1_41, %c0_42, %c0_43] : memref<4x1x8xf32, #tpu.memory_space<vmem>>, vector<1x1x8xf32>
    %56 = vector.shape_cast %55 : vector<1x1x8xf32> to vector<1x8xf32>
    %57 = vector.broadcast %56 : vector<1x8xf32> to vector<6x8xf32>
    %58 = arith.addf %54, %57 : vector<6x8xf32>
    %c1_44 = arith.constant 1 : index
    %c0_45 = arith.constant 0 : index
    %c0_46 = arith.constant 0 : index
    %59 = vector.load %arg3[%c1_44, %c0_45, %c0_46] : memref<4x32x8xf32, #tpu.memory_space<vmem>>, vector<1x32x8xf32>
    %60 = vector.shape_cast %59 : vector<1x32x8xf32> to vector<32x8xf32>
    %cst_47 = arith.constant dense<0.000000e+00> : vector<6x8xf32>
    %61 = tpu.matmul %0, %60, %cst_47 {dimension_numbers = #tpu.dot_dimension_numbers<[1], [0], [0], [1], [0, 0, 1, 1], [], []>} : vector<6x32xf32>, vector<32x8xf32>, vector<6x8xf32> -> vector<6x8xf32>
    %c1_48 = arith.constant 1 : index
    %c0_49 = arith.constant 0 : index
    %c0_50 = arith.constant 0 : index
    %62 = vector.load %arg6[%c1_48, %c0_49, %c0_50] : memref<4x1x8xf32, #tpu.memory_space<vmem>>, vector<1x1x8xf32>
    %63 = vector.shape_cast %62 : vector<1x1x8xf32> to vector<1x8xf32>
    %64 = vector.broadcast %63 : vector<1x8xf32> to vector<6x8xf32>
    %65 = arith.addf %61, %64 : vector<6x8xf32>
    %66 = vector.shape_cast %51 : vector<6x8xf32> to vector<2x3x8xf32>
    %cst_51 = arith.constant 0.353553385 : f32
    %67 = vector.broadcast %cst_51 : f32 to vector<2x3x8xf32>
    %68 = arith.mulf %66, %67 : vector<2x3x8xf32>
    %69 = vector.shape_cast %58 : vector<6x8xf32> to vector<2x3x8xf32>
    %70 = vector.shape_cast %65 : vector<6x8xf32> to vector<2x3x8xf32>
    "tpu.trace_start"() <{level = 10 : i32, message = "bld,bmd->blm"}> : () -> ()
    %cst_52 = arith.constant dense<0.000000e+00> : vector<2x3x3xf32>
    %71 = tpu.matmul %68, %69, %cst_52 {dimension_numbers = #tpu.dot_dimension_numbers<[2], [2], [1], [1], [0, 0, 0, 1, 1, 1], [0], [0]>} : vector<2x3x8xf32>, vector<2x3x8xf32>, vector<2x3x3xf32> -> vector<2x3x3xf32>
    "tpu.trace_stop"() : () -> ()
    %cst_53 = arith.constant dense<0xFF800000> : vector<2x3xf32>
    %72 = vector.multi_reduction <maximumf>, %71, %cst_53 [2] : vector<2x3x3xf32> to vector<2x3xf32>
    %73 = vector.shape_cast %72 : vector<2x3xf32> to vector<2x3x1xf32>
    %74 = vector.broadcast %73 : vector<2x3x1xf32> to vector<2x3x3xf32>
    %75 = arith.subf %71, %74 : vector<2x3x3xf32>
    %76 = math.exp %75 : vector<2x3x3xf32>
    %cst_54 = arith.constant dense<0.000000e+00> : vector<2x3xf32>
    %77 = vector.multi_reduction <add>, %76, %cst_54 [2] : vector<2x3x3xf32> to vector<2x3xf32>
    %78 = vector.shape_cast %77 : vector<2x3xf32> to vector<2x3x1xf32>
    %79 = tpu.reciprocal %78 {approx = true} : vector<2x3x1xf32> -> vector<2x3x1xf32>
    %80 = vector.broadcast %79 : vector<2x3x1xf32> to vector<2x3x3xf32>
    %81 = arith.mulf %76, %80 : vector<2x3x3xf32>
    "tpu.trace_start"() <{level = 10 : i32, message = "blm,bmd->bld"}> : () -> ()
    %cst_55 = arith.constant dense<0.000000e+00> : vector<2x3x8xf32>
    %82 = tpu.matmul %81, %70, %cst_55 {dimension_numbers = #tpu.dot_dimension_numbers<[2], [1], [1], [2], [0, 0, 0, 1, 1, 2], [0], [0]>} : vector<2x3x3xf32>, vector<2x3x8xf32>, vector<2x3x8xf32> -> vector<2x3x8xf32>
    "tpu.trace_stop"() : () -> ()
    %83 = vector.shape_cast %82 : vector<2x3x8xf32> to vector<6x8xf32>
    %c1_56 = arith.constant 1 : index
    %c0_57 = arith.constant 0 : index
    %c0_58 = arith.constant 0 : index
    %84 = vector.load %arg7[%c1_56, %c0_57, %c0_58] : memref<4x8x32xf32, #tpu.memory_space<vmem>>, vector<1x8x32xf32>
    %85 = vector.shape_cast %84 : vector<1x8x32xf32> to vector<8x32xf32>
    %cst_59 = arith.constant dense<0.000000e+00> : vector<6x32xf32>
    %86 = tpu.matmul %83, %85, %cst_59 {dimension_numbers = #tpu.dot_dimension_numbers<[1], [0], [0], [1], [0, 0, 1, 1], [], []>} : vector<6x8xf32>, vector<8x32xf32>, vector<6x32xf32> -> vector<6x32xf32>
    %87 = arith.addf %44, %86 : vector<6x32xf32>
    %c2 = arith.constant 2 : index
    %c0_60 = arith.constant 0 : index
    %c0_61 = arith.constant 0 : index
    %88 = vector.load %arg1[%c2, %c0_60, %c0_61] : memref<4x32x8xf32, #tpu.memory_space<vmem>>, vector<1x32x8xf32>
    %89 = vector.shape_cast %88 : vector<1x32x8xf32> to vector<32x8xf32>
    %cst_62 = arith.constant dense<0.000000e+00> : vector<6x8xf32>
    %90 = tpu.matmul %0, %89, %cst_62 {dimension_numbers = #tpu.dot_dimension_numbers<[1], [0], [0], [1], [0, 0, 1, 1], [], []>} : vector<6x32xf32>, vector<32x8xf32>, vector<6x8xf32> -> vector<6x8xf32>
    %c2_63 = arith.constant 2 : index
    %c0_64 = arith.constant 0 : index
    %c0_65 = arith.constant 0 : index
    %91 = vector.load %arg4[%c2_63, %c0_64, %c0_65] : memref<4x1x8xf32, #tpu.memory_space<vmem>>, vector<1x1x8xf32>
    %92 = vector.shape_cast %91 : vector<1x1x8xf32> to vector<1x8xf32>
    %93 = vector.broadcast %92 : vector<1x8xf32> to vector<6x8xf32>
    %94 = arith.addf %90, %93 : vector<6x8xf32>
    %c2_66 = arith.constant 2 : index
    %c0_67 = arith.constant 0 : index
    %c0_68 = arith.constant 0 : index
    %95 = vector.load %arg2[%c2_66, %c0_67, %c0_68] : memref<4x32x8xf32, #tpu.memory_space<vmem>>, vector<1x32x8xf32>
    %96 = vector.shape_cast %95 : vector<1x32x8xf32> to vector<32x8xf32>
    %cst_69 = arith.constant dense<0.000000e+00> : vector<6x8xf32>
    %97 = tpu.matmul %0, %96, %cst_69 {dimension_numbers = #tpu.dot_dimension_numbers<[1], [0], [0], [1], [0, 0, 1, 1], [], []>} : vector<6x32xf32>, vector<32x8xf32>, vector<6x8xf32> -> vector<6x8xf32>
    %c2_70 = arith.constant 2 : index
    %c0_71 = arith.constant 0 : index
    %c0_72 = arith.constant 0 : index
    %98 = vector.load %arg5[%c2_70, %c0_71, %c0_72] : memref<4x1x8xf32, #tpu.memory_space<vmem>>, vector<1x1x8xf32>
    %99 = vector.shape_cast %98 : vector<1x1x8xf32> to vector<1x8xf32>
    %100 = vector.broadcast %99 : vector<1x8xf32> to vector<6x8xf32>
    %101 = arith.addf %97, %100 : vector<6x8xf32>
    %c2_73 = arith.constant 2 : index
    %c0_74 = arith.constant 0 : index
    %c0_75 = arith.constant 0 : index
    %102 = vector.load %arg3[%c2_73, %c0_74, %c0_75] : memref<4x32x8xf32, #tpu.memory_space<vmem>>, vector<1x32x8xf32>
    %103 = vector.shape_cast %102 : vector<1x32x8xf32> to vector<32x8xf32>
    %cst_76 = arith.constant dense<0.000000e+00> : vector<6x8xf32>
    %104 = tpu.matmul %0, %103, %cst_76 {dimension_numbers = #tpu.dot_dimension_numbers<[1], [0], [0], [1], [0, 0, 1, 1], [], []>} : vector<6x32xf32>, vector<32x8xf32>, vector<6x8xf32> -> vector<6x8xf32>
    %c2_77 = arith.constant 2 : index
    %c0_78 = arith.constant 0 : index
    %c0_79 = arith.constant 0 : index
    %105 = vector.load %arg6[%c2_77, %c0_78, %c0_79] : memref<4x1x8xf32, #tpu.memory_space<vmem>>, vector<1x1x8xf32>
    %106 = vector.shape_cast %105 : vector<1x1x8xf32> to vector<1x8xf32>
    %107 = vector.broadcast %106 : vector<1x8xf32> to vector<6x8xf32>
    %108 = arith.addf %104, %107 : vector<6x8xf32>
    %109 = vector.shape_cast %94 : vector<6x8xf32> to vector<2x3x8xf32>
    %cst_80 = arith.constant 0.353553385 : f32
    %110 = vector.broadcast %cst_80 : f32 to vector<2x3x8xf32>
    %111 = arith.mulf %109, %110 : vector<2x3x8xf32>
    %112 = vector.shape_cast %101 : vector<6x8xf32> to vector<2x3x8xf32>
    %113 = vector.shape_cast %108 : vector<6x8xf32> to vector<2x3x8xf32>
    "tpu.trace_start"() <{level = 10 : i32, message = "bld,bmd->blm"}> : () -> ()
    %cst_81 = arith.constant dense<0.000000e+00> : vector<2x3x3xf32>
    %114 = tpu.matmul %111, %112, %cst_81 {dimension_numbers = #tpu.dot_dimension_numbers<[2], [2], [1], [1], [0, 0, 0, 1, 1, 1], [0], [0]>} : vector<2x3x8xf32>, vector<2x3x8xf32>, vector<2x3x3xf32> -> vector<2x3x3xf32>
    "tpu.trace_stop"() : () -> ()
    %cst_82 = arith.constant dense<0xFF800000> : vector<2x3xf32>
    %115 = vector.multi_reduction <maximumf>, %114, %cst_82 [2] : vector<2x3x3xf32> to vector<2x3xf32>
    %116 = vector.shape_cast %115 : vector<2x3xf32> to vector<2x3x1xf32>
    %117 = vector.broadcast %116 : vector<2x3x1xf32> to vector<2x3x3xf32>
    %118 = arith.subf %114, %117 : vector<2x3x3xf32>
    %119 = math.exp %118 : vector<2x3x3xf32>
    %cst_83 = arith.constant dense<0.000000e+00> : vector<2x3xf32>
    %120 = vector.multi_reduction <add>, %119, %cst_83 [2] : vector<2x3x3xf32> to vector<2x3xf32>
    %121 = vector.shape_cast %120 : vector<2x3xf32> to vector<2x3x1xf32>
    %122 = tpu.reciprocal %121 {approx = true} : vector<2x3x1xf32> -> vector<2x3x1xf32>
    %123 = vector.broadcast %122 : vector<2x3x1xf32> to vector<2x3x3xf32>
    %124 = arith.mulf %119, %123 : vector<2x3x3xf32>
    "tpu.trace_start"() <{level = 10 : i32, message = "blm,bmd->bld"}> : () -> ()
    %cst_84 = arith.constant dense<0.000000e+00> : vector<2x3x8xf32>
    %125 = tpu.matmul %124, %113, %cst_84 {dimension_numbers = #tpu.dot_dimension_numbers<[2], [1], [1], [2], [0, 0, 0, 1, 1, 2], [0], [0]>} : vector<2x3x3xf32>, vector<2x3x8xf32>, vector<2x3x8xf32> -> vector<2x3x8xf32>
    "tpu.trace_stop"() : () -> ()
    %126 = vector.shape_cast %125 : vector<2x3x8xf32> to vector<6x8xf32>
    %c2_85 = arith.constant 2 : index
    %c0_86 = arith.constant 0 : index
    %c0_87 = arith.constant 0 : index
    %127 = vector.load %arg7[%c2_85, %c0_86, %c0_87] : memref<4x8x32xf32, #tpu.memory_space<vmem>>, vector<1x8x32xf32>
    %128 = vector.shape_cast %127 : vector<1x8x32xf32> to vector<8x32xf32>
    %cst_88 = arith.constant dense<0.000000e+00> : vector<6x32xf32>
    %129 = tpu.matmul %126, %128, %cst_88 {dimension_numbers = #tpu.dot_dimension_numbers<[1], [0], [0], [1], [0, 0, 1, 1], [], []>} : vector<6x8xf32>, vector<8x32xf32>, vector<6x32xf32> -> vector<6x32xf32>
    %130 = arith.addf %87, %129 : vector<6x32xf32>
    %c3 = arith.constant 3 : index
    %c0_89 = arith.constant 0 : index
    %c0_90 = arith.constant 0 : index
    %131 = vector.load %arg1[%c3, %c0_89, %c0_90] : memref<4x32x8xf32, #tpu.memory_space<vmem>>, vector<1x32x8xf32>
    %132 = vector.shape_cast %131 : vector<1x32x8xf32> to vector<32x8xf32>
    %cst_91 = arith.constant dense<0.000000e+00> : vector<6x8xf32>
    %133 = tpu.matmul %0, %132, %cst_91 {dimension_numbers = #tpu.dot_dimension_numbers<[1], [0], [0], [1], [0, 0, 1, 1], [], []>} : vector<6x32xf32>, vector<32x8xf32>, vector<6x8xf32> -> vector<6x8xf32>
    %c3_92 = arith.constant 3 : index
    %c0_93 = arith.constant 0 : index
    %c0_94 = arith.constant 0 : index
    %134 = vector.load %arg4[%c3_92, %c0_93, %c0_94] : memref<4x1x8xf32, #tpu.memory_space<vmem>>, vector<1x1x8xf32>
    %135 = vector.shape_cast %134 : vector<1x1x8xf32> to vector<1x8xf32>
    %136 = vector.broadcast %135 : vector<1x8xf32> to vector<6x8xf32>
    %137 = arith.addf %133, %136 : vector<6x8xf32>
    %c3_95 = arith.constant 3 : index
    %c0_96 = arith.constant 0 : index
    %c0_97 = arith.constant 0 : index
    %138 = vector.load %arg2[%c3_95, %c0_96, %c0_97] : memref<4x32x8xf32, #tpu.memory_space<vmem>>, vector<1x32x8xf32>
    %139 = vector.shape_cast %138 : vector<1x32x8xf32> to vector<32x8xf32>
    %cst_98 = arith.constant dense<0.000000e+00> : vector<6x8xf32>
    %140 = tpu.matmul %0, %139, %cst_98 {dimension_numbers = #tpu.dot_dimension_numbers<[1], [0], [0], [1], [0, 0, 1, 1], [], []>} : vector<6x32xf32>, vector<32x8xf32>, vector<6x8xf32> -> vector<6x8xf32>
    %c3_99 = arith.constant 3 : index
    %c0_100 = arith.constant 0 : index
    %c0_101 = arith.constant 0 : index
    %141 = vector.load %arg5[%c3_99, %c0_100, %c0_101] : memref<4x1x8xf32, #tpu.memory_space<vmem>>, vector<1x1x8xf32>
    %142 = vector.shape_cast %141 : vector<1x1x8xf32> to vector<1x8xf32>
    %143 = vector.broadcast %142 : vector<1x8xf32> to vector<6x8xf32>
    %144 = arith.addf %140, %143 : vector<6x8xf32>
    %c3_102 = arith.constant 3 : index
    %c0_103 = arith.constant 0 : index
    %c0_104 = arith.constant 0 : index
    %145 = vector.load %arg3[%c3_102, %c0_103, %c0_104] : memref<4x32x8xf32, #tpu.memory_space<vmem>>, vector<1x32x8xf32>
    %146 = vector.shape_cast %145 : vector<1x32x8xf32> to vector<32x8xf32>
    %cst_105 = arith.constant dense<0.000000e+00> : vector<6x8xf32>
    %147 = tpu.matmul %0, %146, %cst_105 {dimension_numbers = #tpu.dot_dimension_numbers<[1], [0], [0], [1], [0, 0, 1, 1], [], []>} : vector<6x32xf32>, vector<32x8xf32>, vector<6x8xf32> -> vector<6x8xf32>
    %c3_106 = arith.constant 3 : index
    %c0_107 = arith.constant 0 : index
    %c0_108 = arith.constant 0 : index
    %148 = vector.load %arg6[%c3_106, %c0_107, %c0_108] : memref<4x1x8xf32, #tpu.memory_space<vmem>>, vector<1x1x8xf32>
    %149 = vector.shape_cast %148 : vector<1x1x8xf32> to vector<1x8xf32>
    %150 = vector.broadcast %149 : vector<1x8xf32> to vector<6x8xf32>
    %151 = arith.addf %147, %150 : vector<6x8xf32>
    %152 = vector.shape_cast %137 : vector<6x8xf32> to vector<2x3x8xf32>
    %cst_109 = arith.constant 0.353553385 : f32
    %153 = vector.broadcast %cst_109 : f32 to vector<2x3x8xf32>
    %154 = arith.mulf %152, %153 : vector<2x3x8xf32>
    %155 = vector.shape_cast %144 : vector<6x8xf32> to vector<2x3x8xf32>
    %156 = vector.shape_cast %151 : vector<6x8xf32> to vector<2x3x8xf32>
    "tpu.trace_start"() <{level = 10 : i32, message = "bld,bmd->blm"}> : () -> ()
    %cst_110 = arith.constant dense<0.000000e+00> : vector<2x3x3xf32>
    %157 = tpu.matmul %154, %155, %cst_110 {dimension_numbers = #tpu.dot_dimension_numbers<[2], [2], [1], [1], [0, 0, 0, 1, 1, 1], [0], [0]>} : vector<2x3x8xf32>, vector<2x3x8xf32>, vector<2x3x3xf32> -> vector<2x3x3xf32>
    "tpu.trace_stop"() : () -> ()
    %cst_111 = arith.constant dense<0xFF800000> : vector<2x3xf32>
    %158 = vector.multi_reduction <maximumf>, %157, %cst_111 [2] : vector<2x3x3xf32> to vector<2x3xf32>
    %159 = vector.shape_cast %158 : vector<2x3xf32> to vector<2x3x1xf32>
    %160 = vector.broadcast %159 : vector<2x3x1xf32> to vector<2x3x3xf32>
    %161 = arith.subf %157, %160 : vector<2x3x3xf32>
    %162 = math.exp %161 : vector<2x3x3xf32>
    %cst_112 = arith.constant dense<0.000000e+00> : vector<2x3xf32>
    %163 = vector.multi_reduction <add>, %162, %cst_112 [2] : vector<2x3x3xf32> to vector<2x3xf32>
    %164 = vector.shape_cast %163 : vector<2x3xf32> to vector<2x3x1xf32>
    %165 = tpu.reciprocal %164 {approx = true} : vector<2x3x1xf32> -> vector<2x3x1xf32>
    %166 = vector.broadcast %165 : vector<2x3x1xf32> to vector<2x3x3xf32>
    %167 = arith.mulf %162, %166 : vector<2x3x3xf32>
    "tpu.trace_start"() <{level = 10 : i32, message = "blm,bmd->bld"}> : () -> ()
    %cst_113 = arith.constant dense<0.000000e+00> : vector<2x3x8xf32>
    %168 = tpu.matmul %167, %156, %cst_113 {dimension_numbers = #tpu.dot_dimension_numbers<[2], [1], [1], [2], [0, 0, 0, 1, 1, 2], [0], [0]>} : vector<2x3x3xf32>, vector<2x3x8xf32>, vector<2x3x8xf32> -> vector<2x3x8xf32>
    "tpu.trace_stop"() : () -> ()
    %169 = vector.shape_cast %168 : vector<2x3x8xf32> to vector<6x8xf32>
    %c3_114 = arith.constant 3 : index
    %c0_115 = arith.constant 0 : index
    %c0_116 = arith.constant 0 : index
    %170 = vector.load %arg7[%c3_114, %c0_115, %c0_116] : memref<4x8x32xf32, #tpu.memory_space<vmem>>, vector<1x8x32xf32>
    %171 = vector.shape_cast %170 : vector<1x8x32xf32> to vector<8x32xf32>
    %cst_117 = arith.constant dense<0.000000e+00> : vector<6x32xf32>
    %172 = tpu.matmul %169, %171, %cst_117 {dimension_numbers = #tpu.dot_dimension_numbers<[1], [0], [0], [1], [0, 0, 1, 1], [], []>} : vector<6x8xf32>, vector<8x32xf32>, vector<6x32xf32> -> vector<6x32xf32>
    %173 = arith.addf %130, %172 : vector<6x32xf32>
    %c0_118 = arith.constant 0 : index
    %c0_119 = arith.constant 0 : index
    %174 = vector.load %arg8[%c0_118, %c0_119] : memref<1x32xf32, #tpu.memory_space<vmem>>, vector<1x32xf32>
    %175 = vector.broadcast %174 : vector<1x32xf32> to vector<6x32xf32>
    %176 = arith.addf %173, %175 : vector<6x32xf32>
    %177 = vector.shape_cast %176 : vector<6x32xf32> to vector<2x3x32xf32>
    %cst_120 = arith.constant 0.000000e+00 : f32
    %178 = vector.broadcast %cst_120 : f32 to vector<2x128xf32>
    %179 = vector.extract_strided_slice %177 {offsets = [0, 0, 0], sizes = [2, 1, 32], strides = [1, 1, 1]} : vector<2x3x32xf32> to vector<2x1x32xf32>
    %180 = vector.shape_cast %179 : vector<2x1x32xf32> to vector<2x32xf32>
    %c0_121 = arith.constant 0 : index
    %c0_122 = arith.constant 0 : index
    %c0_123 = arith.constant 0 : index
    %181 = vector.load %arg9[%c0_121, %c0_122, %c0_123] : memref<3x32x128xf32, #tpu.memory_space<vmem>>, vector<1x32x128xf32>
    %182 = vector.shape_cast %181 : vector<1x32x128xf32> to vector<32x128xf32>
    %cst_124 = arith.constant dense<0.000000e+00> : vector<2x128xf32>
    %183 = tpu.matmul %180, %182, %cst_124 {dimension_numbers = #tpu.dot_dimension_numbers<[1], [0], [0], [1], [0, 0, 1, 1], [], []>} : vector<2x32xf32>, vector<32x128xf32>, vector<2x128xf32> -> vector<2x128xf32>
    %184 = arith.addf %178, %183 : vector<2x128xf32>
    %185 = vector.extract_strided_slice %177 {offsets = [0, 1, 0], sizes = [2, 1, 32], strides = [1, 1, 1]} : vector<2x3x32xf32> to vector<2x1x32xf32>
    %186 = vector.shape_cast %185 : vector<2x1x32xf32> to vector<2x32xf32>
    %c1_125 = arith.constant 1 : index
    %c0_126 = arith.constant 0 : index
    %c0_127 = arith.constant 0 : index
    %187 = vector.load %arg9[%c1_125, %c0_126, %c0_127] : memref<3x32x128xf32, #tpu.memory_space<vmem>>, vector<1x32x128xf32>
    %188 = vector.shape_cast %187 : vector<1x32x128xf32> to vector<32x128xf32>
    %cst_128 = arith.constant dense<0.000000e+00> : vector<2x128xf32>
    %189 = tpu.matmul %186, %188, %cst_128 {dimension_numbers = #tpu.dot_dimension_numbers<[1], [0], [0], [1], [0, 0, 1, 1], [], []>} : vector<2x32xf32>, vector<32x128xf32>, vector<2x128xf32> -> vector<2x128xf32>
    %190 = arith.addf %184, %189 : vector<2x128xf32>
    %191 = vector.extract_strided_slice %177 {offsets = [0, 2, 0], sizes = [2, 1, 32], strides = [1, 1, 1]} : vector<2x3x32xf32> to vector<2x1x32xf32>
    %192 = vector.shape_cast %191 : vector<2x1x32xf32> to vector<2x32xf32>
    %c2_129 = arith.constant 2 : index
    %c0_130 = arith.constant 0 : index
    %c0_131 = arith.constant 0 : index
    %193 = vector.load %arg9[%c2_129, %c0_130, %c0_131] : memref<3x32x128xf32, #tpu.memory_space<vmem>>, vector<1x32x128xf32>
    %194 = vector.shape_cast %193 : vector<1x32x128xf32> to vector<32x128xf32>
    %cst_132 = arith.constant dense<0.000000e+00> : vector<2x128xf32>
    %195 = tpu.matmul %192, %194, %cst_132 {dimension_numbers = #tpu.dot_dimension_numbers<[1], [0], [0], [1], [0, 0, 1, 1], [], []>} : vector<2x32xf32>, vector<32x128xf32>, vector<2x128xf32> -> vector<2x128xf32>
    %196 = arith.addf %190, %195 : vector<2x128xf32>
    %c0_133 = arith.constant 0 : index
    %c0_134 = arith.constant 0 : index
    %197 = vector.load %arg10[%c0_133, %c0_134] : memref<1x128xf32, #tpu.memory_space<vmem>>, vector<1x128xf32>
    %198 = vector.broadcast %197 : vector<1x128xf32> to vector<2x128xf32>
    %199 = arith.addf %196, %198 : vector<2x128xf32>
    %cst_135 = arith.constant 0.000000e+00 : f32
    %200 = vector.broadcast %cst_135 : f32 to vector<2x128xf32>
    %201 = arith.maximumf %199, %200 : vector<2x128xf32>
    %c0_136 = arith.constant 0 : index
    %c0_137 = arith.constant 0 : index
    %202 = vector.load %arg11[%c0_136, %c0_137] : memref<128x4xf32, #tpu.memory_space<vmem>>, vector<128x4xf32>
    %cst_138 = arith.constant dense<0.000000e+00> : vector<2x4xf32>
    %203 = tpu.matmul %201, %202, %cst_138 {dimension_numbers = #tpu.dot_dimension_numbers<[1], [0], [0], [1], [0, 0, 1, 1], [], []>} : vector<2x128xf32>, vector<128x4xf32>, vector<2x4xf32> -> vector<2x4xf32>
    %c0_139 = arith.constant 0 : index
    %c0_140 = arith.constant 0 : index
    %204 = vector.load %arg12[%c0_139, %c0_140] : memref<1x4xf32, #tpu.memory_space<vmem>>, vector<1x4xf32>
    %205 = vector.broadcast %204 : vector<1x4xf32> to vector<2x4xf32>
    %206 = arith.addf %203, %205 : vector<2x4xf32>
    %c0_141 = arith.constant 0 : index
    %c0_142 = arith.constant 0 : index
    %207 = vector.load %arg13[%c0_141, %c0_142] : memref<2x4xf32, #tpu.memory_space<vmem>>, vector<2x4xf32>
    tpu.vector_store %arg13[%c0_141, %c0_142], %206 {strides = array<i32>} : memref<2x4xf32, #tpu.memory_space<vmem>>, vector<2x4xf32>,
    return
  }
}

</mosaic_0001>

<bundles_post_ra>
// kernel: pyramid_lstm_forward.2
= control target key start
LH: loop header
LB: loop body
LE: loop exit
PB: predicated region body
PF: predicated region fallthrough
CT: control target
= control target key end

     0   :  { %s2514_s0 = inlined_call_operand.vmem [shape: s32[3], index: 0, kind: input, shape index: {}]   ;;  %s2515_s1 = inlined_call_operand.vmem [shape: f32[3,6,2,128], index: 1, kind: input, shape index: {}]   ;;  %s2516_s2 = inlined_call_operand.vmem [shape: f32[3,32,128], index: 2, kind: input, shape index: {}]   ;;  %s2517_s3 = inlined_call_operand.vmem [shape: f32[3,64,128], index: 3, kind: input, shape index: {}]   ;;  %s2518_s4 = inlined_call_operand.vmem [shape: f32[3,1,128], index: 4, kind: input, shape index: {}]   ;;  %s2519_s5 = inlined_call_operand.vmem [shape: f32[3,2,32], index: 5, kind: output, shape index: {}]  }
   0x1   :  { %s10_s20 = sshll.u32 %s2514_s0, 4  ;;  %s11_s20 = int_to_ptr.vmem [resolvable:$true] %s10_s20 }
   0x2   :  { %s2161_s21 = scalar_lea.vmem %s11_s20, 16  ;;  %p2166_p1 = scmp.lt.s32.totalorder %s11_s20, %s11_s20 }
   0x3   :  { %p2162_p0 = scmp.ne.s32.totalorder %s11_s20, %s2161_s21  ;;  %p2167_p2 = scmp.lt.s32.totalorder %s2161_s21, %s2161_s21 }
   0x5   :  { %p2168_p3 = por %p2167_p2, %p2166_p1 }
   0x7   :  { %p2169_p4 = pnand %p2168_p3, %p2162_p0 }
   0x9   :  { %2172 = shalt.err (!%p2169_p4)  }
   0xa   :  { %s2183_s22 = smov [#allocation3]  }
   0xb   :  { %13 = dma.vmem_to_smem %s11_s20, 16, %s2183_s22, [#allocation2] }
   0xc   :  { %2177 = dma.done.wait [#allocation2], 16 }
   0xd   :  { %2178 = vsyncadd [#allocation2], 4294967280 }
   0xe   :  { %15 = sfence }
   0xf   :  { %s2222_s23 = smov 0  }
  0x10 LB: > { %s2228_s0 = sadd.s32 4294967295, %s2181_s23   ;;  %p1638_p5 = scmp.ge.s32.totalorder %s2181_s23, 1  ;;  %s2181_s23 = sphi %s2222_s23, %s21_s23  }
  0x11   : > { %p197_p6 = scmp.lt.s32.totalorder %s2181_s23, 4 }
  0x13   : > { %p198_p7 = pnand %p1638_p5, %p197_p6 }
  0x14   : > { %p235_p8 = scmp.lt.s32.totalorder (!%p198_p7), %s2228_s0, 2  ;;  %v2184_v0 = vmov (!%p198_p7), 0.0|0.0   ;;  %vm2185_vm0 = vmmov (!%p198_p7), 0   ;;  %v2186_v1 = vmov (!%p198_p7), 0.0   ;;  %s2187_s8 = smov (!%p198_p7), 64   ;;  %vm278_vm1 = vcmask (!%p198_p7), 261120  }
  0x15   : > { %201 = sbr.rel (%p198_p7) target bundleno = 4987 (0x137b), region = 36  ;;  %1942 = vmatprep.subr.bf16.mxu1 (!%p198_p7), %v2184_v0  ;;  %1770 = vmatprep.mubr.msk.f32.mxu1 (!%p198_p7), %vm2185_vm0, %v2186_v1  ;;  %s2188_s9 = smov (!%p198_p7), 32   ;;  %vm382_vm2 = vcmask (!%p198_p7), 523264   ;;  %vm1546_vm3 = vcmask (!%p198_p7), 254976  }
  0x16   : > { %1960 = vmatprep.subr.bf16.mxu0 (!%p198_p7), %v2184_v0  ;;  %1800 = vmatprep.mubr.msk.f32.mxu0 (!%p198_p7), %vm2185_vm0, %v2186_v1  ;;  %s2413_s17 = sld [smem:[#allocation3 + %s2228_s0]] (!%p198_p7) }
  0x1c   : > { %s2237_s24 = scalar_select %p235_p8, %s2228_s0, 2 }
  0x1d   : > { %p890_p9 = scmp.gt.s32.totalorder %s2413_s17, 2  ;;  %p1105_p10 = scmp.gt.s32.totalorder %s2413_s17, 3 }
  0x1e   : > { %s1676_s25 = sshll.u32 %s2237_s24, 5  ;;  %s2050_s29 = smul.u32 12, %s2237_s24 }
  0x1f   : > { %s244_s28 = scalar_lea.vmem %s2516_s2, %s1676_s25  ;;  %s1677_s10 = sshll.u32 %s2237_s24, 6 }
  0x20   : > { %v258_v2 = vld [vmem:[%s244_s28] sm:$0xff]  ;;  %v259_v3 = vld [vmem:[%s244_s28 + $0x8] sm:$0xff]  ;;  %v260_v4 = vld [vmem:[%s244_s28 + $0x10] sm:$0xff]  ;;  %s2265_s7 = scalar_lea.vmem %s2515_s1, %s2050_s29  ;;  %s249_s13 = scalar_lea.vmem %s2517_s3, %s1677_s10 }
  0x21   : > { %v2246_v5 = vpack.c.bf16 %v259_v3, %v258_v2  ;;  %v261_v6 = vld [vmem:[%s244_s28 + $0x18] sm:$0xff]  ;;  %v277_v8 = vld [vmem:[%s2265_s7] sm:$0x3]  ;;  %v263_v23 = vld [vmem:[%s249_s13 + $0x8] sm:$0xff]  ;;  %s252_s16 = scalar_lea.vmem %s2518_s4, %s2237_s24  ;;  %p1320_p11 = scmp.gt.s32.totalorder %s2413_s17, 4 }
  0x22   : > { %v2249_v7 = vpack.c.bf16 %v261_v6, %v260_v4  ;;  %v262_v22 = vld [vmem:[%s249_s13] sm:$0xff]  ;;  %v264_v24 = vld [vmem:[%s249_s13 + $0x10] sm:$0xff]  ;;  %v265_v26 = vld [vmem:[%s249_s13 + $0x18] sm:$0xff]  ;;  %s891_s18 = scalar_select %p890_p9, 1, 0 }
  0x23   : > { %1944 = vmatpush3.bf16.msra.mxu1 %v2246_v5  ;;  %1962 = vmatpush3.bf16.msra.mxu0 %v2246_v5  ;;  %v2277_v25 = vpack.c.bf16 %v263_v23, %v262_v22  ;;  %v2280_v27 = vpack.c.bf16 %v265_v26, %v264_v24  ;;  %v266_v28 = vld [vmem:[%s249_s13 + $0x20] sm:$0xff]  ;;  %v267_v29 = vld [vmem:[%s249_s13 + $0x28] sm:$0xff]  ;;  %v268_v32 = vld [vmem:[%s249_s13 + $0x30] sm:$0xff]  ;;  %s1106_s20 = scalar_select %p1105_p10, 1, 0 }
  0x24   : > { %1945 = vmatprep.subr.bf16.mxu1 %v2184_v0  ;;  %1963 = vmatprep.subr.bf16.mxu0 %v2184_v0  ;;  %v2284_v30 = vpack.c.bf16 %v267_v29, %v266_v28  ;;  %v269_v33 = vld [vmem:[%s249_s13 + $0x38] sm:$0xff]  ;;  %v1649_v39 = vld [vmem:[%s2265_s7 + $0x2] sm:$0x3]  ;;  %v2319_v40 = vld [vmem:[%s252_s16] ss:$0 sm:$0xff]  ;;  %s892_s19 = scvt.s32.f32 %s891_s18  ;;  %p1535_p12 = scmp.gt.s32.totalorder %s2413_s17, 5 }
  0x25   : > { %v2289_v34 = vpack.c.bf16 %v269_v33, %v268_v32  ;;  %s1107_s21 = scvt.s32.f32 %s1106_s20  ;;  %s1644_s27 = sshll.u32 %s2237_s24, 1 }
  0x26   : > { %s1321_s22 = scalar_select %p1320_p11, 1, 0 }
  0x27   : > { %1947 = vmatpush3.bf16.msra.mxu1 %v2249_v7  ;;  %1965 = vmatpush3.bf16.msra.mxu0 %v2249_v7  ;;  %s1536_s25 = scalar_select %p1535_p12, 1, 0 }
  0x28   : > { %1948 = vmatprep.subr.bf16.mxu1 %v2184_v0  ;;  %1966 = vmatprep.subr.bf16.mxu0 %v2184_v0  ;;  %s1322_s0 = scvt.s32.f32 %s1321_s22  ;;  %s256_s30 = scalar_lea.vmem %s2519_s5, %s1644_s27 }
  0x29   : > { %s1537_s26 = scvt.s32.f32 %s1536_s25 }
  0x2a   : > { %1771 = vmatmul.mubr.f32.vlgmr.msra.gmra.mrb[0].mxu1 %v2186_v1 }
  0x2b   : > { %1789 = vmatprep.mubr.msk.f32.mxu1 %vm2185_vm0, %v2186_v1  ;;  %1950 = vmatpush3.bf16.msra.mxu1 %v2277_v25 }
  0x2c   : > { %1951 = vmatprep.subr.bf16.mxu1 %v2184_v0 }
  0x2f   : > { %1953 = vmatpush3.bf16.msra.mxu1 %v2280_v27 }
  0x30   : > { %1954 = vmatprep.subr.bf16.mxu1 %v2184_v0 }
  0x33   : > { %1956 = vmatpush3.bf16.msra.mxu1 %v2284_v30 }
  0x34   : > { %1957 = vmatprep.subr.bf16.mxu1 %v2184_v0 }
  0x37   : > { %1959 = vmatpush3.bf16.msra.mxu1 %v2289_v34 }
  0x38   : > { %1978 = vmatprep.subr.bf16.mxu1 %v2184_v0 }
  0xfd   : > { %v348_v9 = vpop.f32.mrb[0].mxu1 }
  0xfe   : > { %v352_v10 = vadd.f32 %v348_v9, %v277_v8  ;;  %v1772_v11 = vpop.f32.mrb[1].mxu1 }
 0x100   : > { %2065 = vtanh.f32 %v352_v10  ;;  %v1646_v13 = vmul.f32 -1.442695, %v352_v10 }
 0x102   : > { %2067 = vpow2.f32 %v1646_v13 }
 0x10a   : > { %v2066_v12 = vpop.eup %2065 }
 0x10b   : > { %362 = vrot.lane.b32.xlu0 %v2066_v12, %s2187_s8 }
 0x10c   : > { %v2068_v14 = vpop.eup %2067 }
 0x10d   : > { %v356_v15 = vadd.f32 1.0, %v2068_v14 }
 0x10f   : > { %2069 = vrcp.f32 %v356_v15 }
 0x119   : > { %v2070_v16 = vpop.eup %2069 }
 0x11a   : > { %v360_v19 = vmul.f32 0.0, %v2070_v16 }
 0x17d   : > { %v363_v17 = vpop.permute.xlu0 %362 }
 0x17e   : > { %v365_v18 = vmul.f32 %v2070_v16, %v363_v17 }
 0x180   : > { %367 = vrot.lane.b32.xlu0 %v365_v18, %s2188_s9 }
 0x1f2   : > { %v368_v20 = vpop.permute.xlu0 %367 }
 0x1f3   : > { %v2270_v21 = vadd.f32 %v368_v20, %v360_v19 }
 0x1f5   : > { %2071 = vtanh.f32 %v2270_v21 }
 0x1ff   : > { %v2072_v31 = vpop.eup %2071 }
 0x200   : > { %373 = vrot.lane.b32.xlu1 %v2072_v31, %s2187_s8 }
 0x272   : > { %v374_v35 = vpop.permute.xlu1 %373 }
 0x273   : > { %v376_v36 = vmul.f32 %v2070_v16, %v374_v35  ;;  %v1654_v16 = vld [vmem:[%s2265_s7 + $0x4] sm:$0x3] }
 0x275   : > { %378 = vrot.lane.b32.xlu1 %v376_v36, %s2188_s9 }
 0x2e7   : > { %v379_v37 = vpop.permute.xlu1 %378 }
 0x2e8   : > { %v381_v38 = vsel %vm278_vm1, %v379_v37, 0.0  ;;  %1801 = vmatmul.mubr.msk.f32.vlgmr.msra.gmra.mrb[0].mxu0 %vm278_vm1, %v379_v37 }
 0x2e9   : > { %1790 = vmatmul.mubr.msk.f32.vlgmr.msra.gmra.mrb[2].mxu1 %vm382_vm2, %v381_v38  ;;  %1968 = vmatpush3.bf16.msra.mxu0 %v2277_v25 }
 0x2ea   : > { %1969 = vmatprep.subr.bf16.mxu0 %v2184_v0  ;;  %1980 = vmatpush3.bf16.msra.mxu1 %v2246_v5 }
 0x2eb   : > { %1981 = vmatprep.subr.bf16.mxu1 %v2184_v0  ;;  %1830 = vmatprep.mubr.msk.f32.mxu1 %vm2185_vm0, %v2186_v1 }
 0x2ec   : > { %1819 = vmatprep.mubr.msk.f32.mxu0 %vm2185_vm0, %v2186_v1 }
 0x2ed   : > { %1971 = vmatpush3.bf16.msra.mxu0 %v2280_v27 }
 0x2ee   : > { %1972 = vmatprep.subr.bf16.mxu0 %v2184_v0  ;;  %1983 = vmatpush3.bf16.msra.mxu1 %v2249_v7 }
 0x2ef   : > { %1984 = vmatprep.subr.bf16.mxu1 %v2184_v0 }
 0x2f1   : > { %1974 = vmatpush3.bf16.msra.mxu0 %v2284_v30 }
 0x2f2   : > { %1975 = vmatprep.subr.bf16.mxu0 %v2184_v0 }
 0x2f5   : > { %1977 = vmatpush3.bf16.msra.mxu0 %v2289_v34 }
 0x2f6   : > { %1996 = vmatprep.subr.bf16.mxu0 %v2184_v0 }
 0x3bb   : > { %v550_v41 = vpop.f32.mrb[0].mxu0 }
 0x3bc   : > { %v554_v42 = vadd.f32 %v1649_v39, %v550_v41  ;;  %v452_v43 = vpop.f32.mrb[2].mxu1  ;;  %v1802_v44 = vpop.f32.mrb[1].mxu0 }
 0x3bd   : > { %v453_v45 = vadd.f32 %v2319_v40, %v452_v43  ;;  %v1791_v46 = vpop.f32.mrb[3].mxu1 }
 0x3be   : > { %2073 = vtanh.f32 %v554_v42  ;;  %v1651_v49 = vmul.f32 -1.442695, %v554_v42 }
 0x3bf   : > { %2075 = vtanh.f32 %v453_v45  ;;  %v1648_v50 = vmul.f32 -1.442695, %v453_v45 }
 0x3c0   : > { %2077 = vpow2.f32 %v1651_v49 }
 0x3c1   : > { %2079 = vpow2.f32 %v1648_v50 }
 0x3c8   : > { %v2074_v47 = vpop.eup %2073 }
 0x3c9   : > { %v2076_v48 = vpop.eup %2075  ;;  %564 = vrot.lane.b32.xlu1 %v2074_v47, %s2187_s8 }
 0x3ca   : > { %465 = vrot.lane.b32.xlu0 %v2076_v48, %s2187_s8  ;;  %v2078_v51 = vpop.eup %2077 }
 0x3cb   : > { %v2080_v52 = vpop.eup %2079  ;;  %v558_v53 = vadd.f32 1.0, %v2078_v51 }
 0x3cc   : > { %v459_v54 = vadd.f32 1.0, %v2080_v52 }
 0x3cd   : > { %2081 = vrcp.f32 %v558_v53 }
 0x3ce   : > { %2083 = vrcp.f32 %v459_v54 }
 0x3d7   : > { %v2082_v55 = vpop.eup %2081 }
 0x3d8   : > { %v2084_v57 = vpop.eup %2083  ;;  %v562_v61 = vmul.f32 %v2082_v55, %v2270_v21 }
 0x3d9   : > { %v463_v63 = vmul.f32 0.0, %v2084_v57 }
 0x43b   : > { %v565_v56 = vpop.permute.xlu1 %564 }
 0x43c   : > { %v567_v58 = vmul.f32 %v2082_v55, %v565_v56  ;;  %v466_v59 = vpop.permute.xlu0 %465 }
 0x43d   : > { %v468_v60 = vmul.f32 %v2084_v57, %v466_v59 }
 0x43e   : > { %569 = vrot.lane.b32.xlu1 %v567_v58, %s2188_s9 }
 0x43f   : > { %470 = vrot.lane.b32.xlu0 %v468_v60, %s2188_s9 }
 0x4b0   : > { %v570_v62 = vpop.permute.xlu1 %569 }
 0x4b1   : > { %v2327_v2 = vadd.f32 %v570_v62, %v562_v61  ;;  %v471_v3 = vpop.permute.xlu0 %470 }
 0x4b2   : > { %v2329_v4 = vadd.f32 %v471_v3, %v463_v63 }
 0x4b3   : > { %2085 = vtanh.f32 %v2327_v2 }
 0x4b4   : > { %2087 = vtanh.f32 %v2329_v4 }
 0x4bd   : > { %v2086_v6 = vpop.eup %2085 }
 0x4be   : > { %v2088_v8 = vpop.eup %2087  ;;  %575 = vrot.lane.b32.xlu1 %v2086_v6, %s2187_s8 }
 0x4bf   : > { %476 = vrot.lane.b32.xlu0 %v2088_v8, %s2187_s8 }
 0x530   : > { %v576_v9 = vpop.permute.xlu1 %575 }
 0x531   : > { %v578_v10 = vmul.f32 %v2082_v55, %v576_v9  ;;  %v477_v11 = vpop.permute.xlu0 %476 }
 0x532   : > { %v479_v12 = vmul.f32 %v2084_v57, %v477_v11  ;;  %v1659_v57 = vld [vmem:[%s2265_s7 + $0x6] sm:$0x3] }
 0x533   : > { %580 = vrot.lane.b32.xlu0 %v578_v10, %s2188_s9 }
 0x534   : > { %584 = vrot.lane.b32.xlu1 %v479_v12, %s2187_s8 }
 0x5a5   : > { %v581_v13 = vpop.permute.xlu0 %580 }
 0x5a6   : > { %v585_v14 = vpop.permute.xlu1 %584  ;;  %1831 = vmatmul.mubr.msk.f32.vlgmr.msra.gmra.mrb[4].mxu1 %vm278_vm1, %v581_v13 }
 0x5a7   : > { %v587_v15 = vsel %vm278_vm1, %v581_v13, %v585_v14  ;;  %1986 = vmatpush3.bf16.msra.mxu1 %v2277_v25  ;;  %1849 = vmatprep.mubr.msk.f32.mxu1 %vm2185_vm0, %v2186_v1 }
 0x5a8   : > { %1820 = vmatmul.mubr.msk.f32.vlgmr.msra.gmra.mrb[2].mxu0 %vm382_vm2, %v587_v15  ;;  %1987 = vmatprep.subr.bf16.mxu1 %v2184_v0 }
 0x5a9   : > { %1998 = vmatpush3.bf16.msra.mxu0 %v2246_v5  ;;  %1860 = vmatprep.mubr.msk.f32.mxu0 %vm2185_vm0, %v2186_v1 }
 0x5aa   : > { %1999 = vmatprep.subr.bf16.mxu0 %v2184_v0 }
 0x5ab   : > { %1989 = vmatpush3.bf16.msra.mxu1 %v2280_v27 }
 0x5ac   : > { %1990 = vmatprep.subr.bf16.mxu1 %v2184_v0 }
 0x5ad   : > { %2001 = vmatpush3.bf16.msra.mxu0 %v2249_v7 }
 0x5ae   : > { %2002 = vmatprep.subr.bf16.mxu0 %v2184_v0 }
 0x5af   : > { %1992 = vmatpush3.bf16.msra.mxu1 %v2284_v30 }
 0x5b0   : > { %1993 = vmatprep.subr.bf16.mxu1 %v2184_v0 }
 0x5b3   : > { %1995 = vmatpush3.bf16.msra.mxu1 %v2289_v34 }
 0x5b4   : > { %2014 = vmatprep.subr.bf16.mxu1 %v2184_v0 }
 0x679   : > { %v755_v17 = vpop.f32.mrb[4].mxu1 }
 0x67a   : > { %v759_v18 = vadd.f32 %v1654_v16, %v755_v17  ;;  %v1832_v19 = vpop.f32.mrb[5].mxu1 }
 0x67b   : > { %v657_v20 = vpop.f32.mrb[2].mxu0 }
 0x67c   : > { %2089 = vtanh.f32 %v759_v18  ;;  %v658_v21 = vadd.f32 %v2319_v40, %v657_v20  ;;  %v1821_v22 = vpop.f32.mrb[3].mxu0  ;;  %v1656_v26 = vmul.f32 -1.442695, %v759_v18 }
 0x67e   : > { %2091 = vtanh.f32 %v658_v21  ;;  %v1653_v28 = vmul.f32 -1.442695, %v658_v21 }
 0x67f   : > { %2093 = vpow2.f32 %v1656_v26 }
 0x680   : > { %2095 = vpow2.f32 %v1653_v28 }
 0x686   : > { %v2090_v23 = vpop.eup %2089 }
 0x687   : > { %769 = vrot.lane.b32.xlu1 %v2090_v23, %s2187_s8 }
 0x688   : > { %v2092_v24 = vpop.eup %2091 }
 0x689   : > { %670 = vrot.lane.b32.xlu0 %v2092_v24, %s2187_s8  ;;  %v2094_v29 = vpop.eup %2093 }
 0x68a   : > { %v2096_v31 = vpop.eup %2095  ;;  %v763_v32 = vadd.f32 1.0, %v2094_v29 }
 0x68b   : > { %v664_v33 = vadd.f32 1.0, %v2096_v31 }
 0x68c   : > { %2097 = vrcp.f32 %v763_v32 }
 0x68d   : > { %2099 = vrcp.f32 %v664_v33 }
 0x696   : > { %v2098_v35 = vpop.eup %2097 }
 0x697   : > { %v2100_v38 = vpop.eup %2099  ;;  %v767_v42 = vmul.f32 %v2098_v35, %v2327_v2 }
 0x698   : > { %v668_v45 = vmul.f32 %v2100_v38, %v2329_v4 }
 0x6f9   : > { %v770_v36 = vpop.permute.xlu1 %769 }
 0x6fa   : > { %v772_v37 = vmul.f32 %v2098_v35, %v770_v36 }
 0x6fb   : > { %v671_v39 = vpop.permute.xlu0 %670 }
 0x6fc   : > { %774 = vrot.lane.b32.xlu1 %v772_v37, %s2188_s9  ;;  %v673_v41 = vmul.f32 %v2100_v38, %v671_v39 }
 0x6fe   : > { %675 = vrot.lane.b32.xlu0 %v673_v41, %s2188_s9 }
 0x76e   : > { %v775_v43 = vpop.permute.xlu1 %774 }
 0x76f   : > { %v2363_v44 = vadd.f32 %v775_v43, %v767_v42  ;;  %v1664_v42 = vld [vmem:[%s2265_s7 + $0x8] sm:$0x3] }
 0x770   : > { %v676_v46 = vpop.permute.xlu0 %675 }
 0x771   : > { %2101 = vtanh.f32 %v2363_v44  ;;  %v2367_v47 = vadd.f32 %v676_v46, %v668_v45 }
 0x773   : > { %2103 = vtanh.f32 %v2367_v47 }
 0x77b   : > { %v2102_v48 = vpop.eup %2101 }
 0x77c   : > { %780 = vrot.lane.b32.xlu1 %v2102_v48, %s2187_s8 }
 0x77d   : > { %v2104_v49 = vpop.eup %2103 }
 0x77e   : > { %681 = vrot.lane.b32.xlu0 %v2104_v49, %s2187_s8 }
 0x7ee   : > { %v781_v50 = vpop.permute.xlu1 %780 }
 0x7ef   : > { %v783_v51 = vmul.f32 %v2098_v35, %v781_v50  ;;  %v894_v35 = vstv %s892_s19 }
 0x7f0   : > { %v682_v52 = vpop.permute.xlu0 %681 }
 0x7f1   : > { %785 = vrot.lane.b32.xlu0 %v783_v51, %s2188_s9  ;;  %v2373_v53 = vmul.f32 %v2100_v38, %v682_v52 }
 0x7f3   : > { %789 = vrot.lane.b32.xlu1 %v2373_v53, %s2187_s8 }
 0x863   : > { %v786_v54 = vpop.permute.xlu0 %785 }
 0x864   : > { %1861 = vmatmul.mubr.msk.f32.vlgmr.msra.gmra.mrb[4].mxu0 %vm278_vm1, %v786_v54 }
 0x865   : > { %2004 = vmatpush3.bf16.msra.mxu0 %v2277_v25  ;;  %1879 = vmatprep.mubr.msk.f32.mxu0 %vm2185_vm0, %v2186_v1  ;;  %v790_v55 = vpop.permute.xlu1 %789 }
 0x866   : > { %2005 = vmatprep.subr.bf16.mxu0 %v2184_v0  ;;  %v792_v56 = vsel %vm278_vm1, %v786_v54, %v790_v55 }
 0x867   : > { %1850 = vmatmul.mubr.msk.f32.vlgmr.msra.gmra.mrb[6].mxu1 %vm382_vm2, %v792_v56 }
 0x868   : > { %2016 = vmatpush3.bf16.msra.mxu1 %v2246_v5  ;;  %1890 = vmatprep.mubr.msk.f32.mxu1 %vm2185_vm0, %v2186_v1 }
 0x869   : > { %2007 = vmatpush3.bf16.msra.mxu0 %v2280_v27  ;;  %2017 = vmatprep.subr.bf16.mxu1 %v2184_v0 }
 0x86a   : > { %2008 = vmatprep.subr.bf16.mxu0 %v2184_v0 }
 0x86c   : > { %2019 = vmatpush3.bf16.msra.mxu1 %v2249_v7 }
 0x86d   : > { %2010 = vmatpush3.bf16.msra.mxu0 %v2284_v30  ;;  %2020 = vmatprep.subr.bf16.mxu1 %v2184_v0 }
 0x86e   : > { %2011 = vmatprep.subr.bf16.mxu0 %v2184_v0 }
 0x871   : > { %2013 = vmatpush3.bf16.msra.mxu0 %v2289_v34 }
 0x872   : > { %2032 = vmatprep.subr.bf16.mxu0 %v2184_v0 }
 0x937   : > { %v970_v58 = vpop.f32.mrb[4].mxu0 }
 0x938   : > { %v974_v59 = vadd.f32 %v1659_v57, %v970_v58  ;;  %v1862_v60 = vpop.f32.mrb[5].mxu0 }
 0x93a   : > { %2105 = vtanh.f32 %v974_v59  ;;  %v862_v61 = vpop.f32.mrb[6].mxu1  ;;  %v1661_v4 = vmul.f32 -1.442695, %v974_v59 }
 0x93b   : > { %v863_v62 = vadd.f32 %v2319_v40, %v862_v61  ;;  %v1851_v63 = vpop.f32.mrb[7].mxu1 }
 0x93d   : > { %2107 = vtanh.f32 %v863_v62  ;;  %v1658_v6 = vmul.f32 -1.442695, %v863_v62 }
 0x93e   : > { %2109 = vpow2.f32 %v1661_v4 }
 0x93f   : > { %2111 = vpow2.f32 %v1658_v6 }
 0x944   : > { %v2106_v2 = vpop.eup %2105 }
 0x945   : > { %984 = vrot.lane.b32.xlu1 %v2106_v2, %s2187_s8 }
 0x947   : > { %v2108_v3 = vpop.eup %2107 }
 0x948   : > { %875 = vrot.lane.b32.xlu0 %v2108_v3, %s2187_s8  ;;  %v2110_v8 = vpop.eup %2109 }
 0x949   : > { %v978_v9 = vadd.f32 1.0, %v2110_v8  ;;  %v2112_v10 = vpop.eup %2111 }
 0x94a   : > { %v869_v11 = vadd.f32 1.0, %v2112_v10 }
 0x94b   : > { %2113 = vrcp.f32 %v978_v9 }
 0x94c   : > { %2115 = vrcp.f32 %v869_v11 }
 0x955   : > { %v2114_v12 = vpop.eup %2113 }
 0x956   : > { %v2116_v15 = vpop.eup %2115  ;;  %v982_v18 = vmul.f32 %v2114_v12, %v2363_v44 }
 0x957   : > { %v873_v21 = vmul.f32 %v2116_v15, %v2367_v47 }
 0x9b7   : > { %v985_v13 = vpop.permute.xlu1 %984 }
 0x9b8   : > { %v987_v14 = vmul.f32 %v2114_v12, %v985_v13 }
 0x9ba   : > { %989 = vrot.lane.b32.xlu1 %v987_v14, %s2188_s9  ;;  %v876_v16 = vpop.permute.xlu0 %875 }
 0x9bb   : > { %v878_v17 = vmul.f32 %v2116_v15, %v876_v16 }
 0x9bd   : > { %880 = vrot.lane.b32.xlu0 %v878_v17, %s2188_s9  ;;  %v1109_v17 = vstv %s1107_s21 }
 0xa2c   : > { %v990_v19 = vpop.permute.xlu1 %989 }
 0xa2d   : > { %v2403_v20 = vadd.f32 %v990_v19, %v982_v18 }
 0xa2f   : > { %2117 = vtanh.f32 %v2403_v20  ;;  %v881_v22 = vpop.permute.xlu0 %880 }
 0xa30   : > { %v2407_v23 = vadd.f32 %v881_v22, %v873_v21 }
 0xa32   : > { %2119 = vtanh.f32 %v2407_v23  ;;  %v897_v63 = vsub.f32 %v2407_v23, %v2367_v47 }
 0xa34   : > { %v898_v4 = vmul.f32 %v897_v63, %v894_v35 }
 0xa36   : > { %v2454_v6 = vadd.f32 %v898_v4, %v2367_v47 }
 0xa39   : > { %v2118_v24 = vpop.eup %2117 }
 0xa3a   : > { %995 = vrot.lane.b32.xlu1 %v2118_v24, %s2187_s8 }
 0xa3c   : > { %v2120_v26 = vpop.eup %2119 }
 0xa3d   : > { %886 = vrot.lane.b32.xlu0 %v2120_v26, %s2187_s8 }
 0xaac   : > { %v996_v28 = vpop.permute.xlu1 %995 }
 0xaad   : > { %v998_v29 = vmul.f32 %v2114_v12, %v996_v28 }
 0xaaf   : > { %1000 = vrot.lane.b32.xlu0 %v998_v29, %s2188_s9  ;;  %v887_v31 = vpop.permute.xlu0 %886 }
 0xab0   : > { %v889_v32 = vmul.f32 %v2116_v15, %v887_v31 }
 0xab2   : > { %v893_v33 = vsub.f32 %v889_v32, %v2373_v53 }
 0xab4   : > { %v895_v36 = vmul.f32 %v894_v35, %v893_v33 }
 0xab6   : > { %v2419_v37 = vadd.f32 %v895_v36, %v2373_v53 }
 0xab8   : > { %1004 = vrot.lane.b32.xlu1 %v2419_v37, %s2187_s8 }
 0xb21   : > { %v1001_v38 = vpop.permute.xlu0 %1000 }
 0xb22   : > { %1891 = vmatmul.mubr.msk.f32.vlgmr.msra.gmra.mrb[8].mxu1 %vm278_vm1, %v1001_v38 }
 0xb23   : > { %2022 = vmatpush3.bf16.msra.mxu1 %v2277_v25  ;;  %1909 = vmatprep.mubr.msk.f32.mxu1 %vm2185_vm0, %v2186_v1 }
 0xb24   : > { %2023 = vmatprep.subr.bf16.mxu1 %v2184_v0 }
 0xb27   : > { %2025 = vmatpush3.bf16.msra.mxu1 %v2280_v27 }
 0xb28   : > { %2026 = vmatprep.subr.bf16.mxu1 %v2184_v0 }
 0xb2a   : > { %v1005_v39 = vpop.permute.xlu1 %1004 }
 0xb2b   : > { %2028 = vmatpush3.bf16.msra.mxu1 %v2284_v30  ;;  %v1007_v41 = vsel %vm278_vm1, %v1001_v38, %v1005_v39 }
 0xb2c   : > { %2029 = vmatprep.subr.bf16.mxu1 %v2184_v0  ;;  %1880 = vmatmul.mubr.msk.f32.vlgmr.msra.gmra.mrb[6].mxu0 %vm382_vm2, %v1007_v41 }
 0xb2d   : > { %2034 = vmatpush3.bf16.msra.mxu0 %v2246_v5  ;;  %1920 = vmatprep.mubr.msk.f32.mxu0 %vm2185_vm0, %v2186_v1 }
 0xb2e   : > { %2035 = vmatprep.subr.bf16.mxu0 %v2184_v0 }
 0xb2f   : > { %2031 = vmatpush3.bf16.msra.mxu1 %v2289_v34 }
 0xb31   : > { %2037 = vmatpush3.bf16.msra.mxu0 %v2249_v7 }
 0xb32   : > { %2038 = vmatprep.subr.bf16.mxu0 %v2184_v0 }
 0xbf5   : > { %v1185_v43 = vpop.f32.mrb[8].mxu1 }
 0xbf6   : > { %v1189_v44 = vadd.f32 %v1664_v42, %v1185_v43  ;;  %v1892_v45 = vpop.f32.mrb[9].mxu1 }
 0xbf8   : > { %2121 = vtanh.f32 %v1189_v44  ;;  %v1666_v51 = vmul.f32 -1.442695, %v1189_v44 }
 0xbff   : > { %v1077_v46 = vpop.f32.mrb[6].mxu0 }
 0xc00   : > { %v1078_v48 = vadd.f32 %v2319_v40, %v1077_v46  ;;  %v1881_v5 = vpop.f32.mrb[7].mxu0 }
 0xc02   : > { %v2122_v49 = vpop.eup %2121  ;;  %2123 = vtanh.f32 %v1078_v48  ;;  %v1663_v7 = vmul.f32 -1.442695, %v1078_v48 }
 0xc03   : > { %1199 = vrot.lane.b32.xlu1 %v2122_v49, %s2187_s8  ;;  %2125 = vpow2.f32 %v1666_v51 }
 0xc04   : > { %2127 = vpow2.f32 %v1663_v7 }
 0xc0c   : > { %v2124_v50 = vpop.eup %2123 }
 0xc0d   : > { %1090 = vrot.lane.b32.xlu0 %v2124_v50, %s2187_s8  ;;  %v2126_v52 = vpop.eup %2125 }
 0xc0e   : > { %v1193_v53 = vadd.f32 1.0, %v2126_v52  ;;  %v2128_v54 = vpop.eup %2127 }
 0xc0f   : > { %v1084_v55 = vadd.f32 1.0, %v2128_v54 }
 0xc10   : > { %2129 = vrcp.f32 %v1193_v53 }
 0xc11   : > { %2131 = vrcp.f32 %v1084_v55 }
 0xc1a   : > { %v2130_v56 = vpop.eup %2129 }
 0xc1b   : > { %v2132_v59 = vpop.eup %2131  ;;  %v1197_v62 = vmul.f32 %v2130_v56, %v2403_v20 }
 0xc1c   : > { %v1088_v8 = vmul.f32 %v2132_v59, %v2454_v6 }
 0xc75   : > { %v1200_v57 = vpop.permute.xlu1 %1199 }
 0xc76   : > { %v1202_v58 = vmul.f32 %v2130_v56, %v1200_v57 }
 0xc78   : > { %1204 = vrot.lane.b32.xlu1 %v1202_v58, %s2188_s9  ;;  %v1324_v58 = vstv %s1322_s0 }
 0xc7f   : > { %v1091_v60 = vpop.permute.xlu0 %1090 }
 0xc80   : > { %v1093_v61 = vmul.f32 %v2132_v59, %v1091_v60 }
 0xc82   : > { %1095 = vrot.lane.b32.xlu0 %v1093_v61, %s2188_s9 }
 0xcea   : > { %v1205_v2 = vpop.permute.xlu1 %1204 }
 0xceb   : > { %v2450_v3 = vadd.f32 %v1205_v2, %v1197_v62 }
 0xced   : > { %2133 = vtanh.f32 %v2450_v3 }
 0xcf4   : > { %v1096_v9 = vpop.permute.xlu0 %1095 }
 0xcf5   : > { %v2457_v10 = vadd.f32 %v1096_v9, %v1088_v8 }
 0xcf7   : > { %v2134_v11 = vpop.eup %2133  ;;  %2135 = vtanh.f32 %v2457_v10  ;;  %v1112_v46 = vsub.f32 %v2457_v10, %v2454_v6 }
 0xcf8   : > { %1210 = vrot.lane.b32.xlu1 %v2134_v11, %s2187_s8 }
 0xcf9   : > { %v1113_v48 = vmul.f32 %v1112_v46, %v1109_v17 }
 0xcfb   : > { %v1114_v49 = vadd.f32 %v1113_v48, %v2454_v6 }
 0xd01   : > { %v2136_v12 = vpop.eup %2135 }
 0xd02   : > { %1101 = vrot.lane.b32.xlu0 %v2136_v12, %s2187_s8 }
 0xd6a   : > { %v1211_v13 = vpop.permute.xlu1 %1210 }
 0xd6b   : > { %v1213_v14 = vmul.f32 %v2130_v56, %v1211_v13 }
 0xd6d   : > { %1215 = vrot.lane.b32.xlu0 %v1213_v14, %s2188_s9 }
 0xd74   : > { %v1102_v47 = vpop.permute.xlu0 %1101 }
 0xd75   : > { %v1104_v15 = vmul.f32 %v2132_v59, %v1102_v47 }
 0xd77   : > { %v1108_v16 = vsub.f32 %v1104_v15, %v2419_v37 }
 0xd79   : > { %v1110_v18 = vmul.f32 %v1109_v17, %v1108_v16 }
 0xd7b   : > { %v2466_v19 = vadd.f32 %v1110_v18, %v2419_v37 }
 0xd7d   : > { %1219 = vrot.lane.b32.xlu1 %v2466_v19, %s2187_s8 }
 0xddf   : > { %v1216_v20 = vpop.permute.xlu0 %1215 }
 0xde0   : > { %1921 = vmatmul.mubr.msk.f32.vlgmr.msra.gmra.mrb[8].mxu0 %vm278_vm1, %v1216_v20 }
 0xde1   : > { %2040 = vmatpush3.bf16.msra.mxu0 %v2277_v25  ;;  %1939 = vmatprep.mubr.msk.f32.mxu0 %vm2185_vm0, %v2186_v1  ;;  %v1669_v25 = vld [vmem:[%s2265_s7 + $0xa] sm:$0x3] }
 0xde2   : > { %2041 = vmatprep.subr.bf16.mxu0 %v2184_v0 }
 0xde5   : > { %2043 = vmatpush3.bf16.msra.mxu0 %v2280_v27 }
 0xde6   : > { %2044 = vmatprep.subr.bf16.mxu0 %v2184_v0 }
 0xde9   : > { %2046 = vmatpush3.bf16.msra.mxu0 %v2284_v30 }
 0xdea   : > { %2047 = vmatprep.subr.bf16.mxu0 %v2184_v0 }
 0xded   : > { %2049 = vmatpush3.bf16.msra.mxu0 %v2289_v34 }
 0xdef   : > { %v1220_v21 = vpop.permute.xlu1 %1219 }
 0xdf0   : > { %v1222_v22 = vsel %vm278_vm1, %v1216_v20, %v1220_v21  ;;  %v1539_v21 = vstv %s1537_s26 }
 0xdf1   : > { %1910 = vmatmul.mubr.msk.f32.vlgmr.msra.gmra.mrb[10].mxu1 %vm382_vm2, %v1222_v22 }
 0xeb3   : > { %v1400_v23 = vpop.f32.mrb[8].mxu0 }
 0xeb4   : > { %v1404_v1 = vadd.f32 %v1669_v25, %v1400_v23  ;;  %v1922_v24 = vpop.f32.mrb[9].mxu0 }
 0xeb6   : > { %2137 = vtanh.f32 %v1404_v1  ;;  %v1671_v34 = vmul.f32 -1.442695, %v1404_v1 }
 0xec0   : > { %v2138_v26 = vpop.eup %2137 }
 0xec1   : > { %1414 = vrot.lane.b32.xlu1 %v2138_v26, %s2187_s8 }
 0xec4   : > { %v1292_v27 = vpop.f32.mrb[10].mxu1 }
 0xec5   : > { %v1293_v30 = vadd.f32 %v2319_v40, %v1292_v27  ;;  %v1911_v28 = vpop.f32.mrb[11].mxu1 }
 0xec7   : > { %2139 = vtanh.f32 %v1293_v30  ;;  %v1668_v32 = vmul.f32 -1.442695, %v1293_v30 }
 0xec8   : > { %2141 = vpow2.f32 %v1671_v34 }
 0xed1   : > { %v2140_v0 = vpop.eup %2139 }
 0xed2   : > { %1305 = vrot.lane.b32.xlu0 %v2140_v0, %s2187_s8  ;;  %v2142_v29 = vpop.eup %2141 }
 0xed3   : > { %v1408_v31 = vadd.f32 1.0, %v2142_v29 }
 0xed5   : > { %2143 = vrcp.f32 %v1408_v31 }
 0xed6   : > { %2145 = vpow2.f32 %v1668_v32 }
 0xedf   : > { %v2144_v33 = vpop.eup %2143 }
 0xee0   : > { %v2146_v36 = vpop.eup %2145  ;;  %v1412_v43 = vmul.f32 %v2144_v33, %v2450_v3 }
 0xee1   : > { %v1299_v38 = vadd.f32 1.0, %v2146_v36 }
 0xee3   : > { %2147 = vrcp.f32 %v1299_v38 }
 0xeed   : > { %v2148_v39 = vpop.eup %2147 }
 0xeee   : > { %v1303_v50 = vmul.f32 %v2148_v39, %v1114_v49 }
 0xf33   : > { %v1415_v35 = vpop.permute.xlu1 %1414 }
 0xf34   : > { %v1417_v37 = vmul.f32 %v2144_v33, %v1415_v35 }
 0xf36   : > { %1419 = vrot.lane.b32.xlu1 %v1417_v37, %s2188_s9 }
 0xf44   : > { %v1306_v41 = vpop.permute.xlu0 %1305 }
 0xf45   : > { %v1308_v42 = vmul.f32 %v2148_v39, %v1306_v41 }
 0xf47   : > { %1310 = vrot.lane.b32.xlu0 %v1308_v42, %s2188_s9 }
 0xfa8   : > { %v1420_v44 = vpop.permute.xlu1 %1419 }
 0xfa9   : > { %v1422_v45 = vadd.f32 %v1420_v44, %v1412_v43 }
 0xfab   : > { %2149 = vtanh.f32 %v1422_v45 }
 0xfb5   : > { %v2150_v5 = vpop.eup %2149 }
 0xfb6   : > { %1425 = vrot.lane.b32.xlu1 %v2150_v5, %s2187_s8 }
 0xfb9   : > { %v1311_v51 = vpop.permute.xlu0 %1310 }
 0xfba   : > { %v1313_v7 = vadd.f32 %v1311_v51, %v1303_v50 }
 0xfbc   : > { %2151 = vtanh.f32 %v1313_v7  ;;  %v1327_v14 = vsub.f32 %v1313_v7, %v1114_v49 }
 0xfbe   : > { %v1328_v47 = vmul.f32 %v1327_v14, %v1324_v58 }
 0xfc0   : > { %v1329_v15 = vadd.f32 %v1328_v47, %v1114_v49 }
 0xfc6   : > { %v2152_v52 = vpop.eup %2151 }
 0xfc7   : > { %1316 = vrot.lane.b32.xlu0 %v2152_v52, %s2187_s8 }
0x1028   : > { %v1426_v53 = vpop.permute.xlu1 %1425 }
0x1029   : > { %v1428_v54 = vmul.f32 %v2144_v33, %v1426_v53 }
0x102b   : > { %1430 = vrot.lane.b32.xlu0 %v1428_v54, %s2188_s9 }
0x1039   : > { %v1317_v55 = vpop.permute.xlu0 %1316 }
0x103a   : > { %v1319_v56 = vmul.f32 %v2148_v39, %v1317_v55 }
0x103c   : > { %v1323_v57 = vsub.f32 %v1319_v56, %v2466_v19 }
0x103e   : > { %v1325_v59 = vmul.f32 %v1324_v58, %v1323_v57 }
0x1040   : > { %v1326_v60 = vadd.f32 %v1325_v59, %v2466_v19 }
0x1042   : > { %1434 = vrot.lane.b32.xlu1 %v1326_v60, %s2187_s8 }
0x109d   : > { %v1431_v61 = vpop.permute.xlu0 %1430 }
0x10b4   : > { %v1435_v62 = vpop.permute.xlu1 %1434 }
0x10b5   : > { %v1437_v63 = vsel %vm278_vm1, %v1431_v61, %v1435_v62 }
0x10b6   : > { %1940 = vmatmul.mubr.msk.f32.vlgmr.msra.gmra.mrb[10].mxu0 %vm382_vm2, %v1437_v63 }
0x1189   : > { %v1507_v2 = vpop.f32.mrb[10].mxu0 }
0x118a   : > { %v1508_v3 = vadd.f32 %v2319_v40, %v1507_v2  ;;  %v1941_v4 = vpop.f32.mrb[11].mxu0 }
0x118c   : > { %2153 = vtanh.f32 %v1508_v3  ;;  %v1673_v8 = vmul.f32 -1.442695, %v1508_v3 }
0x118e   : > { %2155 = vpow2.f32 %v1673_v8 }
0x1196   : > { %v2154_v6 = vpop.eup %2153 }
0x1197   : > { %1520 = vrot.lane.b32.xlu0 %v2154_v6, %s2187_s8 }
0x1198   : > { %v2156_v9 = vpop.eup %2155 }
0x1199   : > { %v1514_v10 = vadd.f32 1.0, %v2156_v9 }
0x119b   : > { %2157 = vrcp.f32 %v1514_v10 }
0x11a5   : > { %v2158_v11 = vpop.eup %2157 }
0x11a6   : > { %v1518_v40 = vmul.f32 %v2158_v11, %v1329_v15 }
0x1209   : > { %v1521_v12 = vpop.permute.xlu0 %1520 }
0x120a   : > { %v1523_v13 = vmul.f32 %v2158_v11, %v1521_v12 }
0x120c   : > { %1525 = vrot.lane.b32.xlu1 %v1523_v13, %s2188_s9 }
0x127e   : > { %v1526_v16 = vpop.permute.xlu1 %1525 }
0x127f   : > { %v1528_v17 = vadd.f32 %v1526_v16, %v1518_v40 }
0x1281   : > { %2159 = vtanh.f32 %v1528_v17 }
0x128b   : > { %v2160_v18 = vpop.eup %2159 }
0x128c   : > { %1531 = vrot.lane.b32.xlu0 %v2160_v18, %s2187_s8 }
0x12fe   : > { %v1532_v19 = vpop.permute.xlu0 %1531 }
0x12ff   : > { %v1534_v20 = vmul.f32 %v2158_v11, %v1532_v19 }
0x1301   : > { %v1538_v22 = vsub.f32 %v1534_v20, %v1326_v60 }
0x1303   : > { %v1540_v25 = vmul.f32 %v1539_v21, %v1538_v22 }
0x1305   : > { %v1541_v23 = vadd.f32 %v1540_v25, %v1326_v60 }
0x1307   : > { %1543 = vrot.lane.b32.xlu1 %v1541_v23, %s2188_s9 }
0x1379   : > { %v1544_v1 = vpop.permute.xlu1 %1543 }
0x137a   : > { %1547 = vst.msk [vmem:[%s256_s30] sm:$0x3] %vm1546_vm3, %v1544_v1 }
0x137b PF: > { %s21_s23 = sadd.s32 1, %s2181_s23  }
0x137c   : > { %p18_p13 = scmp.ge.s32.totalorder %s21_s23, 5  }
0x137e   :  { %20 = sbr.rel (!%p18_p13) target bundleno = 16 (0x10), region = 80 }

// kernel: pyramid_lstm_forward.3
= control target key start
LH: loop header
LB: loop body
LE: loop exit
PB: predicated region body
PF: predicated region fallthrough
CT: control target
= control target key end

     0   :  { %v5353_v3 = vmov 0.0|0.0   ;;  %vm5354_vm0 = vmmov 0   ;;  %v5355_v6 = vmov 0.0   ;;  %s6155_s0 = inlined_call_operand.vmem [shape: f32[6,32], index: 0, kind: input, shape index: {}]   ;;  %s6156_s1 = inlined_call_operand.vmem [shape: f32[4,32,8], index: 1, kind: input, shape index: {}]   ;;  %s6157_s2 = inlined_call_operand.vmem [shape: f32[4,32,8], index: 2, kind: input, shape index: {}]   ;;  %s6158_s3 = inlined_call_operand.vmem [shape: f32[4,32,8], index: 3, kind: input, shape index: {}]   ;;  %s6159_s4 = inlined_call_operand.vmem [shape: f32[4,1,8], index: 4, kind: input, shape index: {}]   ;;  %s6160_s5 = inlined_call_operand.vmem [shape: f32[4,1,8], index: 5, kind: input, shape index: {}]   ;;  %s6161_s6 = inlined_call_operand.vmem [shape: f32[4,1,8], index: 6, kind: input, shape index: {}]   ;;  %s6162_s7 = inlined_call_operand.vmem [shape: f32[4,8,32], index: 7, kind: input, shape index: {}]   ;;  %s6163_s8 = inlined_call_operand.vmem [shape: f32[1,32], index: 8, kind: input, shape index: {}]   ;;  %s6164_s9 = inlined_call_operand.vmem [shape: f32[3,32,128], index: 9, kind: input, shape index: {}]   ;;  %s6165_s10 = inlined_call_operand.vmem [shape: f32[1,128], index: 10, kind: input, shape index: {}]   ;;  %s6166_s11 = inlined_call_operand.vmem [shape: f32[128,4], index: 11, kind: input, shape index: {}]   ;;  %s6167_s12 = inlined_call_operand.vmem [shape: f32[1,4], index: 12, kind: input, shape index: {}]   ;;  %s6168_s13 = inlined_call_operand.hbm [shape: f32[2,4], index: 13, kind: output, shape index: {}]  }
   0x1   :  { %v46_v0 = vld [vmem:[%s6156_s1] sm:$0xff]  ;;  %v47_v1 = vld [vmem:[%s6156_s1 + $0x8] sm:$0xff]  ;;  %v48_v2 = vld [vmem:[%s6156_s1 + $0x10] sm:$0xff]  ;;  %5177 = vmatprep.subr.bf16.mxu0 %v5353_v3  ;;  %4885 = vmatprep.mubr.msk.f32.mxu0 %vm5354_vm0, %v5355_v6 }
   0x2   :  { %v5178_v4 = vpack.c.bf16 %v47_v1, %v46_v0  ;;  %v49_v5 = vld [vmem:[%s6156_s1 + $0x18] sm:$0xff]  ;;  %4915 = vmatprep.subr.mxu1 %v5355_v6  ;;  %4917 = vmatprep.mubr.msk.f32.mxu1 %vm5354_vm0, %v5355_v6 }
   0x3   :  { %v5181_v7 = vpack.c.bf16 %v49_v5, %v48_v2 }
   0x4   :  { %5179 = vmatpush3.bf16.msra.mxu0 %v5178_v4 }
   0x5   :  { %18 = vsyncpa [#allocation3], 0  ;;  %5180 = vmatprep.subr.bf16.mxu0 %v5353_v3  ;;  %v131_v8 = vld [vmem:[%s6157_s2] sm:$0xff]  ;;  %v132_v9 = vld [vmem:[%s6157_s2 + $0x8] sm:$0xff]  ;;  %vm57_vm1 = vcmask 261120   ;;  %v298_v23 = vlaneseq  ;;  %vm498_vm2 = vcmask 64512  }
   0x6   :  { %v5456_v10 = vld [vmem:[%s6155_s0] sm:$0x3f]  ;;  %v5184_v11 = vpack.c.bf16 %v132_v9, %v131_v8  ;;  %v133_v12 = vld [vmem:[%s6157_s2 + $0x10] sm:$0xff]  ;;  %v134_v13 = vld [vmem:[%s6157_s2 + $0x18] sm:$0xff]  ;;  %v5356_v21 = vmov 1966171168  }
   0x7   :  { %v5187_v14 = vpack.c.bf16 %v134_v13, %v133_v12  ;;  %v212_v15 = vld [vmem:[%s6158_s3] sm:$0xff]  ;;  %v213_v16 = vld [vmem:[%s6158_s3 + $0x8] sm:$0xff]  ;;  %v214_v18 = vld [vmem:[%s6158_s3 + $0x10] sm:$0xff]  ;;  %v296_v22 = vunpack.c.l.s4 %v5356_v21  ;;  %v299_v25 = vshrl.u32 %v298_v23, 7  ;;  %vm746_vm3 = vcmask 1042432  }
   0x8   :  { %5182 = vmatpush3.bf16.msra.mxu0 %v5181_v7  ;;  %v5190_v17 = vpack.c.bf16 %v213_v16, %v212_v15  ;;  %v215_v19 = vld [vmem:[%s6158_s3 + $0x18] sm:$0xff]  ;;  %v4623_v26 = vld [vmem:[%s6159_s4] ss:$0 sm:$0xff]  ;;  %vm696_vm4 = vcmask 18432   ;;  %vm742_vm5 = vcmask 23552   ;;  %vm4607_vm6 = vcmask 25600  }
   0x9   :  { %5183 = vmatprep.subr.bf16.mxu0 %v5353_v3  ;;  %v5193_v20 = vpack.c.bf16 %v215_v19, %v214_v18  ;;  %v297_v24 = vunpack.c.0.s8 %v296_v22  ;;  %v4625_v37 = vld [vmem:[%s6160_s5] ss:$0 sm:$0xff] }
   0xa   :  { %v4627_v22 = vld [vmem:[%s6161_s6] ss:$0 sm:$0xff] }
   0xb   :  { %4886 = vmatmul.mubr.msk.f32.vlgmr.msra.gmra.mrb[0].mxu0 %vm57_vm1, %v5456_v10  ;;  %v5496_v27 = vsub.s32 %v297_v24, %v299_v25 }
   0xc   :  { %5185 = vmatpush3.bf16.msra.mxu0 %v5184_v11  ;;  %4896 = vmatprep.mubr.msk.f32.mxu0 %vm5354_vm0, %v5355_v6 }
   0xd   :  { %5186 = vmatprep.subr.bf16.mxu0 %v5353_v3 }
  0x10   :  { %5188 = vmatpush3.bf16.msra.mxu0 %v5187_v14 }
  0x11   :  { %5189 = vmatprep.subr.bf16.mxu0 %v5353_v3 }
  0x13   :  { %4897 = vmatmul.mubr.msk.f32.vlgmr.msra.gmra.mrb[2].mxu0 %vm57_vm1, %v5456_v10 }
  0x14   :  { %4907 = vmatprep.mubr.msk.f32.mxu0 %vm5354_vm0, %v5355_v6  ;;  %5191 = vmatpush3.bf16.msra.mxu0 %v5190_v17 }
  0x15   :  { %5192 = vmatprep.subr.bf16.mxu0 %v5353_v3 }
  0x18   :  { %5194 = vmatpush3.bf16.msra.mxu0 %v5193_v20 }
  0x19   :  { %4910 = vmatprep.subr.mxu0 %v5355_v6 }
  0x1b   :  { %4908 = vmatmul.mubr.msk.f32.vlgmr.msra.gmra.mrb[4].mxu0 %vm57_vm1, %v5456_v10 }
  0x1c   :  { %4912 = vmatprep.mubr.msk.f32.mxu0 %vm5354_vm0, %v5355_v6 }
  0xde   :  { %v127_v28 = vpop.f32.mrb[0].mxu0 }
  0xdf   :  { %v128_v29 = vadd.f32 %v4623_v26, %v127_v28  ;;  %v4887_v30 = vpop.f32.mrb[1].mxu0 }
  0xe1   :  { %v294_v31 = vcombine.high %v128_v29, %v128_v29  ;;  %v301_v32 = vrot.slane %v128_v29, %v5496_v27 }
  0xe3   :  { %v308_v33 = vrot.slane %v294_v31, %v5496_v27  ;;  %v309_v34 = vcombine.high %v301_v32, %v301_v32  ;;  %v317_v35 = vrot.slane %v301_v32, %v5496_v27 }
  0xe5   :  { %v331_v36 = vrot.slane %v309_v34, %v5496_v27  ;;  %v310_v39 = vcombine.high %v308_v33, %v308_v33  ;;  %v324_v40 = vrot.slane %v308_v33, %v5496_v27  ;;  %v339_v44 = vcombine.high %v317_v35, %v317_v35 }
  0xe6   :  { %v208_v38 = vpop.f32.mrb[2].mxu0  ;;  %v347_v45 = vmul.f32 0.35355338, %v317_v35 }
  0xe7   :  { %v340_v41 = vcombine.high %v331_v36, %v331_v36  ;;  %v4898_v42 = vpop.f32.mrb[3].mxu0  ;;  %v209_v43 = vadd.f32 %v4625_v37, %v208_v38  ;;  %v348_v46 = vmul.f32 0.35355338, %v331_v36  ;;  %v338_v49 = vrot.slane %v310_v39, %v5496_v27 }
  0xe8   :  { %v351_v51 = vmul.f32 0.35355338, %v324_v40  ;;  %v349_v55 = vmul.f32 0.35355338, %v339_v44 }
  0xe9   :  { %v354_v47 = vcombine.high %v209_v43, %v209_v43  ;;  %v361_v48 = vrot.slane %v209_v43, %v5496_v27  ;;  %v350_v50 = vmul.f32 0.35355338, %v340_v41  ;;  %v452_v56 = vcombine.low %v347_v45, %v348_v46 }
  0xea   :  { %v352_v60 = vmul.f32 0.35355338, %v338_v49  ;;  %v466_v4 = vrot.slane %v349_v55, %v5496_v27 }
  0xeb   :  { %v368_v52 = vrot.slane %v354_v47, %v5496_v27  ;;  %v369_v53 = vcombine.high %v361_v48, %v361_v48  ;;  %v377_v54 = vrot.slane %v361_v48, %v5496_v27  ;;  %v576_v61 = vcombine.low %v350_v50, %v351_v51 }
  0xec   :  { %v459_v2 = vrot.slane %v452_v56, %v5496_v27  ;;  %v590_v11 = vrot.slane %v352_v60, %v5496_v27 }
  0xed   :  { %v370_v57 = vcombine.high %v368_v52, %v368_v52  ;;  %v391_v58 = vrot.slane %v369_v53, %v5496_v27  ;;  %v399_v59 = vcombine.high %v377_v54, %v377_v54  ;;  %v384_v62 = vrot.slane %v368_v52, %v5496_v27 }
  0xee   :  { %v583_v9 = vrot.slane %v576_v61, %v5496_v27  ;;  %v467_v15 = vcombine.low %v459_v2, %v466_v4  ;;  %v289_v23 = vpop.f32.mrb[4].mxu0  ;;  %v4644_v2 = vld [vmem:[%s6157_s2 + $0x20] sm:$0xff]  ;;  %v4645_v4 = vld [vmem:[%s6157_s2 + $0x28] sm:$0xff] }
  0xef   :  { %v398_v63 = vrot.slane %v370_v57, %v5496_v27  ;;  %v400_v0 = vcombine.high %v391_v58, %v391_v58  ;;  %v475_v1 = vcombine.low %v377_v54, %v391_v58  ;;  %v489_v7 = vrot.slane %v399_v59, %v5496_v27  ;;  %v4909_v25 = vpop.f32.mrb[5].mxu0 }
  0xf0   :  { %v591_v18 = vcombine.low %v583_v9, %v590_v11  ;;  %v474_v20 = vrot.slane %v467_v15, %v5496_v27  ;;  %v290_v24 = vadd.f32 %v4627_v22, %v289_v23  ;;  %v4638_v11 = vld [vmem:[%s6156_s1 + $0x28] sm:$0xff] }
  0xf1   :  { %v482_v5 = vrot.slane %v475_v1, %v5496_v27  ;;  %v599_v8 = vcombine.low %v400_v0, %v384_v62  ;;  %v613_v14 = vrot.slane %v398_v63, %v5496_v27 }
  0xf2   :  { %v598_v21 = vrot.slane %v591_v18, %v5496_v27  ;;  %v402_v26 = vcombine.high %v290_v24, %v290_v24  ;;  %v409_v28 = vrot.slane %v290_v24, %v5496_v27  ;;  %v4639_v18 = vld [vmem:[%s6156_s1 + $0x30] sm:$0xff] }
  0xf3   :  { %v490_v12 = vcombine.low %v482_v5, %v489_v7  ;;  %v606_v13 = vrot.slane %v599_v8, %v5496_v27  ;;  %v5202_v7 = vpack.c.bf16 %v4645_v4, %v4644_v2  ;;  %v4637_v8 = vld [vmem:[%s6156_s1 + $0x20] sm:$0xff] }
  0xf4   :  { %v416_v29 = vrot.slane %v402_v26, %v5496_v27  ;;  %v417_v30 = vcombine.high %v409_v28, %v409_v28  ;;  %v425_v31 = vrot.slane %v409_v28, %v5496_v27  ;;  %v5196_v15 = vpack.c.bf16 %v4638_v11, %v4637_v8 }
  0xf5   :  { %v497_v16 = vrot.slane %v490_v12, %v5496_v27  ;;  %v614_v17 = vcombine.low %v606_v13, %v613_v14  ;;  %v4646_v12 = vld [vmem:[%s6157_s2 + $0x30] sm:$0xff]  ;;  %v4647_v13 = vld [vmem:[%s6157_s2 + $0x38] sm:$0xff] }
  0xf6   :  { %v418_v32 = vcombine.high %v416_v29, %v416_v29  ;;  %v432_v33 = vrot.slane %v416_v29, %v5496_v27  ;;  %v439_v34 = vrot.slane %v417_v30, %v5496_v27  ;;  %v447_v35 = vcombine.high %v425_v31, %v425_v31 }
  0xf7   :  { %4911 = vmatpush3.xpose.msk.msra.mxu0 %vm498_vm2, %v497_v16  ;;  %v621_v19 = vrot.slane %v614_v17, %v5496_v27  ;;  %v5205_v16 = vpack.c.bf16 %v4647_v13, %v4646_v12 }
  0xf8   :  { %4920 = vmatprep.subr.mxu0 %v5355_v6  ;;  %v446_v36 = vrot.slane %v418_v32, %v5496_v27  ;;  %v448_v37 = vcombine.high %v439_v34, %v439_v34  ;;  %v719_v38 = vcombine.low %v425_v31, %v439_v34  ;;  %v733_v39 = vrot.slane %v447_v35, %v5496_v27  ;;  %v4649_v32 = vld [vmem:[%s6160_s5 + $0x1] ss:$0 sm:$0xff] }
  0xf9   :  { %4916 = vmatpush3.xpose.msk.msra.mxu1 %vm498_vm2, %v621_v19  ;;  %v4640_v19 = vld [vmem:[%s6156_s1 + $0x38] sm:$0xff] }
  0xfa   :  { %4913 = vmatmul.mubr.msk.f32.vlgmr.msra.gmra.mrb[6].mxu0 %vm498_vm2, %v474_v20  ;;  %4925 = vmatprep.subr.mxu1 %v5355_v6  ;;  %v726_v40 = vrot.slane %v719_v38, %v5496_v27  ;;  %v819_v41 = vcombine.low %v448_v37, %v432_v33  ;;  %v833_v42 = vrot.slane %v446_v36, %v5496_v27 }
  0xfb   :  { %4922 = vmatprep.mubr.msk.f32.mxu0 %vm5354_vm0, %v5355_v6  ;;  %v5199_v20 = vpack.c.bf16 %v4640_v19, %v4639_v18 }
  0xfc   :  { %4918 = vmatmul.mubr.msk.f32.vlgmr.msra.gmra.mrb[0].mxu1 %vm498_vm2, %v598_v21  ;;  %v734_v43 = vcombine.low %v726_v40, %v733_v39  ;;  %v826_v44 = vrot.slane %v819_v41, %v5496_v27  ;;  %v4642_v41 = vld [vmem:[%s6159_s4 + $0x1] ss:$0 sm:$0xff] }
  0xfd   :  { %4927 = vmatprep.mubr.msk.f32.mxu1 %vm5354_vm0, %v5355_v6 }
  0xfe   :  { %v834_v45 = vcombine.low %v826_v44, %v833_v42  ;;  %v741_v46 = vrot.slane %v734_v43, %v5496_v27 }
 0x100   :  { %v841_v47 = vrot.slane %v834_v45, %v5496_v27  ;;  %4921 = vmatpush3.msk.msra.mxu0 %vm746_vm3, %v741_v46 }
 0x101   :  { %5195 = vmatprep.subr.bf16.mxu0 %v5353_v3 }
 0x102   :  { %4926 = vmatpush3.msk.msra.mxu1 %vm746_vm3, %v841_v47 }
 0x103   :  { %5201 = vmatprep.subr.bf16.mxu1 %v5353_v3 }
 0x1cd   :  { %v569_v48 = vpop.f32.mrb[6].mxu0 }
 0x1ce   :  { %v4914_v49 = vpop.f32.mrb[7].mxu0  ;;  %v697_v53 = vsel %vm696_vm4, %v569_v48, -inf }
 0x1cf   :  { %v692_v50 = vpop.f32.mrb[0].mxu1 }
 0x1d0   :  { %v4919_v51 = vpop.f32.mrb[1].mxu1  ;;  %v700_v52 = vsel %vm696_vm4, %v692_v50, -inf }
 0x1d1   :  { %701 = vmax.xlane.f32.xlu0 %v700_v52 }
 0x1d5   :  { %698 = vmax.xlane.f32.xlu0 %v697_v53 }
 0x25e   :  { %v702_v54 = vpop.xlane.xlu0 %701 }
 0x25f   :  { %v704_v55 = vsub.f32 %v692_v50, %v702_v54 }
 0x261   :  { %v707_v56 = vmul.f32 1.442695, %v704_v55 }
 0x262   :  { %v699_v57 = vpop.xlane.xlu0 %698 }
 0x263   :  { %5296 = vpow2.f32 %v707_v56  ;;  %v703_v58 = vsub.f32 %v569_v48, %v699_v57 }
 0x265   :  { %v705_v59 = vmul.f32 1.442695, %v703_v58 }
 0x267   :  { %5298 = vpow2.f32 %v705_v59 }
 0x26d   :  { %v5297_v60 = vpop.eup %5296 }
 0x26e   :  { %v712_v61 = vsel %vm696_vm4, %v5297_v60, 0.0 }
 0x26f   :  { %713 = vadd.xlane.f32.xlu1 %v712_v61 }
 0x271   :  { %v5299_v62 = vpop.eup %5298 }
 0x272   :  { %v709_v63 = vsel %vm696_vm4, %v5299_v62, 0.0 }
 0x273   :  { %710 = vadd.xlane.f32.xlu1 %v709_v63 }
 0x2fc   :  { %v714_v0 = vpop.xlane.xlu1 %713 }
 0x2fd   :  { %5300 = vrcp.f32 %v714_v0 }
 0x300   :  { %v711_v1 = vpop.xlane.xlu1 %710 }
 0x301   :  { %5302 = vrcp.f32 %v711_v1 }
 0x307   :  { %v5301_v5 = vpop.eup %5300 }
 0x308   :  { %v718_v9 = vmul.f32 %v5301_v5, %v5297_v60 }
 0x30a   :  { %4928 = vmatmul.mubr.msk.f32.vlgmr.msra.gmra.mrb[2].mxu1 %vm742_vm5, %v718_v9 }
 0x30b   :  { %v5303_v14 = vpop.eup %5302  ;;  %5203 = vmatpush3.bf16.msra.mxu1 %v5202_v7  ;;  %4949 = vmatprep.mubr.msk.f32.mxu1 %vm5354_vm0, %v5355_v6 }
 0x30c   :  { %v717_v17 = vmul.f32 %v5303_v14, %v5299_v62  ;;  %5204 = vmatprep.subr.bf16.mxu1 %v5353_v3 }
 0x30e   :  { %4923 = vmatmul.mubr.msk.f32.vlgmr.msra.gmra.mrb[8].mxu0 %vm742_vm5, %v717_v17 }
 0x30f   :  { %5197 = vmatpush3.bf16.msra.mxu0 %v5196_v15  ;;  %5206 = vmatpush3.bf16.msra.mxu1 %v5205_v16 }
 0x310   :  { %5198 = vmatprep.subr.bf16.mxu0 %v5353_v3  ;;  %4938 = vmatprep.mubr.msk.f32.mxu0 %vm5354_vm0, %v5355_v6 }
 0x311   :  { %4963 = vmatprep.subr.mxu1 %v5355_v6 }
 0x312   :  { %4950 = vmatmul.mubr.msk.f32.vlgmr.msra.gmra.mrb[4].mxu1 %vm57_vm1, %v5456_v10 }
 0x313   :  { %5200 = vmatpush3.bf16.msra.mxu0 %v5199_v20  ;;  %4965 = vmatprep.mubr.msk.f32.mxu1 %vm5354_vm0, %v5355_v6 }
 0x314   :  { %5207 = vmatprep.subr.bf16.mxu0 %v5353_v3 }
 0x316   :  { %4939 = vmatmul.mubr.msk.f32.vlgmr.msra.gmra.mrb[10].mxu0 %vm57_vm1, %v5456_v10 }
 0x317   :  { %4960 = vmatprep.mubr.msk.f32.mxu0 %vm5354_vm0, %v5355_v6 }
 0x3dd   :  { %v913_v21 = vpop.f32.mrb[2].mxu1 }
 0x3de   :  { %v948_v22 = vrot.slane %v913_v21, %v5496_v27  ;;  %v4929_v23 = vpop.f32.mrb[3].mxu1 }
 0x3e0   :  { %v949_v24 = vcombine.high %v948_v22, %v948_v22  ;;  %v956_v25 = vrot.slane %v948_v22, %v5496_v27 }
 0x3e1   :  { %v815_v26 = vpop.f32.mrb[8].mxu0 }
 0x3e2   :  { %v963_v28 = vrot.slane %v949_v24, %v5496_v27  ;;  %v964_v29 = vcombine.high %v956_v25, %v956_v25  ;;  %v925_v30 = vrot.slane %v815_v26, %v5496_v27  ;;  %v4924_v31 = vpop.f32.mrb[9].mxu0 }
 0x3e4   :  { %v926_v33 = vcombine.high %v925_v30, %v925_v30  ;;  %v933_v34 = vrot.slane %v925_v30, %v5496_v27  ;;  %v1999_v35 = vcombine.low %v963_v28, %v964_v29 }
 0x3e5   :  { %v1128_v36 = vpop.f32.mrb[4].mxu1 }
 0x3e6   :  { %v940_v37 = vrot.slane %v926_v33, %v5496_v27  ;;  %v941_v38 = vcombine.high %v933_v34, %v933_v34  ;;  %v1129_v39 = vadd.f32 %v4649_v32, %v1128_v36  ;;  %v4951_v40 = vpop.f32.mrb[5].mxu1  ;;  %v2020_v45 = vrot.slane %v1999_v35, %v5496_v27 }
 0x3e8   :  { %v1997_v42 = vcombine.low %v933_v34, %v940_v37  ;;  %v1998_v43 = vcombine.low %v941_v38, %v956_v25  ;;  %v1276_v44 = vcombine.high %v1129_v39, %v1129_v39  ;;  %v1283_v46 = vrot.slane %v1129_v39, %v5496_v27 }
 0x3e9   :  { %v1045_v47 = vpop.f32.mrb[10].mxu0  ;;  %v2035_v62 = vrot.slane %v2020_v45, %v5496_v27 }
 0x3ea   :  { %v2006_v48 = vrot.slane %v1997_v42, %v5496_v27  ;;  %v2013_v49 = vrot.slane %v1998_v43, %v5496_v27  ;;  %v1290_v50 = vrot.slane %v1276_v44, %v5496_v27  ;;  %v1046_v51 = vadd.f32 %v4642_v41, %v1045_v47  ;;  %v4940_v52 = vpop.f32.mrb[11].mxu0  ;;  %v4651_v42 = vld [vmem:[%s6158_s3 + $0x20] sm:$0xff]  ;;  %v4652_v43 = vld [vmem:[%s6158_s3 + $0x28] sm:$0xff]  ;;  %v4653_v44 = vld [vmem:[%s6158_s3 + $0x30] sm:$0xff] }
 0x3eb   :  { %v1291_v53 = vcombine.high %v1283_v46, %v1283_v46  ;;  %v1299_v54 = vrot.slane %v1283_v46, %v5496_v27  ;;  %v5208_v45 = vpack.c.bf16 %v4652_v43, %v4651_v42  ;;  %v4654_v46 = vld [vmem:[%s6158_s3 + $0x38] sm:$0xff] }
 0x3ec   :  { %v2021_v55 = vcombine.low %v2006_v48, %v2013_v49  ;;  %v1292_v56 = vcombine.high %v1290_v50, %v1290_v50  ;;  %v1216_v57 = vcombine.high %v1046_v51, %v1046_v51  ;;  %v1306_v58 = vrot.slane %v1290_v50, %v5496_v27 }
 0x3ed   :  { %v1313_v59 = vrot.slane %v1291_v53, %v5496_v27  ;;  %v1321_v60 = vcombine.high %v1299_v54, %v1299_v54  ;;  %v1223_v61 = vrot.slane %v1046_v51, %v5496_v27  ;;  %5209 = vmatpush3.bf16.msra.mxu0 %v5208_v45  ;;  %v5211_v47 = vpack.c.bf16 %v4654_v46, %v4653_v44 }
 0x3ee   :  { %v2028_v63 = vrot.slane %v2021_v55, %v5496_v27  ;;  %v1230_v0 = vrot.slane %v1216_v57, %v5496_v27  ;;  %v1320_v7 = vrot.slane %v1292_v56, %v5496_v27  ;;  %5210 = vmatprep.subr.bf16.mxu0 %v5353_v3 }
 0x3ef   :  { %v1322_v1 = vcombine.high %v1313_v59, %v1313_v59  ;;  %v1397_v2 = vcombine.low %v1299_v54, %v1313_v59  ;;  %v1411_v4 = vrot.slane %v1321_v60, %v5496_v27  ;;  %v1231_v5 = vcombine.high %v1223_v61, %v1223_v61 }
 0x3f0   :  { %v1232_v8 = vcombine.high %v1230_v0, %v1230_v0  ;;  %v1239_v9 = vrot.slane %v1223_v61, %v5496_v27  ;;  %v1246_v11 = vrot.slane %v1230_v0, %v5496_v27  ;;  %v5630_v15 = vcombine.low %v2028_v63, %v2035_v62  ;;  %v4656_v62 = vld [vmem:[%s6161_s6 + $0x1] ss:$0 sm:$0xff] }
 0x3f1   :  { %v1404_v12 = vrot.slane %v1397_v2, %v5496_v27  ;;  %v1520_v13 = vcombine.low %v1322_v1, %v1306_v58  ;;  %v1253_v14 = vrot.slane %v1231_v5, %v5496_v27  ;;  %v1534_v23 = vrot.slane %v1320_v7, %v5496_v27  ;;  %5212 = vmatpush3.bf16.msra.mxu0 %v5211_v47 }
 0x3f2   :  { %v1260_v16 = vrot.slane %v1232_v8, %v5496_v27  ;;  %v1261_v17 = vcombine.high %v1239_v9, %v1239_v9  ;;  %v1269_v20 = vmul.f32 0.35355338, %v1239_v9  ;;  %v1273_v25 = vmul.f32 0.35355338, %v1246_v11  ;;  %4973 = vmatprep.subr.mxu0 %v5355_v6 }
 0x3f3   :  { %v1412_v18 = vcombine.low %v1404_v12, %v1411_v4  ;;  %v1262_v19 = vcombine.high %v1253_v14, %v1253_v14  ;;  %v1270_v21 = vmul.f32 0.35355338, %v1253_v14  ;;  %v1527_v22 = vrot.slane %v1520_v13, %v5496_v27 }
 0x3f4   :  { %v1271_v24 = vmul.f32 0.35355338, %v1261_v17  ;;  %v1274_v28 = vmul.f32 0.35355338, %v1260_v16  ;;  %4961 = vmatmul.mubr.msk.f32.vlgmr.msra.gmra.mrb[12].mxu0 %vm57_vm1, %v5456_v10 }
 0x3f5   :  { %v1272_v26 = vmul.f32 0.35355338, %v1262_v19  ;;  %v1374_v29 = vcombine.low %v1269_v20, %v1270_v21  ;;  %v1419_v30 = vrot.slane %v1412_v18, %v5496_v27  ;;  %v1535_v34 = vcombine.low %v1527_v22, %v1534_v23  ;;  %4975 = vmatprep.mubr.msk.f32.mxu0 %vm5354_vm0, %v5355_v6 }
 0x3f6   :  { %v1388_v32 = vrot.slane %v1271_v24, %v5496_v27  ;;  %v1511_v37 = vrot.slane %v1274_v28, %v5496_v27 }
 0x3f7   :  { %v1381_v31 = vrot.slane %v1374_v29, %v5496_v27  ;;  %v1497_v33 = vcombine.low %v1272_v26, %v1273_v25  ;;  %4964 = vmatpush3.xpose.msk.msra.mxu1 %vm498_vm2, %v1419_v30  ;;  %v1542_v40 = vrot.slane %v1535_v34, %v5496_v27 }
 0x3f8   :  { %4968 = vmatprep.subr.mxu1 %v5355_v6 }
 0x3f9   :  { %v1389_v35 = vcombine.low %v1381_v31, %v1388_v32  ;;  %v1504_v36 = vrot.slane %v1497_v33, %v5496_v27 }
 0x3fb   :  { %v1512_v38 = vcombine.low %v1504_v36, %v1511_v37  ;;  %v1396_v39 = vrot.slane %v1389_v35, %v5496_v27  ;;  %v965_v36 = vld [vmem:[%s6162_s7] sm:$0xff] }
 0x3fc   :  { %v4676_v37 = vld [vmem:[%s6157_s2 + $0x40] sm:$0xff] }
 0x3fd   :  { %4966 = vmatmul.mubr.msk.f32.vlgmr.msra.gmra.mrb[6].mxu1 %vm498_vm2, %v1396_v39  ;;  %v1519_v41 = vrot.slane %v1512_v38, %v5496_v27  ;;  %v4677_v38 = vld [vmem:[%s6157_s2 + $0x48] sm:$0xff] }
 0x3fe   :  { %4969 = vmatpush3.xpose.msk.msra.mxu1 %vm498_vm2, %v1542_v40  ;;  %4970 = vmatprep.mubr.msk.f32.mxu1 %vm5354_vm0, %v5355_v6  ;;  %v4666_v39 = vld [vmem:[%s6162_s7 + $0x8] sm:$0xff]  ;;  %v5220_v40 = vpack.c.bf16 %v4677_v38, %v4676_v37 }
 0x3ff   :  { %4978 = vmatprep.subr.mxu1 %v5355_v6 }
 0x401   :  { %4971 = vmatmul.mubr.msk.f32.vlgmr.msra.gmra.mrb[8].mxu1 %vm498_vm2, %v1519_v41  ;;  %v4679_v41 = vld [vmem:[%s6157_s2 + $0x58] sm:$0xff] }
 0x402   :  { %4980 = vmatprep.mubr.msk.f32.mxu1 %vm5354_vm0, %v5355_v6 }
 0x4c7   :  { %v1211_v54 = vpop.f32.mrb[12].mxu0 }
 0x4c8   :  { %v4962_v55 = vpop.f32.mrb[13].mxu0  ;;  %v1212_v63 = vadd.f32 %v4656_v62, %v1211_v54 }
 0x4ca   :  { %v1331_v2 = vrot.slane %v1212_v63, %v5496_v27  ;;  %v1324_v7 = vcombine.high %v1212_v63, %v1212_v63 }
 0x4cc   :  { %v1339_v8 = vcombine.high %v1331_v2, %v1331_v2  ;;  %v1338_v9 = vrot.slane %v1324_v7, %v5496_v27  ;;  %v1347_v12 = vrot.slane %v1331_v2, %v5496_v27  ;;  %v4669_v2 = vld [vmem:[%s6156_s1 + $0x40] sm:$0xff] }
 0x4ce   :  { %v1361_v11 = vrot.slane %v1339_v8, %v5496_v27  ;;  %v1340_v13 = vcombine.high %v1338_v9, %v1338_v9  ;;  %v1354_v14 = vrot.slane %v1338_v9, %v5496_v27  ;;  %v1369_v17 = vcombine.high %v1347_v12, %v1347_v12 }
 0x4d0   :  { %v1490_v48 = vpop.f32.mrb[6].mxu1  ;;  %v1370_v16 = vcombine.high %v1361_v11, %v1361_v11  ;;  %v1639_v18 = vcombine.low %v1347_v12, %v1361_v11  ;;  %v1368_v19 = vrot.slane %v1340_v13, %v5496_v27  ;;  %v1653_v22 = vrot.slane %v1369_v17, %v5496_v27  ;;  %v4671_v11 = vld [vmem:[%s6156_s1 + $0x50] sm:$0xff]  ;;  %v4672_v12 = vld [vmem:[%s6156_s1 + $0x58] sm:$0xff] }
 0x4d1   :  { %v4967_v49 = vpop.f32.mrb[7].mxu1  ;;  %v1617_v50 = vsel %vm696_vm4, %v1490_v48, -inf  ;;  %v5217_v13 = vpack.c.bf16 %v4672_v12, %v4671_v11 }
 0x4d2   :  { %1618 = vmax.xlane.f32.xlu0 %v1617_v50  ;;  %v1737_v20 = vcombine.low %v1370_v16, %v1354_v14  ;;  %v1646_v21 = vrot.slane %v1639_v18, %v5496_v27  ;;  %v1751_v24 = vrot.slane %v1368_v19, %v5496_v27  ;;  %v4681_v14 = vld [vmem:[%s6160_s5 + $0x2] ss:$0 sm:$0xff] }
 0x4d4   :  { %v1613_v51 = vpop.f32.mrb[8].mxu1  ;;  %v1744_v23 = vrot.slane %v1737_v20, %v5496_v27  ;;  %v1654_v25 = vcombine.low %v1646_v21, %v1653_v22 }
 0x4d5   :  { %v4972_v52 = vpop.f32.mrb[9].mxu1  ;;  %v1620_v53 = vsel %vm696_vm4, %v1613_v51, -inf }
 0x4d6   :  { %1621 = vmax.xlane.f32.xlu1 %v1620_v53  ;;  %v1752_v26 = vcombine.low %v1744_v23, %v1751_v24  ;;  %v1661_v28 = vrot.slane %v1654_v25, %v5496_v27 }
 0x4d8   :  { %4974 = vmatpush3.msk.msra.mxu0 %vm746_vm3, %v1661_v28  ;;  %v1759_v29 = vrot.slane %v1752_v26, %v5496_v27 }
 0x4d9   :  { %4983 = vmatprep.subr.mxu0 %v5355_v6 }
 0x4da   :  { %4979 = vmatpush3.msk.msra.mxu1 %vm746_vm3, %v1759_v29 }
 0x4db   :  { %4988 = vmatprep.subr.mxu1 %v5355_v6 }
 0x55f   :  { %v1619_v56 = vpop.xlane.xlu0 %1618 }
 0x560   :  { %v1623_v57 = vsub.f32 %v1490_v48, %v1619_v56 }
 0x562   :  { %v1625_v58 = vmul.f32 1.442695, %v1623_v57 }
 0x563   :  { %v1622_v59 = vpop.xlane.xlu1 %1621 }
 0x564   :  { %5304 = vpow2.f32 %v1625_v58  ;;  %v1624_v60 = vsub.f32 %v1613_v51, %v1622_v59 }
 0x566   :  { %v1627_v61 = vmul.f32 1.442695, %v1624_v60 }
 0x568   :  { %5306 = vpow2.f32 %v1627_v61 }
 0x56e   :  { %v5305_v0 = vpop.eup %5304 }
 0x56f   :  { %v1629_v1 = vsel %vm696_vm4, %v5305_v0, 0.0 }
 0x570   :  { %1630 = vadd.xlane.f32.xlu0 %v1629_v1 }
 0x572   :  { %v5307_v4 = vpop.eup %5306 }
 0x573   :  { %v1632_v5 = vsel %vm696_vm4, %v5307_v4, 0.0 }
 0x574   :  { %1633 = vadd.xlane.f32.xlu1 %v1632_v5 }
 0x5fd   :  { %v1631_v30 = vpop.xlane.xlu0 %1630 }
 0x5fe   :  { %5308 = vrcp.f32 %v1631_v30 }
 0x601   :  { %v1634_v31 = vpop.xlane.xlu1 %1633 }
 0x602   :  { %5310 = vrcp.f32 %v1634_v31 }
 0x608   :  { %v5309_v32 = vpop.eup %5308 }
 0x609   :  { %v1637_v33 = vmul.f32 %v5309_v32, %v5305_v0 }
 0x60b   :  { %4976 = vmatmul.mubr.msk.f32.vlgmr.msra.gmra.mrb[14].mxu0 %vm742_vm5, %v1637_v33 }
 0x60c   :  { %v5311_v34 = vpop.eup %5310  ;;  %4985 = vmatprep.mubr.msk.f32.mxu0 %vm5354_vm0, %v5355_v6  ;;  %4984 = vmatpush3.msra.mxu0 %v4666_v39 }
 0x60d   :  { %v1638_v35 = vmul.f32 %v5311_v34, %v5307_v4  ;;  %5213 = vmatprep.subr.bf16.mxu0 %v5353_v3  ;;  %v4670_v4 = vld [vmem:[%s6156_s1 + $0x48] sm:$0xff] }
 0x60e   :  { %v5214_v8 = vpack.c.bf16 %v4670_v4, %v4669_v2 }
 0x60f   :  { %4981 = vmatmul.mubr.msk.f32.vlgmr.msra.gmra.mrb[10].mxu1 %vm742_vm5, %v1638_v35 }
 0x610   :  { %4989 = vmatpush3.msra.mxu1 %v965_v36  ;;  %4990 = vmatprep.mubr.msk.f32.mxu1 %vm5354_vm0, %v5355_v6 }
 0x611   :  { %5219 = vmatprep.subr.bf16.mxu1 %v5353_v3 }
 0x613   :  { %4991 = vmatmul.mubr.msk.f32.vlgmr.msra.gmra.mrb[12].mxu1 %vm498_vm2, %v5630_v15  ;;  %v4678_v15 = vld [vmem:[%s6157_s2 + $0x50] sm:$0xff] }
 0x614   :  { %5012 = vmatprep.mubr.msk.f32.mxu1 %vm5354_vm0, %v5355_v6  ;;  %5221 = vmatpush3.bf16.msra.mxu1 %v5220_v40  ;;  %v5223_v42 = vpack.c.bf16 %v4679_v41, %v4678_v15 }
 0x615   :  { %5222 = vmatprep.subr.bf16.mxu1 %v5353_v3 }
 0x618   :  { %5224 = vmatpush3.bf16.msra.mxu1 %v5223_v42  ;;  %v4674_v42 = vld [vmem:[%s6159_s4 + $0x2] ss:$0 sm:$0xff] }
 0x619   :  { %5026 = vmatprep.subr.mxu1 %v5355_v6 }
 0x61b   :  { %5013 = vmatmul.mubr.msk.f32.vlgmr.msra.gmra.mrb[14].mxu1 %vm57_vm1, %v5456_v10 }
 0x61c   :  { %5028 = vmatprep.mubr.msk.f32.mxu1 %vm5354_vm0, %v5355_v6 }
 0x6de   :  { %v1733_v43 = vpop.f32.mrb[14].mxu0 }
 0x6df   :  { %v1843_v44 = vrot.slane %v1733_v43, %v5496_v27  ;;  %v4977_v45 = vpop.f32.mrb[15].mxu0 }
 0x6e1   :  { %v1844_v46 = vcombine.high %v1843_v44, %v1843_v44  ;;  %v1851_v47 = vrot.slane %v1843_v44, %v5496_v27 }
 0x6e2   :  { %v1831_v48 = vpop.f32.mrb[10].mxu1 }
 0x6e3   :  { %v1858_v49 = vrot.slane %v1844_v46, %v5496_v27  ;;  %v1866_v50 = vrot.slane %v1831_v48, %v5496_v27  ;;  %v4982_v51 = vpop.f32.mrb[11].mxu1  ;;  %v1859_v52 = vcombine.high %v1851_v47, %v1851_v47 }
 0x6e5   :  { %v1885_v53 = vcombine.low %v1851_v47, %v1858_v49  ;;  %v1867_v54 = vcombine.high %v1866_v50, %v1866_v50  ;;  %v1874_v55 = vrot.slane %v1866_v50, %v5496_v27 }
 0x6e6   :  { %v2105_v56 = vpop.f32.mrb[12].mxu1 }
 0x6e7   :  { %v1881_v57 = vrot.slane %v1867_v54, %v5496_v27  ;;  %v1882_v58 = vcombine.high %v1874_v55, %v1874_v55  ;;  %v1886_v59 = vcombine.low %v1859_v52, %v1874_v55  ;;  %v4992_v60 = vpop.f32.mrb[13].mxu1  ;;  %v1894_v61 = vrot.slane %v1885_v53, %v5496_v27 }
 0x6e9   :  { %v1887_v62 = vcombine.low %v1881_v57, %v1882_v58  ;;  %v1901_v63 = vrot.slane %v1886_v59, %v5496_v27 }
 0x6eb   :  { %v1908_v0 = vrot.slane %v1887_v62, %v5496_v27  ;;  %v1909_v1 = vcombine.low %v1894_v61, %v1901_v63 }
 0x6ed   :  { %v1916_v5 = vrot.slane %v1909_v1, %v5496_v27  ;;  %v1923_v7 = vrot.slane %v1908_v0, %v5496_v27 }
 0x6ee   :  { %v2271_v16 = vpop.f32.mrb[14].mxu1 }
 0x6ef   :  { %v1924_v9 = vcombine.low %v1916_v5, %v1923_v7  ;;  %v2272_v17 = vadd.f32 %v4681_v14, %v2271_v16  ;;  %v5014_v18 = vpop.f32.mrb[15].mxu1  ;;  %v4684_v14 = vld [vmem:[%s6158_s3 + $0x48] sm:$0xff]  ;;  %v4685_v16 = vld [vmem:[%s6158_s3 + $0x50] sm:$0xff] }
 0x6f0   :  { %v4686_v18 = vld [vmem:[%s6158_s3 + $0x58] sm:$0xff] }
 0x6f1   :  { %4986 = vmatmul.mubr.msk.f32.vlgmr.msra.gmra.mrb[16].mxu0 %vm498_vm2, %v1924_v9  ;;  %v2419_v19 = vcombine.high %v2272_v17, %v2272_v17  ;;  %v2426_v20 = vrot.slane %v2272_v17, %v5496_v27 }
 0x6f2   :  { %5215 = vmatpush3.bf16.msra.mxu0 %v5214_v8  ;;  %5001 = vmatprep.mubr.msk.f32.mxu0 %vm5354_vm0, %v5355_v6 }
 0x6f3   :  { %5216 = vmatprep.subr.bf16.mxu0 %v5353_v3  ;;  %v2433_v21 = vrot.slane %v2419_v19, %v5496_v27  ;;  %v2434_v22 = vcombine.high %v2426_v20, %v2426_v20  ;;  %v2442_v23 = vrot.slane %v2426_v20, %v5496_v27  ;;  %v5229_v19 = vpack.c.bf16 %v4686_v18, %v4685_v16 }
 0x6f5   :  { %v2435_v24 = vcombine.high %v2433_v21, %v2433_v21  ;;  %v2449_v25 = vrot.slane %v2433_v21, %v5496_v27  ;;  %v2456_v26 = vrot.slane %v2434_v22, %v5496_v27  ;;  %v2464_v28 = vcombine.high %v2442_v23, %v2442_v23 }
 0x6f6   :  { %5218 = vmatpush3.bf16.msra.mxu0 %v5217_v13  ;;  %v4683_v13 = vld [vmem:[%s6158_s3 + $0x40] sm:$0xff] }
 0x6f7   :  { %5225 = vmatprep.subr.bf16.mxu0 %v5353_v3  ;;  %v2463_v29 = vrot.slane %v2435_v24, %v5496_v27  ;;  %v2465_v30 = vcombine.high %v2456_v26, %v2456_v26  ;;  %v2540_v31 = vcombine.low %v2442_v23, %v2456_v26  ;;  %v2554_v32 = vrot.slane %v2464_v28, %v5496_v27 }
 0x6f8   :  { %v5226_v17 = vpack.c.bf16 %v4684_v14, %v4683_v13  ;;  %v5872_v13 = vld [vmem:[%s6155_s0] sm:$0x3f] }
 0x6f9   :  { %5002 = vmatmul.mubr.msk.f32.vlgmr.msra.gmra.mrb[18].mxu0 %vm57_vm1, %v5456_v10  ;;  %v2547_v33 = vrot.slane %v2540_v31, %v5496_v27  ;;  %v2663_v34 = vcombine.low %v2465_v30, %v2449_v25  ;;  %v2677_v35 = vrot.slane %v2463_v29, %v5496_v27 }
 0x6fa   :  { %5023 = vmatprep.mubr.msk.f32.mxu0 %vm5354_vm0, %v5355_v6  ;;  %5227 = vmatpush3.bf16.msra.mxu0 %v5226_v17 }
 0x6fb   :  { %v2555_v36 = vcombine.low %v2547_v33, %v2554_v32  ;;  %v2670_v37 = vrot.slane %v2663_v34, %v5496_v27  ;;  %5228 = vmatprep.subr.bf16.mxu0 %v5353_v3  ;;  %v4688_v34 = vld [vmem:[%s6161_s6 + $0x2] ss:$0 sm:$0xff] }
 0x6fd   :  { %v2678_v38 = vcombine.low %v2670_v37, %v2677_v35  ;;  %v2562_v39 = vrot.slane %v2555_v36, %v5496_v27 }
 0x6fe   :  { %5230 = vmatpush3.bf16.msra.mxu0 %v5229_v19 }
 0x6ff   :  { %5027 = vmatpush3.xpose.msk.msra.mxu1 %vm498_vm2, %v2562_v39  ;;  %v2685_v11 = vrot.slane %v2678_v38, %v5496_v27  ;;  %5036 = vmatprep.subr.mxu0 %v5355_v6 }
 0x700   :  { %5031 = vmatprep.subr.mxu1 %v5355_v6 }
 0x701   :  { %5024 = vmatmul.mubr.msk.f32.vlgmr.msra.gmra.mrb[20].mxu0 %vm57_vm1, %v5456_v10 }
 0x702   :  { %5038 = vmatprep.mubr.msk.f32.mxu0 %vm5354_vm0, %v5355_v6 }
 0x7c4   :  { %v1993_v40 = vpop.f32.mrb[16].mxu0 }
 0x7c5   :  { %v5778_v15 = vadd.f32 %v2105_v56, %v1993_v40  ;;  %v4987_v41 = vpop.f32.mrb[17].mxu0 }
 0x7cc   :  { %v2188_v43 = vpop.f32.mrb[18].mxu0 }
 0x7cd   :  { %v2189_v44 = vadd.f32 %v4674_v42, %v2188_v43  ;;  %v5003_v45 = vpop.f32.mrb[19].mxu0 }
 0x7cf   :  { %v2359_v46 = vcombine.high %v2189_v44, %v2189_v44  ;;  %v2366_v47 = vrot.slane %v2189_v44, %v5496_v27 }
 0x7d1   :  { %v2373_v48 = vrot.slane %v2359_v46, %v5496_v27  ;;  %v2374_v49 = vcombine.high %v2366_v47, %v2366_v47  ;;  %v2382_v50 = vrot.slane %v2366_v47, %v5496_v27 }
 0x7d3   :  { %v2375_v51 = vcombine.high %v2373_v48, %v2373_v48  ;;  %v2389_v52 = vrot.slane %v2373_v48, %v5496_v27  ;;  %v2396_v53 = vrot.slane %v2374_v49, %v5496_v27  ;;  %v2404_v54 = vcombine.high %v2382_v50, %v2382_v50 }
 0x7d4   :  { %v2412_v55 = vmul.f32 0.35355338, %v2382_v50  ;;  %v2354_v26 = vpop.f32.mrb[20].mxu0 }
 0x7d5   :  { %v2403_v56 = vrot.slane %v2375_v51, %v5496_v27  ;;  %v2405_v57 = vcombine.high %v2396_v53, %v2396_v53  ;;  %v2413_v58 = vmul.f32 0.35355338, %v2396_v53  ;;  %v2414_v59 = vmul.f32 0.35355338, %v2404_v54  ;;  %v5025_v28 = vpop.f32.mrb[21].mxu0 }
 0x7d6   :  { %v2416_v61 = vmul.f32 0.35355338, %v2389_v52  ;;  %v2355_v35 = vadd.f32 %v4688_v34, %v2354_v26 }
 0x7d7   :  { %v2415_v60 = vmul.f32 0.35355338, %v2405_v57  ;;  %v2417_v62 = vmul.f32 0.35355338, %v2403_v56  ;;  %v2517_v63 = vcombine.low %v2412_v55, %v2413_v58  ;;  %v2531_v1 = vrot.slane %v2414_v59, %v5496_v27 }
 0x7d8   :  { %v2474_v38 = vrot.slane %v2355_v35, %v5496_v27  ;;  %v2467_v41 = vcombine.high %v2355_v35, %v2355_v35 }
 0x7d9   :  { %v2524_v0 = vrot.slane %v2517_v63, %v5496_v27  ;;  %v2640_v2 = vcombine.low %v2415_v60, %v2416_v61  ;;  %v2654_v7 = vrot.slane %v2417_v62, %v5496_v27 }
 0x7da   :  { %v2482_v42 = vcombine.high %v2474_v38, %v2474_v38  ;;  %v2481_v43 = vrot.slane %v2467_v41, %v5496_v27  ;;  %v2490_v45 = vrot.slane %v2474_v38, %v5496_v27 }
 0x7db   :  { %v2532_v4 = vcombine.low %v2524_v0, %v2531_v1  ;;  %v2647_v5 = vrot.slane %v2640_v2, %v5496_v27 }
 0x7dc   :  { %v2504_v44 = vrot.slane %v2482_v42, %v5496_v27  ;;  %v2483_v46 = vcombine.high %v2481_v43, %v2481_v43  ;;  %v2497_v47 = vrot.slane %v2481_v43, %v5496_v27  ;;  %v2512_v49 = vcombine.high %v2490_v45, %v2490_v45  ;;  %v4709_v42 = vld [vmem:[%s6157_s2 + $0x70] sm:$0xff]  ;;  %v4710_v43 = vld [vmem:[%s6157_s2 + $0x78] sm:$0xff] }
 0x7dd   :  { %v2655_v8 = vcombine.low %v2647_v5, %v2654_v7  ;;  %v2539_v9 = vrot.slane %v2532_v4, %v5496_v27  ;;  %v4698_v4 = vld [vmem:[%s6162_s7 + $0x10] sm:$0xff]  ;;  %v4700_v5 = vld [vmem:[%s6156_s1 + $0x60] sm:$0xff]  ;;  %v4701_v7 = vld [vmem:[%s6156_s1 + $0x68] sm:$0xff] }
 0x7de   :  { %v2513_v48 = vcombine.high %v2504_v44, %v2504_v44  ;;  %v2782_v50 = vcombine.low %v2490_v45, %v2504_v44  ;;  %v2511_v51 = vrot.slane %v2483_v46, %v5496_v27  ;;  %v2796_v54 = vrot.slane %v2512_v49, %v5496_v27 }
 0x7df   :  { %5029 = vmatmul.mubr.msk.f32.vlgmr.msra.gmra.mrb[16].mxu1 %vm498_vm2, %v2539_v9  ;;  %v2662_v12 = vrot.slane %v2655_v8, %v5496_v27  ;;  %v5232_v8 = vpack.c.bf16 %v4701_v7, %v4700_v5  ;;  %v4702_v9 = vld [vmem:[%s6156_s1 + $0x70] sm:$0xff]  ;;  %v5241_v44 = vpack.c.bf16 %v4710_v43, %v4709_v42 }
 0x7e0   :  { %5032 = vmatpush3.xpose.msk.msra.mxu1 %vm498_vm2, %v2685_v11  ;;  %5033 = vmatprep.mubr.msk.f32.mxu1 %vm5354_vm0, %v5355_v6  ;;  %v2880_v52 = vcombine.low %v2513_v48, %v2497_v47  ;;  %v2789_v53 = vrot.slane %v2782_v50, %v5496_v27  ;;  %v2894_v56 = vrot.slane %v2511_v51, %v5496_v27  ;;  %v4703_v11 = vld [vmem:[%s6156_s1 + $0x78] sm:$0xff]  ;;  %v4705_v47 = vld [vmem:[%s6159_s4 + $0x3] ss:$0 sm:$0xff] }
 0x7e1   :  { %5041 = vmatprep.subr.mxu1 %v5355_v6 }
 0x7e2   :  { %v2887_v55 = vrot.slane %v2880_v52, %v5496_v27  ;;  %v2797_v57 = vcombine.low %v2789_v53, %v2796_v54 }
 0x7e3   :  { %5034 = vmatmul.mubr.msk.f32.vlgmr.msra.gmra.mrb[18].mxu1 %vm498_vm2, %v2662_v12  ;;  %v5235_v12 = vpack.c.bf16 %v4703_v11, %v4702_v9 }
 0x7e4   :  { %5043 = vmatprep.mubr.msk.f32.mxu1 %vm5354_vm0, %v5355_v6  ;;  %v2895_v58 = vcombine.low %v2887_v55, %v2894_v56  ;;  %v2804_v59 = vrot.slane %v2797_v57, %v5496_v27 }
 0x7e6   :  { %5037 = vmatpush3.msk.msra.mxu0 %vm746_vm3, %v2804_v59  ;;  %v2902_v60 = vrot.slane %v2895_v58, %v5496_v27  ;;  %v4712_v58 = vld [vmem:[%s6160_s5 + $0x3] ss:$0 sm:$0xff] }
 0x7e7   :  { %5046 = vmatprep.subr.mxu0 %v5355_v6 }
 0x7e8   :  { %5042 = vmatpush3.msk.msra.mxu1 %vm746_vm3, %v2902_v60 }
 0x7e9   :  { %5231 = vmatprep.subr.bf16.mxu1 %v5353_v3 }
 0x8b2   :  { %v2633_v20 = vpop.f32.mrb[16].mxu1 }
 0x8b3   :  { %v5030_v21 = vpop.f32.mrb[17].mxu1  ;;  %v2760_v22 = vsel %vm696_vm4, %v2633_v20, -inf }
 0x8b4   :  { %2761 = vmax.xlane.f32.xlu0 %v2760_v22 }
 0x8b6   :  { %v2756_v23 = vpop.f32.mrb[18].mxu1 }
 0x8b7   :  { %v5035_v24 = vpop.f32.mrb[19].mxu1  ;;  %v2763_v25 = vsel %vm696_vm4, %v2756_v23, -inf }
 0x8b8   :  { %2764 = vmax.xlane.f32.xlu1 %v2763_v25 }
 0x941   :  { %v2762_v29 = vpop.xlane.xlu0 %2761 }
 0x942   :  { %v2766_v30 = vsub.f32 %v2633_v20, %v2762_v29 }
 0x944   :  { %v2768_v31 = vmul.f32 1.442695, %v2766_v30 }
 0x945   :  { %v2765_v32 = vpop.xlane.xlu1 %2764 }
 0x946   :  { %5312 = vpow2.f32 %v2768_v31  ;;  %v2767_v10 = vsub.f32 %v2756_v23, %v2765_v32 }
 0x948   :  { %v2770_v33 = vmul.f32 1.442695, %v2767_v10 }
 0x94a   :  { %5314 = vpow2.f32 %v2770_v33 }
 0x950   :  { %v5313_v36 = vpop.eup %5312 }
 0x951   :  { %v2772_v37 = vsel %vm696_vm4, %v5313_v36, 0.0 }
 0x952   :  { %2773 = vadd.xlane.f32.xlu0 %v2772_v37  ;;  %v4708_v37 = vld [vmem:[%s6157_s2 + $0x68] sm:$0xff] }
 0x954   :  { %v5315_v39 = vpop.eup %5314 }
 0x955   :  { %v2775_v40 = vsel %vm696_vm4, %v5315_v39, 0.0 }
 0x956   :  { %2776 = vadd.xlane.f32.xlu1 %v2775_v40 }
 0x9df   :  { %v2774_v61 = vpop.xlane.xlu0 %2773 }
 0x9e0   :  { %5316 = vrcp.f32 %v2774_v61 }
 0x9e3   :  { %v2777_v62 = vpop.xlane.xlu1 %2776 }
 0x9e4   :  { %5318 = vrcp.f32 %v2777_v62 }
 0x9ea   :  { %v5317_v63 = vpop.eup %5316 }
 0x9eb   :  { %v2780_v0 = vmul.f32 %v5317_v63, %v5313_v36  ;;  %v4707_v36 = vld [vmem:[%s6157_s2 + $0x60] sm:$0xff] }
 0x9ec   :  { %v5238_v40 = vpack.c.bf16 %v4708_v37, %v4707_v36 }
 0x9ed   :  { %5039 = vmatmul.mubr.msk.f32.vlgmr.msra.gmra.mrb[22].mxu0 %vm742_vm5, %v2780_v0 }
 0x9ee   :  { %v5319_v1 = vpop.eup %5318  ;;  %5048 = vmatprep.mubr.msk.f32.mxu0 %vm5354_vm0, %v5355_v6  ;;  %5047 = vmatpush3.msra.mxu0 %v4698_v4 }
 0x9ef   :  { %v2781_v2 = vmul.f32 %v5319_v1, %v5315_v39  ;;  %5237 = vmatprep.subr.bf16.mxu0 %v5353_v3 }
 0x9f1   :  { %5044 = vmatmul.mubr.msk.f32.vlgmr.msra.gmra.mrb[20].mxu1 %vm742_vm5, %v2781_v2 }
 0x9f2   :  { %5059 = vmatprep.mubr.msk.f32.mxu1 %vm5354_vm0, %v5355_v6  ;;  %5233 = vmatpush3.bf16.msra.mxu1 %v5232_v8 }
 0x9f3   :  { %5234 = vmatprep.subr.bf16.mxu1 %v5353_v3 }
 0x9f6   :  { %5236 = vmatpush3.bf16.msra.mxu1 %v5235_v12 }
 0x9f7   :  { %5243 = vmatprep.subr.bf16.mxu1 %v5353_v3 }
 0x9f9   :  { %5060 = vmatmul.mubr.msk.f32.vlgmr.msra.gmra.mrb[22].mxu1 %vm57_vm1, %v5872_v13 }
 0x9fa   :  { %5081 = vmatprep.mubr.msk.f32.mxu1 %vm5354_vm0, %v5355_v6 }
 0xac0   :  { %v2876_v14 = vpop.f32.mrb[22].mxu0 }
 0xac1   :  { %v2986_v16 = vrot.slane %v2876_v14, %v5496_v27  ;;  %v5040_v17 = vpop.f32.mrb[23].mxu0 }
 0xac3   :  { %v2987_v18 = vcombine.high %v2986_v16, %v2986_v16  ;;  %v2994_v19 = vrot.slane %v2986_v16, %v5496_v27 }
 0xac4   :  { %v2974_v20 = vpop.f32.mrb[20].mxu1 }
 0xac5   :  { %v3001_v21 = vrot.slane %v2987_v18, %v5496_v27  ;;  %v3009_v22 = vrot.slane %v2974_v20, %v5496_v27  ;;  %v5045_v23 = vpop.f32.mrb[21].mxu1  ;;  %v3002_v24 = vcombine.high %v2994_v19, %v2994_v19 }
 0xac7   :  { %v3028_v25 = vcombine.low %v2994_v19, %v3001_v21  ;;  %v3010_v26 = vcombine.high %v3009_v22, %v3009_v22  ;;  %v3017_v28 = vrot.slane %v3009_v22, %v5496_v27 }
 0xac9   :  { %v3024_v29 = vrot.slane %v3010_v26, %v5496_v27  ;;  %v3025_v30 = vcombine.high %v3017_v28, %v3017_v28  ;;  %v3029_v31 = vcombine.low %v3002_v24, %v3017_v28  ;;  %v3037_v32 = vrot.slane %v3028_v25, %v5496_v27 }
 0xacb   :  { %v3030_v10 = vcombine.low %v3024_v29, %v3025_v30  ;;  %v3044_v33 = vrot.slane %v3029_v31, %v5496_v27 }
 0xacc   :  { %v3220_v45 = vpop.f32.mrb[22].mxu1 }
 0xacd   :  { %v3051_v34 = vrot.slane %v3030_v10, %v5496_v27  ;;  %v3052_v35 = vcombine.low %v3037_v32, %v3044_v33  ;;  %v5061_v46 = vpop.f32.mrb[23].mxu1  ;;  %v3221_v48 = vadd.f32 %v4705_v47, %v3220_v45  ;;  %v4715_v45 = vld [vmem:[%s6158_s3 + $0x68] sm:$0xff] }
 0xace   :  { %v4716_v46 = vld [vmem:[%s6158_s3 + $0x70] sm:$0xff] }
 0xacf   :  { %v3059_v38 = vrot.slane %v3052_v35, %v5496_v27  ;;  %v3066_v39 = vrot.slane %v3051_v34, %v5496_v27  ;;  %v3398_v49 = vrot.slane %v3221_v48, %v5496_v27  ;;  %v3391_v53 = vcombine.high %v3221_v48, %v3221_v48  ;;  %v4717_v48 = vld [vmem:[%s6158_s3 + $0x78] sm:$0xff] }
 0xad1   :  { %v3067_v41 = vcombine.low %v3059_v38, %v3066_v39  ;;  %v3406_v54 = vcombine.high %v3398_v49, %v3398_v49  ;;  %v3405_v55 = vrot.slane %v3391_v53, %v5496_v27  ;;  %v3414_v56 = vrot.slane %v3398_v49, %v5496_v27 }
 0xad2   :  { %v5247_v49 = vpack.c.bf16 %v4717_v48, %v4716_v46 }
 0xad3   :  { %5049 = vmatmul.mubr.msk.f32.vlgmr.msra.gmra.mrb[24].mxu0 %vm498_vm2, %v3067_v41  ;;  %v3428_v57 = vrot.slane %v3406_v54, %v5496_v27  ;;  %v3407_v60 = vcombine.high %v3405_v55, %v3405_v55  ;;  %v3421_v61 = vrot.slane %v3405_v55, %v5496_v27  ;;  %v3436_v63 = vcombine.high %v3414_v56, %v3414_v56 }
 0xad4   :  { %5239 = vmatpush3.bf16.msra.mxu0 %v5238_v40  ;;  %5070 = vmatprep.mubr.msk.f32.mxu0 %vm5354_vm0, %v5355_v6  ;;  %v3444_v1 = vmul.f32 0.35355338, %v3414_v56 }
 0xad5   :  { %5240 = vmatprep.subr.bf16.mxu0 %v5353_v3  ;;  %v3437_v0 = vcombine.high %v3428_v57, %v3428_v57  ;;  %v3445_v2 = vmul.f32 0.35355338, %v3428_v57  ;;  %v3435_v7 = vrot.slane %v3407_v60, %v5496_v27  ;;  %v3446_v12 = vmul.f32 0.35355338, %v3436_v63  ;;  %v4719_v63 = vld [vmem:[%s6161_s6 + $0x3] ss:$0 sm:$0xff] }
 0xad6   :  { %v3448_v16 = vmul.f32 0.35355338, %v3421_v61 }
 0xad7   :  { %v3447_v14 = vmul.f32 0.35355338, %v3437_v0  ;;  %v3549_v17 = vcombine.low %v3444_v1, %v3445_v2  ;;  %v3449_v25 = vmul.f32 0.35355338, %v3435_v7  ;;  %v3563_v28 = vrot.slane %v3446_v12, %v5496_v27 }
 0xad8   :  { %5242 = vmatpush3.bf16.msra.mxu0 %v5241_v44  ;;  %v4714_v44 = vld [vmem:[%s6158_s3 + $0x60] sm:$0xff] }
 0xad9   :  { %5084 = vmatprep.subr.mxu0 %v5355_v6  ;;  %v3556_v26 = vrot.slane %v3549_v17, %v5496_v27  ;;  %v3672_v29 = vcombine.low %v3447_v14, %v3448_v16  ;;  %v3686_v37 = vrot.slane %v3449_v25, %v5496_v27  ;;  %v5244_v47 = vpack.c.bf16 %v4715_v45, %v4714_v44 }
 0xadb   :  { %5071 = vmatmul.mubr.msk.f32.vlgmr.msra.gmra.mrb[26].mxu0 %vm57_vm1, %v5872_v13  ;;  %v3564_v35 = vcombine.low %v3556_v26, %v3563_v28  ;;  %v3679_v36 = vrot.slane %v3672_v29, %v5496_v27  ;;  %5245 = vmatpush3.bf16.msra.mxu1 %v5244_v47 }
 0xadc   :  { %5086 = vmatprep.mubr.msk.f32.mxu0 %vm5354_vm0, %v5355_v6  ;;  %5246 = vmatprep.subr.bf16.mxu1 %v5353_v3 }
 0xadd   :  { %v3687_v40 = vcombine.low %v3679_v36, %v3686_v37  ;;  %v3571_v41 = vrot.slane %v3564_v35, %v5496_v27  ;;  %v4729_v37 = vld [vmem:[%s6162_s7 + $0x18] sm:$0xff] }
 0xadf   :  { %v3694_v43 = vrot.slane %v3687_v40, %v5496_v27  ;;  %5248 = vmatpush3.bf16.msra.mxu1 %v5247_v49 }
 0xae0   :  { %5094 = vmatprep.subr.mxu1 %v5355_v6 }
 0xae2   :  { %5082 = vmatmul.mubr.msk.f32.vlgmr.msra.gmra.mrb[24].mxu1 %vm57_vm1, %v5872_v13 }
 0xae3   :  { %5096 = vmatprep.mubr.msk.f32.mxu1 %vm5354_vm0, %v5355_v6 }
 0xba6   :  { %v3136_v50 = vpop.f32.mrb[24].mxu0 }
 0xba7   :  { %v5915_v51 = vadd.f32 %v3136_v50, %v5778_v15  ;;  %v5050_v52 = vpop.f32.mrb[25].mxu0 }
 0xbae   :  { %v3303_v59 = vpop.f32.mrb[26].mxu0 }
 0xbaf   :  { %v3304_v62 = vadd.f32 %v4712_v58, %v3303_v59  ;;  %v5072_v15 = vpop.f32.mrb[27].mxu0 }
 0xbb1   :  { %v3451_v4 = vcombine.high %v3304_v62, %v3304_v62  ;;  %v3458_v5 = vrot.slane %v3304_v62, %v5496_v27 }
 0xbb3   :  { %v3465_v8 = vrot.slane %v3451_v4, %v5496_v27  ;;  %v3466_v9 = vcombine.high %v3458_v5, %v3458_v5  ;;  %v3474_v11 = vrot.slane %v3458_v5, %v5496_v27 }
 0xbb5   :  { %v3467_v18 = vcombine.high %v3465_v8, %v3465_v8  ;;  %v3488_v19 = vrot.slane %v3466_v9, %v5496_v27  ;;  %v3496_v20 = vcombine.high %v3474_v11, %v3474_v11  ;;  %v3481_v21 = vrot.slane %v3465_v8, %v5496_v27  ;;  %v3386_v57 = vpop.f32.mrb[24].mxu1 }
 0xbb6   :  { %v5083_v58 = vpop.f32.mrb[25].mxu1  ;;  %v3387_v0 = vadd.f32 %v4719_v63, %v3386_v57 }
 0xbb7   :  { %v3495_v22 = vrot.slane %v3467_v18, %v5496_v27  ;;  %v3497_v23 = vcombine.high %v3488_v19, %v3488_v19  ;;  %v3572_v24 = vcombine.low %v3474_v11, %v3488_v19  ;;  %v3586_v31 = vrot.slane %v3496_v20, %v5496_v27 }
 0xbb8   :  { %v3506_v2 = vrot.slane %v3387_v0, %v5496_v27  ;;  %v3499_v7 = vcombine.high %v3387_v0, %v3387_v0  ;;  %v4229_v0 = vld [vmem:[%s6164_s9] sm:$0xff] }
 0xbb9   :  { %v3579_v30 = vrot.slane %v3572_v24, %v5496_v27  ;;  %v3695_v32 = vcombine.low %v3497_v23, %v3481_v21  ;;  %v3709_v34 = vrot.slane %v3495_v22, %v5496_v27 }
 0xbba   :  { %v3514_v8 = vcombine.high %v3506_v2, %v3506_v2  ;;  %v3513_v11 = vrot.slane %v3499_v7, %v5496_v27  ;;  %v3522_v14 = vrot.slane %v3506_v2, %v5496_v27 }
 0xbbb   :  { %v3587_v10 = vcombine.low %v3579_v30, %v3586_v31  ;;  %v3702_v33 = vrot.slane %v3695_v32, %v5496_v27 }
 0xbbc   :  { %v3536_v12 = vrot.slane %v3514_v8, %v5496_v27  ;;  %v3515_v16 = vcombine.high %v3513_v11, %v3513_v11  ;;  %v3529_v17 = vrot.slane %v3513_v11, %v5496_v27  ;;  %v3544_v19 = vcombine.high %v3522_v14, %v3522_v14  ;;  %v4231_v8 = vld [vmem:[%s6164_s9 + $0x10] sm:$0xff] }
 0xbbd   :  { %v3710_v38 = vcombine.low %v3702_v33, %v3709_v34  ;;  %v3594_v39 = vrot.slane %v3587_v10, %v5496_v27 }
 0xbbe   :  { %v3545_v18 = vcombine.high %v3536_v12, %v3536_v12  ;;  %v3814_v20 = vcombine.low %v3522_v14, %v3536_v12  ;;  %v3543_v21 = vrot.slane %v3515_v16, %v5496_v27  ;;  %v3828_v24 = vrot.slane %v3544_v19, %v5496_v27  ;;  %v4731_v14 = vld [vmem:[%s6163_s8] ss:$0 sm:$0xff] }
 0xbbf   :  { %5085 = vmatpush3.xpose.msk.msra.mxu0 %vm498_vm2, %v3594_v39  ;;  %v3717_v42 = vrot.slane %v3710_v38, %v5496_v27 }
 0xbc0   :  { %5089 = vmatprep.subr.mxu0 %v5355_v6  ;;  %v3912_v22 = vcombine.low %v3545_v18, %v3529_v17  ;;  %v3821_v23 = vrot.slane %v3814_v20, %v5496_v27  ;;  %v3926_v26 = vrot.slane %v3543_v21, %v5496_v27 }
 0xbc2   :  { %5087 = vmatmul.mubr.msk.f32.vlgmr.msra.gmra.mrb[28].mxu0 %vm498_vm2, %v3571_v41  ;;  %v3919_v25 = vrot.slane %v3912_v22, %v5496_v27  ;;  %v3829_v28 = vcombine.low %v3821_v23, %v3828_v24 }
 0xbc3   :  { %5090 = vmatpush3.xpose.msk.msra.mxu0 %vm498_vm2, %v3717_v42  ;;  %5091 = vmatprep.mubr.msk.f32.mxu0 %vm5354_vm0, %v5355_v6 }
 0xbc4   :  { %5099 = vmatprep.subr.mxu0 %v5355_v6  ;;  %v3927_v29 = vcombine.low %v3919_v25, %v3926_v26  ;;  %v3836_v30 = vrot.slane %v3829_v28, %v5496_v27 }
 0xbc6   :  { %5092 = vmatmul.mubr.msk.f32.vlgmr.msra.gmra.mrb[30].mxu0 %vm498_vm2, %v3694_v43  ;;  %5095 = vmatpush3.msk.msra.mxu1 %vm746_vm3, %v3836_v30  ;;  %v3934_v31 = vrot.slane %v3927_v29, %v5496_v27 }
 0xbc7   :  { %5101 = vmatprep.mubr.msk.f32.mxu0 %vm5354_vm0, %v5355_v6  ;;  %5104 = vmatprep.subr.mxu1 %v5355_v6 }
 0xbc8   :  { %5100 = vmatpush3.msk.msra.mxu0 %vm746_vm3, %v3934_v31  ;;  %v4739_v31 = vld [vmem:[%s6164_s9 + $0x48] sm:$0xff] }
 0xbc9   :  { %5249 = vmatprep.subr.bf16.mxu0 %v5353_v3 }
 0xc95   :  { %v3665_v50 = vpop.f32.mrb[28].mxu0 }
 0xc96   :  { %v5088_v52 = vpop.f32.mrb[29].mxu0  ;;  %v3792_v53 = vsel %vm696_vm4, %v3665_v50, -inf }
 0xc97   :  { %3793 = vmax.xlane.f32.xlu0 %v3792_v53 }
 0xc99   :  { %v3788_v54 = vpop.f32.mrb[30].mxu0 }
 0xc9a   :  { %v5093_v55 = vpop.f32.mrb[31].mxu0  ;;  %v3795_v56 = vsel %vm696_vm4, %v3788_v54, -inf }
 0xc9b   :  { %3796 = vmax.xlane.f32.xlu1 %v3795_v56 }
 0xd24   :  { %v3794_v59 = vpop.xlane.xlu0 %3793 }
 0xd25   :  { %v3798_v60 = vsub.f32 %v3665_v50, %v3794_v59 }
 0xd27   :  { %v3800_v61 = vmul.f32 1.442695, %v3798_v60 }
 0xd28   :  { %v3797_v62 = vpop.xlane.xlu1 %3796 }
 0xd29   :  { %5320 = vpow2.f32 %v3800_v61  ;;  %v3799_v13 = vsub.f32 %v3788_v54, %v3797_v62 }
 0xd2b   :  { %v3802_v15 = vmul.f32 1.442695, %v3799_v13  ;;  %v4732_v13 = vld [vmem:[%s6164_s9 + $0x20] sm:$0xff] }
 0xd2d   :  { %5322 = vpow2.f32 %v3802_v15  ;;  %v4733_v15 = vld [vmem:[%s6164_s9 + $0x28] sm:$0xff] }
 0xd2e   :  { %v5250_v63 = vpack.c.bf16 %v4733_v15, %v4732_v13  ;;  %v4528_v15 = vld [vmem:[%s6166_s11 + $0x70] sm:$0xff] }
 0xd33   :  { %v5321_v1 = vpop.eup %5320 }
 0xd34   :  { %v3804_v4 = vsel %vm696_vm4, %v5321_v1, 0.0 }
 0xd35   :  { %3805 = vadd.xlane.f32.xlu0 %v3804_v4  ;;  %v4734_v4 = vld [vmem:[%s6164_s9 + $0x30] sm:$0xff] }
 0xd37   :  { %v5323_v5 = vpop.eup %5322 }
 0xd38   :  { %v3807_v9 = vsel %vm696_vm4, %v5323_v5, 0.0 }
 0xd39   :  { %3808 = vadd.xlane.f32.xlu1 %v3807_v9  ;;  %v4232_v9 = vld [vmem:[%s6164_s9 + $0x18] sm:$0xff] }
 0xd3a   :  { %v5259_v11 = vpack.c.bf16 %v4232_v9, %v4231_v8 }
 0xdc2   :  { %v3806_v32 = vpop.xlane.xlu0 %3805 }
 0xdc3   :  { %5324 = vrcp.f32 %v3806_v32 }
 0xdc6   :  { %v3809_v10 = vpop.xlane.xlu1 %3808 }
 0xdc7   :  { %5326 = vrcp.f32 %v3809_v10 }
 0xdcd   :  { %v5325_v33 = vpop.eup %5324 }
 0xdce   :  { %v3812_v34 = vmul.f32 %v5325_v33, %v5321_v1  ;;  %v4230_v1 = vld [vmem:[%s6164_s9 + $0x8] sm:$0xff] }
 0xdcf   :  { %v5256_v2 = vpack.c.bf16 %v4230_v1, %v4229_v0 }
 0xdd0   :  { %5097 = vmatmul.mubr.msk.f32.vlgmr.msra.gmra.mrb[26].mxu1 %vm742_vm5, %v3812_v34  ;;  %v4514_v34 = vld [vmem:[%s6166_s11] sm:$0xff] }
 0xdd1   :  { %v5327_v35 = vpop.eup %5326  ;;  %5106 = vmatprep.mubr.msk.f32.mxu1 %vm5354_vm0, %v5355_v6  ;;  %5105 = vmatpush3.msra.mxu1 %v4729_v37 }
 0xdd2   :  { %v3813_v36 = vmul.f32 %v5327_v35, %v5323_v5  ;;  %5255 = vmatprep.subr.bf16.mxu1 %v5353_v3  ;;  %v4735_v5 = vld [vmem:[%s6164_s9 + $0x38] sm:$0xff]  ;;  %v4515_v35 = vld [vmem:[%s6166_s11 + $0x8] sm:$0xff] }
 0xdd3   :  { %v5253_v7 = vpack.c.bf16 %v4735_v5, %v4734_v4 }
 0xdd4   :  { %5102 = vmatmul.mubr.msk.f32.vlgmr.msra.gmra.mrb[32].mxu0 %vm742_vm5, %v3813_v36 }
 0xdd5   :  { %5117 = vmatprep.mubr.msk.f32.mxu0 %vm5354_vm0, %v5355_v6  ;;  %5251 = vmatpush3.bf16.msra.mxu0 %v5250_v63  ;;  %v4529_v63 = vld [vmem:[%s6166_s11 + $0x78] sm:$0xff] }
 0xdd6   :  { %5252 = vmatprep.subr.bf16.mxu0 %v5353_v3  ;;  %v5289_v0 = vpack.c.bf16 %v4529_v63, %v4528_v15 }
 0xdd9   :  { %5254 = vmatpush3.bf16.msra.mxu0 %v5253_v7 }
 0xdda   :  { %5261 = vmatprep.subr.bf16.mxu0 %v5353_v3 }
 0xea3   :  { %v3908_v38 = vpop.f32.mrb[26].mxu1 }
 0xea4   :  { %v4018_v39 = vrot.slane %v3908_v38, %v5496_v27  ;;  %v5098_v40 = vpop.f32.mrb[27].mxu1 }
 0xea5   :  { %v4740_v40 = vld [vmem:[%s6164_s9 + $0x50] sm:$0xff] }
 0xea6   :  { %v4019_v41 = vcombine.high %v4018_v39, %v4018_v39  ;;  %v4026_v42 = vrot.slane %v4018_v39, %v5496_v27 }
 0xea7   :  { %v4006_v43 = vpop.f32.mrb[32].mxu0 }
 0xea8   :  { %v4033_v44 = vrot.slane %v4019_v41, %v5496_v27  ;;  %v4041_v45 = vrot.slane %v4006_v43, %v5496_v27  ;;  %v5103_v46 = vpop.f32.mrb[33].mxu0  ;;  %v4034_v47 = vcombine.high %v4026_v42, %v4026_v42  ;;  %v4741_v41 = vld [vmem:[%s6164_s9 + $0x58] sm:$0xff] }
 0xea9   :  { %v5265_v46 = vpack.c.bf16 %v4741_v41, %v4740_v40 }
 0xeaa   :  { %v4060_v48 = vcombine.low %v4026_v42, %v4033_v44  ;;  %v4042_v49 = vcombine.high %v4041_v45, %v4041_v45  ;;  %v4049_v50 = vrot.slane %v4041_v45, %v5496_v27  ;;  %v5268_v42 = vpack.c.bf16 %v4515_v35, %v4514_v34  ;;  %v4516_v44 = vld [vmem:[%s6166_s11 + $0x10] sm:$0xff]  ;;  %v4517_v45 = vld [vmem:[%s6166_s11 + $0x18] sm:$0xff] }
 0xeac   :  { %v4056_v52 = vrot.slane %v4042_v49, %v5496_v27  ;;  %v4057_v53 = vcombine.high %v4049_v50, %v4049_v50  ;;  %v4061_v54 = vcombine.low %v4034_v47, %v4049_v50  ;;  %v4069_v55 = vrot.slane %v4060_v48, %v5496_v27  ;;  %v4518_v49 = vld [vmem:[%s6166_s11 + $0x20] sm:$0xff]  ;;  %v4519_v50 = vld [vmem:[%s6166_s11 + $0x28] sm:$0xff] }
 0xead   :  { %v5271_v48 = vpack.c.bf16 %v4517_v45, %v4516_v44 }
 0xeae   :  { %v4062_v56 = vcombine.low %v4056_v52, %v4057_v53  ;;  %v4076_v57 = vrot.slane %v4061_v54, %v5496_v27  ;;  %v5274_v53 = vpack.c.bf16 %v4519_v50, %v4518_v49  ;;  %v4521_v54 = vld [vmem:[%s6166_s11 + $0x38] sm:$0xff] }
 0xeb0   :  { %v4083_v58 = vrot.slane %v4062_v56, %v5496_v27  ;;  %v4084_v59 = vcombine.low %v4069_v55, %v4076_v57  ;;  %v4523_v56 = vld [vmem:[%s6166_s11 + $0x48] sm:$0xff] }
 0xeb2   :  { %v4091_v60 = vrot.slane %v4084_v59, %v5496_v27  ;;  %v4098_v61 = vrot.slane %v4083_v58, %v5496_v27  ;;  %v4524_v58 = vld [vmem:[%s6166_s11 + $0x50] sm:$0xff]  ;;  %v4525_v59 = vld [vmem:[%s6166_s11 + $0x58] sm:$0xff] }
 0xeb4   :  { %v4099_v62 = vcombine.low %v4091_v60, %v4098_v61  ;;  %v5283_v60 = vpack.c.bf16 %v4525_v59, %v4524_v58  ;;  %v4526_v61 = vld [vmem:[%s6166_s11 + $0x60] sm:$0xff] }
 0xeb6   :  { %5107 = vmatmul.mubr.msk.f32.vlgmr.msra.gmra.mrb[28].mxu1 %vm498_vm2, %v4099_v62  ;;  %v4527_v62 = vld [vmem:[%s6166_s11 + $0x68] sm:$0xff] }
 0xeb7   :  { %5128 = vmatprep.mubr.msk.f32.mxu1 %vm5354_vm0, %v5355_v6  ;;  %5257 = vmatpush3.bf16.msra.mxu1 %v5256_v2  ;;  %v5286_v13 = vpack.c.bf16 %v4527_v62, %v4526_v61 }
 0xeb8   :  { %5258 = vmatprep.subr.bf16.mxu1 %v5353_v3 }
 0xebb   :  { %5260 = vmatpush3.bf16.msra.mxu1 %v5259_v11 }
 0xebc   :  { %5267 = vmatprep.subr.bf16.mxu1 %v5353_v3 }
 0xf89   :  { %v4168_v12 = vpop.f32.mrb[28].mxu1 }
 0xf8a   :  { %v4172_v16 = vadd.f32 %v4168_v12, %v5915_v51  ;;  %v5108_v17 = vpop.f32.mrb[29].mxu1  ;;  %v4738_v51 = vld [vmem:[%s6164_s9 + $0x40] sm:$0xff] }
 0xf8b   :  { %v5262_v36 = vpack.c.bf16 %v4739_v31, %v4738_v51 }
 0xf8c   :  { %v4180_v18 = vadd.f32 %v4731_v14, %v4172_v16  ;;  %v4744_v16 = vld [vmem:[%s6167_s12] ss:$0 sm:$0xff] }
 0xf8e   :  { %v4182_v19 = vcombine.high %v4180_v18, %v4180_v18  ;;  %v4189_v20 = vrot.slane %v4180_v18, %v5496_v27 }
 0xf90   :  { %v4196_v21 = vrot.slane %v4182_v19, %v5496_v27  ;;  %v4197_v22 = vcombine.high %v4189_v20, %v4189_v20  ;;  %v4205_v24 = vrot.slane %v4189_v20, %v5496_v27 }
 0xf92   :  { %v4198_v23 = vcombine.high %v4196_v21, %v4196_v21  ;;  %v4212_v25 = vrot.slane %v4196_v21, %v5496_v27  ;;  %v4219_v26 = vrot.slane %v4197_v22, %v5496_v27  ;;  %v4227_v32 = vcombine.high %v4205_v24, %v4205_v24 }
 0xf94   :  { %v4226_v28 = vrot.slane %v4198_v23, %v5496_v27  ;;  %v4228_v29 = vcombine.high %v4219_v26, %v4219_v26  ;;  %v4238_v30 = vcombine.low %v4219_v26, %v4212_v25 }
 0xf96   :  { %v4245_v10 = vrot.slane %v4238_v30, %v5496_v27  ;;  %v4325_v33 = vcombine.low %v4205_v24, %v4228_v29  ;;  %v4417_v38 = vcombine.low %v4227_v32, %v4226_v28 }
 0xf98   :  { %v4332_v37 = vrot.slane %v4325_v33, %v5496_v27  ;;  %v4252_v39 = vrot.slane %v4245_v10, %v5496_v27  ;;  %v4424_v47 = vrot.slane %v4417_v38, %v5496_v27 }
 0xf9a   :  { %5118 = vmatmul.mubr.msk.f32.vlgmr.msra.gmra.mrb[34].mxu0 %vm57_vm1, %v4252_v39  ;;  %v4339_v43 = vrot.slane %v4332_v37, %v5496_v27  ;;  %v4431_v52 = vrot.slane %v4424_v47, %v5496_v27  ;;  %v4522_v27 = vld [vmem:[%s6166_s11 + $0x40] sm:$0xff] }
 0xf9b   :  { %5263 = vmatpush3.bf16.msra.mxu0 %v5262_v36  ;;  %5139 = vmatprep.mubr.msk.f32.mxu0 %vm5354_vm0, %v5355_v6  ;;  %v5280_v57 = vpack.c.bf16 %v4523_v56, %v4522_v27 }
 0xf9c   :  { %5129 = vmatmul.mubr.msk.f32.vlgmr.msra.gmra.mrb[30].mxu1 %vm57_vm1, %v4339_v43  ;;  %5264 = vmatprep.subr.bf16.mxu0 %v5353_v3 }
 0xf9d   :  { %5269 = vmatpush3.bf16.msra.mxu1 %v5268_v42  ;;  %5174 = vmatprep.mubr.msk.f32.mxu1 %vm5354_vm0, %v5355_v6  ;;  %v4520_v6 = vld [vmem:[%s6166_s11 + $0x30] sm:$0xff]  ;;  %s5357_s11 = smov [#allocation2]  }
 0xf9e   :  { %5270 = vmatprep.subr.bf16.mxu1 %v5353_v3  ;;  %v5277_v55 = vpack.c.bf16 %v4521_v54, %v4520_v6  ;;  %s4615_s19 = sshll.u32 %s5357_s11, 4  ;;  %s4616_s19 = int_to_ptr.vmem [resolvable:$true] %s4615_s19 }
 0xf9f   :  { %5266 = vmatpush3.bf16.msra.mxu0 %v5265_v46  ;;  %s5329_s2 = scalar_lea.vmem %s4616_s19, 32  ;;  %p5334_p1 = scmp.lt.s32.totalorder %s4616_s19, %s4616_s19 }
 0xfa0   :  { %p5330_p0 = scmp.ne.s32.totalorder %s4616_s19, %s5329_s2  ;;  %p5335_p2 = scmp.lt.s32.totalorder %s5329_s2, %s5329_s2 }
 0xfa1   :  { %5272 = vmatpush3.bf16.msra.mxu1 %v5271_v48 }
 0xfa2   :  { %5140 = vmatmul.mubr.msk.f32.vlgmr.msra.gmra.mrb[36].mxu0 %vm57_vm1, %v4431_v52  ;;  %5273 = vmatprep.subr.bf16.mxu1 %v5353_v3  ;;  %p5336_p3 = por %p5335_p2, %p5334_p1 }
 0xfa4   :  { %p5337_p4 = pnand %p5336_p3, %p5330_p0 }
 0xfa5   :  { %5275 = vmatpush3.bf16.msra.mxu1 %v5274_v53 }
 0xfa6   :  { %5276 = vmatprep.subr.bf16.mxu1 %v5353_v3 }
 0xfa9   :  { %5278 = vmatpush3.bf16.msra.mxu1 %v5277_v55 }
 0xfaa   :  { %5279 = vmatprep.subr.bf16.mxu1 %v5353_v3 }
 0xfad   :  { %5281 = vmatpush3.bf16.msra.mxu1 %v5280_v57 }
 0xfae   :  { %5282 = vmatprep.subr.bf16.mxu1 %v5353_v3 }
 0xfb1   :  { %5284 = vmatpush3.bf16.msra.mxu1 %v5283_v60 }
 0xfb2   :  { %5285 = vmatprep.subr.bf16.mxu1 %v5353_v3 }
 0xfb5   :  { %5287 = vmatpush3.bf16.msra.mxu1 %v5286_v13 }
 0xfb6   :  { %5288 = vmatprep.subr.bf16.mxu1 %v5353_v3  ;;  %v4743_v3 = vld [vmem:[%s6165_s10] ss:$0 sm:$0xff] }
 0xfb9   :  { %5290 = vmatpush3.bf16.msra.mxu1 %v5289_v0 }
0x106d   :  { %v4321_v1 = vpop.f32.mrb[34].mxu0 }
0x106e   :  { %v5119_v2 = vpop.f32.mrb[35].mxu0 }
0x106f   :  { %v4408_v4 = vpop.f32.mrb[30].mxu1 }
0x1070   :  { %v4409_v5 = vadd.f32 %v4408_v4, %v4321_v1  ;;  %v5130_v7 = vpop.f32.mrb[31].mxu1 }
0x1075   :  { %v4500_v8 = vpop.f32.mrb[36].mxu0 }
0x1076   :  { %v4504_v9 = vadd.f32 %v4500_v8, %v4409_v5  ;;  %v5141_v11 = vpop.f32.mrb[37].mxu0 }
0x1078   :  { %v4512_v12 = vadd.f32 %v4743_v3, %v4504_v9 }
0x107a   :  { %v4513_v14 = vmax.f32 %v4512_v12, 0.0 }
0x107c   :  { %5175 = vmatmul.mubr.f32.vlgmr.msra.gmra.mrb[32].mxu1 %v4513_v14 }
0x114f   :  { %v4603_v17 = vpop.f32.mrb[32].mxu1 }
0x1150   :  { %v4604_v18 = vadd.f32 %v4744_v16, %v4603_v17  ;;  %v5176_v19 = vpop.f32.mrb[33].mxu1 }
0x1152   :  { %4608 = vst.msk [vmem:[#allocation2] sm:$0x3] %vm4607_vm6, %v4604_v18 }
0x1153   :  { %5340 = shalt.err (!%p5337_p4)
}
0x1154   :  { %s5341_s21 = scalar_lea.hbm %s6168_s13, 32 }
0x1155   :  { %p5342_p5 = scmp.ne.s32.totalorder %s6168_s13, %s5341_s21  ;;  %p5345_p6 = scmp.lt.u32.totalorder %s5341_s21, %s6168_s13 }
0x1157   :  { %p5347_p7 = pnand %p5345_p6, %p5342_p5 }
0x1159   :  { %5350 = shalt.err (!%p5347_p7)
}
0x115a   :  { %4618 = dma.vmem_to_hbm [thread:$0]  %s4616_s19, 32, %s6168_s13, [#allocation3]  }
0x115b   :  { %5351 = dma.done.wait [#allocation3], 32  }
0x115c   :  { %5352 = vsyncadd [#allocation3], 4294967264 }
0x115d   :  { %4622 = vsyncpa [#allocation3], 1 }

</bundles_post_ra>
